<compile_context>
chip_gen: v6e
topology: v6e:2x2x1
jax: 0.10.0
libtpu: 0.0.40
codegen_flags: <defaults>
</compile_context>

<pallas_src>
import functools

import jax
import jax.numpy as jnp
from jax.experimental import pallas as pl
from jax.experimental.pallas import tpu as pltpu

ALPHA = 0.5          # matches NN(alpha=0.5)
TILE_N = 256         # batch tile; multiple of 256 fills the v6e/v7x MXU (128 on v5e)
K_PAD = 1280         # layer-1 contraction dim padded 1200 -> multiple of 128


def _nn_loss_partial_kernel(x_ref, ye_ref, ys_ref,
                            w1_ref, b1_ref, w2_ref, b2_ref, w3_ref, b3_ref,
                            we_ref, be_ref,
                            part_ref, *, n_valid, tile_n):
    """One batch tile: 3x(FC+ReLU), entity head, partial BCE / MSE-column sums.

    part_ref is a (1, 8, 128) f32 block:
      [0, 0, 0] <- partial BCE-with-logits sum over this tile's valid rows
      [0, 0, 1] <- partial sum_j (1 - ys_j)^2 over this tile's valid columns
    """
    g = pl.program_id(0)

    # ---- fclayer1/2/3 -> ReLU (dropout is identity in eval mode) ----
    # bf16 operands on the MXU, f32 accumulation; bias adds / ReLU in f32.
    h = jnp.dot(x_ref[...], w1_ref[...], preferred_element_type=jnp.float32)
    h = jnp.maximum(h + b1_ref[...], 0.0)
    h = jnp.dot(h.astype(jnp.bfloat16), w2_ref[...],
                preferred_element_type=jnp.float32)
    h = jnp.maximum(h + b2_ref[...], 0.0)
    h = jnp.dot(h.astype(jnp.bfloat16), w3_ref[...],
                preferred_element_type=jnp.float32)
    h = jnp.maximum(h + b3_ref[...], 0.0)

    # ---- entity head: logits (tile_n, 1), kept in f32 ----
    x = jnp.dot(h, we_ref[...], preferred_element_type=jnp.float32) + be_ref[...]

    # ---- BCEWithLogitsLoss(size_average=False): masked partial sum ----
    y = ye_ref[...]
    bce_elem = jnp.maximum(x, 0.0) - x * y + jnp.log1p(jnp.exp(-jnp.abs(x)))
    row = jax.lax.broadcasted_iota(jnp.int32, bce_elem.shape, 0) + g * tile_n
    bce_part = jnp.sum(jnp.where(row < n_valid, bce_elem, 0.0))

    # ---- closed-form MSE term ----
    # softmax over the size-1 sentence axis == 1.0 exactly, so the PyTorch
    # (N,1)-vs-(N,) broadcast MSE equals N * sum_j (1 - ys_j)^2.  Each tile
    # contributes the column partial sum over its slice of ys.
    ys = ys_ref[...]                                              # (1, tile_n)
    col = jax.lax.broadcasted_iota(jnp.int32, ys.shape, 1) + g * tile_n
    d = jnp.where(col < n_valid, 1.0 - ys, 0.0)
    col_part = jnp.sum(d * d)

    # ---- single unmasked store of the lane-dense partial block ----
    ri = jax.lax.broadcasted_iota(jnp.int32, part_ref.shape, 1)
    ci = jax.lax.broadcasted_iota(jnp.int32, part_ref.shape, 2)
    first_row = ri == 0
    part_ref[...] = jnp.where(first_row & (ci == 0), bce_part,
                              jnp.where(first_row & (ci == 1), col_part, 0.0))


def nn_multitask_loss(X, y_entity, y_sentence, params):
    """Computes NN.forward(X, y_entity, y_sentence) (the scalar loss)."""
    N, D = X.shape
    (w1, b1, w2, b2, w3, b3, we, be, ws, bs) = params
    del ws, bs  # sentence head cannot affect the loss (softmax over size-1 dim == 1)

    G = (N + TILE_N - 1) // TILE_N
    n_pad = G * TILE_N

    # Pad batch to a multiple of TILE_N (masked in-kernel) and the layer-1
    # contraction dim to K_PAD lanes; cast matmul operands to bf16.
    x_p = jnp.pad(X.astype(jnp.float32),
                  ((0, n_pad - N), (0, K_PAD - D))).astype(jnp.bfloat16)
    w1_p = jnp.pad(w1.astype(jnp.float32),
                   ((0, K_PAD - D), (0, 0))).astype(jnp.bfloat16)
    w2_b = w2.astype(jnp.bfloat16)
    w3_b = w3.astype(jnp.bfloat16)

    ye = jnp.pad(y_entity.astype(jnp.float32).reshape(N, 1),
                 ((0, n_pad - N), (0, 0)))
    ys = jnp.pad(y_sentence.astype(jnp.float32).reshape(1, N),
                 ((0, 0), (0, n_pad - N)))

    inputs = (x_p, ye, ys,
              w1_p, b1.reshape(1, -1).astype(jnp.float32),
              w2_b, b2.reshape(1, -1).astype(jnp.float32),
              w3_b, b3.reshape(1, -1).astype(jnp.float32),
              we.astype(jnp.float32), be.reshape(1, 1).astype(jnp.float32))

    def resident(arr):
        # Full-array block, same block every grid step -> stays in VMEM.
        return pl.BlockSpec(arr.shape, lambda g: (0,) * arr.ndim)

    in_specs = [
        pl.BlockSpec((TILE_N, K_PAD), lambda g: (g, 0)),   # X tile (pipelined)
        pl.BlockSpec((TILE_N, 1), lambda g: (g, 0)),       # y_entity tile
        pl.BlockSpec((1, TILE_N), lambda g: (0, g)),       # y_sentence tile
    ] + [resident(a) for a in inputs[3:]]

    kernel = functools.partial(_nn_loss_partial_kernel, n_valid=N, tile_n=TILE_N)

    partials = pl.pallas_call(
        kernel,
        out_shape=jax.ShapeDtypeStruct((G, 8, 128), jnp.float32),
        grid=(G,),
        in_specs=in_specs,
        out_specs=pl.BlockSpec((1, 8, 128), lambda g: (g, 0, 0)),
        compiler_params=pltpu.CompilerParams(
            dimension_semantics=("parallel",)),
    )(*inputs)

    bce = jnp.sum(partials[:, 0, 0])
    col = jnp.sum(partials[:, 0, 1])
    mse = jnp.float32(N) * col
    return ALPHA * bce + (1.0 - ALPHA) * mse


def init_params(key):
    """Deterministic PyTorch-Linear-style init (uniform(-1/sqrt(fan_in), +1/sqrt(fan_in)))."""
    dims = [(1200, 256), (256, 64), (64, 32), (32, 1), (32, 1)]
    params = []
    keys = jax.random.split(key, 2 * len(dims))
    for i, (fin, fout) in enumerate(dims):
        bound = 1.0 / jnp.sqrt(float(fin))
        w = jax.random.uniform(keys[2 * i], (fin, fout), jnp.float32, -bound, bound)
        b = jax.random.uniform(keys[2 * i + 1], (fout,), jnp.float32, -bound, bound)
        params += [w, b]
    # order: w1,b1,w2,b2,w3,b3, wEntity,bEntity, wSentence,bSentence
    return tuple(params)


if __name__ == "__main__":
    key = jax.random.PRNGKey(0)
    k_par, k_x, k_ye, k_ys = jax.random.split(key, 4)

    N = 8  # small batch
    params = init_params(k_par)
    X = jax.random.normal(k_x, (N, 1200), jnp.float32)
    y_entity = jax.random.bernoulli(k_ye, 0.5, (N,)).astype(jnp.float32)
    y_sentence = jax.random.uniform(k_ys, (N,), jnp.float32)

    loss = nn_multitask_loss(X, y_entity, y_sentence, params)
    loss = jax.block_until_ready(loss)
    assert bool(jnp.isfinite(loss)), "loss is not finite"
    print("KERNEL_OK")
</pallas_src>

<mosaic_0001>
module attributes {stable_mosaic.version = 11 : i64} {
  func.func @_nn_loss_partial_kernel(%arg0: i32, %arg1: memref<256x1280xbf16, #tpu.memory_space<vmem>>, %arg2: memref<256x1xf32, #tpu.memory_space<vmem>>, %arg3: memref<1x256xf32, #tpu.memory_space<vmem>>, %arg4: memref<1280x256xbf16, #tpu.memory_space<vmem>>, %arg5: memref<1x256xf32, #tpu.memory_space<vmem>>, %arg6: memref<256x64xbf16, #tpu.memory_space<vmem>>, %arg7: memref<1x64xf32, #tpu.memory_space<vmem>>, %arg8: memref<64x32xbf16, #tpu.memory_space<vmem>>, %arg9: memref<1x32xf32, #tpu.memory_space<vmem>>, %arg10: memref<32x1xf32, #tpu.memory_space<vmem>>, %arg11: memref<1x1xf32, #tpu.memory_space<vmem>>, %arg12: memref<1x8x128xf32, #tpu.memory_space<vmem>>) attributes {dimension_semantics = [#tpu.dimension_semantics<parallel>], iteration_bounds = array<i64: 1>, scalar_prefetch = 0 : i64, scratch_operands = 0 : i64, tpu.core_type = #tpu.core_type<tc>, window_params = [{transform_indices = @transform_0, window_bounds = array<i64: 256, 1280>}, {transform_indices = @transform_1, window_bounds = array<i64: 256, 1>}, {transform_indices = @transform_2, window_bounds = array<i64: 1, 256>}, {pipeline_mode = #tpu.pipeline_mode<synchronous>, transform_indices = @transform_3, window_bounds = array<i64: 1280, 256>}, {pipeline_mode = #tpu.pipeline_mode<synchronous>, transform_indices = @transform_4, window_bounds = array<i64: 1, 256>}, {pipeline_mode = #tpu.pipeline_mode<synchronous>, transform_indices = @transform_5, window_bounds = array<i64: 256, 64>}, {pipeline_mode = #tpu.pipeline_mode<synchronous>, transform_indices = @transform_6, window_bounds = array<i64: 1, 64>}, {pipeline_mode = #tpu.pipeline_mode<synchronous>, transform_indices = @transform_7, window_bounds = array<i64: 64, 32>}, {pipeline_mode = #tpu.pipeline_mode<synchronous>, transform_indices = @transform_8, window_bounds = array<i64: 1, 32>}, {pipeline_mode = #tpu.pipeline_mode<synchronous>, transform_indices = @transform_9, window_bounds = array<i64: 32, 1>}, {pipeline_mode = #tpu.pipeline_mode<synchronous>, transform_indices = @transform_10, window_bounds = array<i64: 1, 1>}, {transform_indices = @transform_11, window_bounds = array<i64: 1, 8, 128>}]} {
    %c0 = arith.constant 0 : index
    %c0_0 = arith.constant 0 : index
    %0 = vector.load %arg1[%c0, %c0_0] : memref<256x1280xbf16, #tpu.memory_space<vmem>>, vector<256x1280xbf16>
    %c0_1 = arith.constant 0 : index
    %c0_2 = arith.constant 0 : index
    %1 = vector.load %arg4[%c0_1, %c0_2] : memref<1280x256xbf16, #tpu.memory_space<vmem>>, vector<1280x256xbf16>
    %cst = arith.constant dense<0.000000e+00> : vector<256x256xf32>
    %2 = tpu.matmul %0, %1, %cst {dimension_numbers = #tpu.dot_dimension_numbers<[1], [0], [0], [1], [0, 0, 1, 1], [], []>} : vector<256x1280xbf16>, vector<1280x256xbf16>, vector<256x256xf32> -> vector<256x256xf32>
    %c0_3 = arith.constant 0 : index
    %c0_4 = arith.constant 0 : index
    %3 = vector.load %arg5[%c0_3, %c0_4] : memref<1x256xf32, #tpu.memory_space<vmem>>, vector<1x256xf32>
    %4 = vector.broadcast %3 : vector<1x256xf32> to vector<256x256xf32>
    %5 = arith.addf %2, %4 : vector<256x256xf32>
    %cst_5 = arith.constant 0.000000e+00 : f32
    %6 = vector.broadcast %cst_5 : f32 to vector<256x256xf32>
    %7 = arith.maximumf %5, %6 : vector<256x256xf32>
    %8 = arith.truncf %7 : vector<256x256xf32> to vector<256x256xbf16>
    %c0_6 = arith.constant 0 : index
    %c0_7 = arith.constant 0 : index
    %9 = vector.load %arg6[%c0_6, %c0_7] : memref<256x64xbf16, #tpu.memory_space<vmem>>, vector<256x64xbf16>
    %cst_8 = arith.constant dense<0.000000e+00> : vector<256x64xf32>
    %10 = tpu.matmul %8, %9, %cst_8 {dimension_numbers = #tpu.dot_dimension_numbers<[1], [0], [0], [1], [0, 0, 1, 1], [], []>} : vector<256x256xbf16>, vector<256x64xbf16>, vector<256x64xf32> -> vector<256x64xf32>
    %c0_9 = arith.constant 0 : index
    %c0_10 = arith.constant 0 : index
    %11 = vector.load %arg7[%c0_9, %c0_10] : memref<1x64xf32, #tpu.memory_space<vmem>>, vector<1x64xf32>
    %12 = vector.broadcast %11 : vector<1x64xf32> to vector<256x64xf32>
    %13 = arith.addf %10, %12 : vector<256x64xf32>
    %cst_11 = arith.constant 0.000000e+00 : f32
    %14 = vector.broadcast %cst_11 : f32 to vector<256x64xf32>
    %15 = arith.maximumf %13, %14 : vector<256x64xf32>
    %16 = arith.truncf %15 : vector<256x64xf32> to vector<256x64xbf16>
    %c0_12 = arith.constant 0 : index
    %c0_13 = arith.constant 0 : index
    %17 = vector.load %arg8[%c0_12, %c0_13] : memref<64x32xbf16, #tpu.memory_space<vmem>>, vector<64x32xbf16>
    %cst_14 = arith.constant dense<0.000000e+00> : vector<256x32xf32>
    %18 = tpu.matmul %16, %17, %cst_14 {dimension_numbers = #tpu.dot_dimension_numbers<[1], [0], [0], [1], [0, 0, 1, 1], [], []>} : vector<256x64xbf16>, vector<64x32xbf16>, vector<256x32xf32> -> vector<256x32xf32>
    %c0_15 = arith.constant 0 : index
    %c0_16 = arith.constant 0 : index
    %19 = vector.load %arg9[%c0_15, %c0_16] : memref<1x32xf32, #tpu.memory_space<vmem>>, vector<1x32xf32>
    %20 = vector.broadcast %19 : vector<1x32xf32> to vector<256x32xf32>
    %21 = arith.addf %18, %20 : vector<256x32xf32>
    %cst_17 = arith.constant 0.000000e+00 : f32
    %22 = vector.broadcast %cst_17 : f32 to vector<256x32xf32>
    %23 = arith.maximumf %21, %22 : vector<256x32xf32>
    %c0_18 = arith.constant 0 : index
    %c0_19 = arith.constant 0 : index
    %24 = vector.load %arg10[%c0_18, %c0_19] : memref<32x1xf32, #tpu.memory_space<vmem>>, vector<32x1xf32>
    %cst_20 = arith.constant dense<0.000000e+00> : vector<256x1xf32>
    %25 = tpu.matmul %23, %24, %cst_20 {dimension_numbers = #tpu.dot_dimension_numbers<[1], [0], [0], [1], [0, 0, 1, 1], [], []>} : vector<256x32xf32>, vector<32x1xf32>, vector<256x1xf32> -> vector<256x1xf32>
    %c0_21 = arith.constant 0 : index
    %c0_22 = arith.constant 0 : index
    %26 = vector.load %arg11[%c0_21, %c0_22] : memref<1x1xf32, #tpu.memory_space<vmem>>, vector<1x1xf32>
    %27 = vector.broadcast %26 : vector<1x1xf32> to vector<256x1xf32>
    %28 = arith.addf %25, %27 : vector<256x1xf32>
    %c0_23 = arith.constant 0 : index
    %c0_24 = arith.constant 0 : index
    %29 = vector.load %arg2[%c0_23, %c0_24] : memref<256x1xf32, #tpu.memory_space<vmem>>, vector<256x1xf32>
    %cst_25 = arith.constant 0.000000e+00 : f32
    %30 = vector.broadcast %cst_25 : f32 to vector<256x1xf32>
    %31 = arith.maximumf %28, %30 : vector<256x1xf32>
    %32 = arith.mulf %28, %29 : vector<256x1xf32>
    %33 = arith.subf %31, %32 : vector<256x1xf32>
    %34 = math.absf %28 : vector<256x1xf32>
    %cst_26 = arith.constant 0.000000e+00 : f32
    %35 = vector.broadcast %cst_26 : f32 to vector<256x1xf32>
    %36 = arith.subf %35, %34 : vector<256x1xf32>
    %37 = math.exp %36 : vector<256x1xf32>
    %38 = math.log1p %37 : vector<256x1xf32>
    %39 = arith.addf %33, %38 : vector<256x1xf32>
    %40 = tpu.iota {dimensions = array<i32: 0>} : vector<256x1xi32>
    %c256_i32 = arith.constant 256 : i32
    %41 = arith.muli %arg0, %c256_i32 : i32
    %42 = vector.broadcast %41 : i32 to vector<256x1xi32>
    %43 = arith.addi %40, %42 : vector<256x1xi32>
    %c8_i32 = arith.constant 8 : i32
    %44 = vector.broadcast %c8_i32 : i32 to vector<256x1xi32>
    %45 = arith.cmpi slt, %43, %44 : vector<256x1xi32>
    %cst_27 = arith.constant 0.000000e+00 : f32
    %46 = vector.broadcast %cst_27 : f32 to vector<256x1xf32>
    %47 = arith.select %45, %39, %46 : vector<256x1xi1>, vector<256x1xf32>
    %48 = vector.shape_cast %47 : vector<256x1xf32> to vector<1x256x1xf32>
    %cst_28 = arith.constant dense<0.000000e+00> : vector<1xf32>
    %49 = vector.multi_reduction <add>, %48, %cst_28 [1, 2] : vector<1x256x1xf32> to vector<1xf32>
    %50 = vector.shape_cast %49 : vector<1xf32> to vector<1x1x1xf32>
    %51 = vector.extract %50[0, 0, 0] : f32 from vector<1x1x1xf32>
    %c0_29 = arith.constant 0 : index
    %c0_30 = arith.constant 0 : index
    %52 = vector.load %arg3[%c0_29, %c0_30] : memref<1x256xf32, #tpu.memory_space<vmem>>, vector<1x256xf32>
    %53 = tpu.iota {dimensions = array<i32: 1>} : vector<1x256xi32>
    %c256_i32_31 = arith.constant 256 : i32
    %54 = arith.muli %arg0, %c256_i32_31 : i32
    %55 = vector.broadcast %54 : i32 to vector<1x256xi32>
    %56 = arith.addi %53, %55 : vector<1x256xi32>
    %c8_i32_32 = arith.constant 8 : i32
    %57 = vector.broadcast %c8_i32_32 : i32 to vector<1x256xi32>
    %58 = arith.cmpi slt, %56, %57 : vector<1x256xi32>
    %cst_33 = arith.constant 1.000000e+00 : f32
    %59 = vector.broadcast %cst_33 : f32 to vector<1x256xf32>
    %60 = arith.subf %59, %52 : vector<1x256xf32>
    %cst_34 = arith.constant 0.000000e+00 : f32
    %61 = vector.broadcast %cst_34 : f32 to vector<1x256xf32>
    %62 = arith.select %58, %60, %61 : vector<1x256xi1>, vector<1x256xf32>
    %63 = arith.mulf %62, %62 : vector<1x256xf32>
    %64 = vector.shape_cast %63 : vector<1x256xf32> to vector<1x1x256xf32>
    %cst_35 = arith.constant dense<0.000000e+00> : vector<1xf32>
    %65 = vector.multi_reduction <add>, %64, %cst_35 [1, 2] : vector<1x1x256xf32> to vector<1xf32>
    %66 = vector.shape_cast %65 : vector<1xf32> to vector<1x1x1xf32>
    %67 = vector.extract %66[0, 0, 0] : f32 from vector<1x1x1xf32>
    %68 = tpu.iota {dimensions = array<i32: 1>} : vector<1x8x128xi32>
    %69 = tpu.iota {dimensions = array<i32: 2>} : vector<1x8x128xi32>
    %c0_i32 = arith.constant 0 : i32
    %70 = vector.broadcast %c0_i32 : i32 to vector<1x8x128xi32>
    %71 = arith.cmpi eq, %68, %70 : vector<1x8x128xi32>
    %c0_i32_36 = arith.constant 0 : i32
    %72 = vector.broadcast %c0_i32_36 : i32 to vector<1x8x128xi32>
    %73 = arith.cmpi eq, %69, %72 : vector<1x8x128xi32>
    %74 = arith.andi %71, %73 : vector<1x8x128xi1>
    %c1_i32 = arith.constant 1 : i32
    %75 = vector.broadcast %c1_i32 : i32 to vector<1x8x128xi32>
    %76 = arith.cmpi eq, %69, %75 : vector<1x8x128xi32>
    %77 = arith.andi %71, %76 : vector<1x8x128xi1>
    %cst_37 = arith.constant 0.000000e+00 : f32
    %78 = vector.broadcast %67 : f32 to vector<1x8x128xf32>
    %79 = vector.broadcast %cst_37 : f32 to vector<1x8x128xf32>
    %80 = arith.select %77, %78, %79 : vector<1x8x128xi1>, vector<1x8x128xf32>
    %81 = vector.broadcast %51 : f32 to vector<1x8x128xf32>
    %82 = arith.select %74, %81, %80 : vector<1x8x128xi1>, vector<1x8x128xf32>
    %c0_38 = arith.constant 0 : index
    %c0_39 = arith.constant 0 : index
    %c0_40 = arith.constant 0 : index
    %83 = vector.load %arg12[%c0_38, %c0_39, %c0_40] : memref<1x8x128xf32, #tpu.memory_space<vmem>>, vector<1x8x128xf32>
    tpu.vector_store %arg12[%c0_38, %c0_39, %c0_40], %82 {strides = array<i32>} : memref<1x8x128xf32, #tpu.memory_space<vmem>>, vector<1x8x128xf32>,
    return
  }
  func.func @transform_0(%arg0: i32) -> (i32, i32) {
    %c0_i32 = arith.constant 0 : i32
    %c0_i32_0 = arith.constant 0 : i32
    return %arg0, %c0_i32 : i32, i32
  }
  func.func @transform_1(%arg0: i32) -> (i32, i32) {
    %c0_i32 = arith.constant 0 : i32
    %c0_i32_0 = arith.constant 0 : i32
    return %arg0, %c0_i32 : i32, i32
  }
  func.func @transform_2(%arg0: i32) -> (i32, i32) {
    %c0_i32 = arith.constant 0 : i32
    %c0_i32_0 = arith.constant 0 : i32
    return %c0_i32, %arg0 : i32, i32
  }
  func.func @transform_3(%arg0: i32) -> (i32, i32) {
    %c0_i32 = arith.constant 0 : i32
    %c0_i32_0 = arith.constant 0 : i32
    %c0_i32_1 = arith.constant 0 : i32
    return %c0_i32, %c0_i32_0 : i32, i32
  }
  func.func @transform_4(%arg0: i32) -> (i32, i32) {
    %c0_i32 = arith.constant 0 : i32
    %c0_i32_0 = arith.constant 0 : i32
    %c0_i32_1 = arith.constant 0 : i32
    return %c0_i32, %c0_i32_0 : i32, i32
  }
  func.func @transform_5(%arg0: i32) -> (i32, i32) {
    %c0_i32 = arith.constant 0 : i32
    %c0_i32_0 = arith.constant 0 : i32
    %c0_i32_1 = arith.constant 0 : i32
    return %c0_i32, %c0_i32_0 : i32, i32
  }
  func.func @transform_6(%arg0: i32) -> (i32, i32) {
    %c0_i32 = arith.constant 0 : i32
    %c0_i32_0 = arith.constant 0 : i32
    %c0_i32_1 = arith.constant 0 : i32
    return %c0_i32, %c0_i32_0 : i32, i32
  }
  func.func @transform_7(%arg0: i32) -> (i32, i32) {
    %c0_i32 = arith.constant 0 : i32
    %c0_i32_0 = arith.constant 0 : i32
    %c0_i32_1 = arith.constant 0 : i32
    return %c0_i32, %c0_i32_0 : i32, i32
  }
  func.func @transform_8(%arg0: i32) -> (i32, i32) {
    %c0_i32 = arith.constant 0 : i32
    %c0_i32_0 = arith.constant 0 : i32
    %c0_i32_1 = arith.constant 0 : i32
    return %c0_i32, %c0_i32_0 : i32, i32
  }
  func.func @transform_9(%arg0: i32) -> (i32, i32) {
    %c0_i32 = arith.constant 0 : i32
    %c0_i32_0 = arith.constant 0 : i32
    %c0_i32_1 = arith.constant 0 : i32
    return %c0_i32, %c0_i32_0 : i32, i32
  }
  func.func @transform_10(%arg0: i32) -> (i32, i32) {
    %c0_i32 = arith.constant 0 : i32
    %c0_i32_0 = arith.constant 0 : i32
    %c0_i32_1 = arith.constant 0 : i32
    return %c0_i32, %c0_i32_0 : i32, i32
  }
  func.func @transform_11(%arg0: i32) -> (i32, i32, i32) {
    %c0_i32 = arith.constant 0 : i32
    %c0_i32_0 = arith.constant 0 : i32
    %c0_i32_1 = arith.constant 0 : i32
    return %arg0, %c0_i32, %c0_i32_0 : i32, i32, i32
  }
}

</mosaic_0001>

<bundles_post_ra>
// kernel: tpu_custom_call.1
= control target key start
LH: loop header
LB: loop body
LE: loop exit
PB: predicated region body
PF: predicated region fallthrough
CT: control target
= control target key end

     0   :  { %s7048_s0 = inlined_call_operand.hbm [shape: bf16[256,1280], index: 0, kind: input, shape index: {}]   ;;  %s7049_s1 = inlined_call_operand.vmem [shape: f32[256,1], index: 1, kind: input, shape index: {}]   ;;  %s7050_s2 = inlined_call_operand.vmem [shape: f32[1,256], index: 2, kind: input, shape index: {}]   ;;  %s7051_s3 = inlined_call_operand.hbm [shape: bf16[1280,256], index: 3, kind: input, shape index: {}]   ;;  %s7052_s4 = inlined_call_operand.vmem [shape: f32[1,256], index: 4, kind: input, shape index: {}]   ;;  %s7053_s5 = inlined_call_operand.vmem [shape: bf16[256,64], index: 5, kind: input, shape index: {}]   ;;  %s7054_s6 = inlined_call_operand.vmem [shape: f32[1,64], index: 6, kind: input, shape index: {}]   ;;  %s7055_s7 = inlined_call_operand.vmem [shape: bf16[64,32], index: 7, kind: input, shape index: {}]   ;;  %s7056_s8 = inlined_call_operand.vmem [shape: f32[1,32], index: 8, kind: input, shape index: {}]   ;;  %s7057_s9 = inlined_call_operand.vmem [shape: f32[32,1], index: 9, kind: input, shape index: {}]   ;;  %s7058_s10 = inlined_call_operand.<no memory space> [shape: f32[1,1], index: 10, kind: input, shape index: {}]   ;;  %s7059_s11 = inlined_call_operand.hbm [shape: f32[1,8,128], index: 11, kind: output, shape index: {}]  }
   0x1   :  { %v16_v0 = vstv %s7058_s10 }
   0x2   :  { %17 = vst [vmem:[#allocation2] sm:$0x1] %v16_v0 }
   0x3   :  { %18 = vsyncpa [#allocation4], 0 }
   0x4   :  { %19 = vsyncpa [#allocation7], 0 }
   0x5   :  { %20 = vsyncpa [#allocation5], 0  ;;  %s6100_s19 = smov [#allocation3]  }
   0x6   :  { %s26_s20 = sshll.u32 %s6100_s19, 4  ;;  %s27_s20 = int_to_ptr.vmem [resolvable:$true] %s26_s20 }
   0x7   :  { %s6042_s21 = scalar_lea.vmem %s27_s20, 20480  ;;  %p6047_p1 = scmp.lt.s32.totalorder %s27_s20, %s27_s20 }
   0x8   :  { %p6043_p0 = scmp.ne.s32.totalorder %s27_s20, %s6042_s21  ;;  %p6048_p2 = scmp.lt.s32.totalorder %s6042_s21, %s6042_s21 }
   0xa   :  { %p6049_p3 = por %p6048_p2, %p6047_p1 }
   0xc   :  { %p6050_p4 = pnand %p6049_p3, %p6043_p0 }
   0xe   :  { %6053 = shalt.err (!%p6050_p4)
}
   0xf   :  { %s6101_s22 = smov 640   ;;  %s6102_s23 = smov 40  }
  0x10   :  { %32 = dma.hbm_to_vmem [thread:$0]  %s7048_s0, 20480, %s27_s20, [#allocation4], %s6101_s22, %s6101_s22, %s6102_s23  }
  0x11   :  { %s6103_s10 = smov [#allocation6]  }
  0x12   :  { %s42_s26 = sshll.u32 %s6103_s10, 4  ;;  %s43_s26 = int_to_ptr.vmem [resolvable:$true] %s42_s26 }
  0x13   :  { %s6062_s27 = scalar_lea.vmem %s43_s26, 20480  ;;  %p6067_p6 = scmp.lt.s32.totalorder %s43_s26, %s43_s26 }
  0x14   :  { %p6063_p5 = scmp.ne.s32.totalorder %s43_s26, %s6062_s27  ;;  %p6068_p7 = scmp.lt.s32.totalorder %s6062_s27, %s6062_s27 }
  0x16   :  { %p6069_p8 = por %p6068_p7, %p6067_p6 }
  0x18   :  { %p6070_p9 = pnand %p6069_p8, %p6063_p5 }
  0x1a   :  { %6073 = shalt.err (!%p6070_p9)
}
  0x1b   :  { %s6104_s28 = smov 128   ;;  %s6105_s29 = smov 8  }
  0x1c   :  { %48 = dma.hbm_to_vmem [thread:$0]  %s7051_s3, 20480, %s43_s26, [#allocation7], %s6104_s28, %s6104_s28, %s6105_s29  }
  0x1d   :  { %6094 = dma.done.wait [#allocation4], 20480  }
  0x1e   :  { %6095 = vsyncadd [#allocation4], 4294946816 }
  0x1f   :  { %6096 = dma.done.wait [#allocation7], 20480  }
  0x20   :  { %6097 = vsyncadd [#allocation7], 4294946816  ;;  %v5530_v1 = vld [vmem:[#allocation6 + $0x74] ss:$8 sps:$4 sm:$0xff]   ;;  %v5532_v2 = vld [vmem:[#allocation6 + $0x70] ss:$8 sps:$4 sm:$0xff]  }
  0x21   :  { %2002 = vmatprep.subr.bf16.mxu0 %v5530_v1  ;;  %v5533_v3 = vld [vmem:[#allocation6 + $0x174] ss:$8 sps:$4 sm:$0xff]   ;;  %v5535_v4 = vld [vmem:[#allocation6 + $0x170] ss:$8 sps:$4 sm:$0xff]   ;;  %v5536_v5 = vld [vmem:[#allocation6 + $0x64] ss:$8 sps:$4 sm:$0xff]  }
  0x22   :  { %2003 = vmatpush1.bf16.msra.mxu0 %v5532_v2  ;;  %v5538_v6 = vld [vmem:[#allocation6 + $0x60] ss:$8 sps:$4 sm:$0xff]   ;;  %2195 = vmatprep.subr.bf16.mxu1 %v5533_v3  ;;  %v5539_v7 = vld [vmem:[#allocation6 + $0x164] ss:$8 sps:$4 sm:$0xff]   ;;  %v5542_v9 = vld [vmem:[#allocation6 + $0x54] ss:$8 sps:$4 sm:$0xff]  }
  0x23   :  { %2196 = vmatpush1.bf16.msra.mxu1 %v5535_v4  ;;  %2004 = vmatprep.subr.bf16.mxu0 %v5536_v5  ;;  %v5541_v8 = vld [vmem:[#allocation6 + $0x160] ss:$8 sps:$4 sm:$0xff]   ;;  %v5544_v10 = vld [vmem:[#allocation6 + $0x50] ss:$8 sps:$4 sm:$0xff]   ;;  %v5545_v11 = vld [vmem:[#allocation6 + $0x154] ss:$8 sps:$4 sm:$0xff]  }
  0x24   :  { %2197 = vmatprep.subr.bf16.mxu1 %v5539_v7  ;;  %v5548_v12 = vld [vmem:[#allocation6 + $0x44] ss:$8 sps:$4 sm:$0xff]   ;;  %v5547_v13 = vld [vmem:[#allocation6 + $0x150] ss:$8 sps:$4 sm:$0xff]   ;;  %v5550_v15 = vld [vmem:[#allocation6 + $0x40] ss:$8 sps:$4 sm:$0xff]  }
  0x25   :  { %v5551_v14 = vld [vmem:[#allocation6 + $0x144] ss:$8 sps:$4 sm:$0xff]   ;;  %v5554_v16 = vld [vmem:[#allocation6 + $0x34] ss:$8 sps:$4 sm:$0xff]   ;;  %v5553_v17 = vld [vmem:[#allocation6 + $0x140] ss:$8 sps:$4 sm:$0xff]  }
  0x26   :  { %2005 = vmatpush1.bf16.msra.mxu0 %v5538_v6  ;;  %v5557_v18 = vld [vmem:[#allocation6 + $0x134] ss:$8 sps:$4 sm:$0xff]   ;;  %v5556_v19 = vld [vmem:[#allocation6 + $0x30] ss:$8 sps:$4 sm:$0xff]   ;;  %v5560_v20 = vld [vmem:[#allocation6 + $0x24] ss:$8 sps:$4 sm:$0xff]  }
  0x27   :  { %2006 = vmatprep.subr.bf16.mxu0 %v5542_v9  ;;  %2198 = vmatpush1.bf16.msra.mxu1 %v5541_v8  ;;  %v5559_v21 = vld [vmem:[#allocation6 + $0x130] ss:$8 sps:$4 sm:$0xff]   ;;  %v5563_v22 = vld [vmem:[#allocation6 + $0x124] ss:$8 sps:$4 sm:$0xff]   ;;  %v5562_v23 = vld [vmem:[#allocation6 + $0x20] ss:$8 sps:$4 sm:$0xff]  }
  0x28   :  { %2199 = vmatprep.subr.bf16.mxu1 %v5545_v11  ;;  %v5566_v24 = vld [vmem:[#allocation6 + $0x14] ss:$8 sps:$4 sm:$0xff]   ;;  %v5565_v25 = vld [vmem:[#allocation6 + $0x120] ss:$8 sps:$4 sm:$0xff]   ;;  %v5568_v27 = vld [vmem:[#allocation6 + $0x10] ss:$8 sps:$4 sm:$0xff]  }
  0x29   :  { %v5569_v26 = vld [vmem:[#allocation6 + $0x114] ss:$8 sps:$4 sm:$0xff]   ;;  %v5572_v28 = vld [vmem:[#allocation6 + $0x4] ss:$8 sps:$4 sm:$0xff]   ;;  %v5571_v29 = vld [vmem:[#allocation6 + $0x110] ss:$8 sps:$4 sm:$0xff]  }
  0x2a   :  { %2007 = vmatpush1.bf16.msra.mxu0 %v5544_v10  ;;  %v5575_v30 = vld [vmem:[#allocation6 + $0x104] ss:$8 sps:$4 sm:$0xff]   ;;  %v5574_v31 = vld [vmem:[#allocation6] ss:$8 sps:$4 sm:$0xff]   ;;  %v5578_v32 = vld [vmem:[#allocation6 + $0xf4] ss:$8 sps:$4 sm:$0xff]  }
  0x2b   :  { %2008 = vmatprep.subr.bf16.mxu0 %v5548_v12  ;;  %2200 = vmatpush1.bf16.msra.mxu1 %v5547_v13  ;;  %v5577_v33 = vld [vmem:[#allocation6 + $0x100] ss:$8 sps:$4 sm:$0xff]   ;;  %v5581_v34 = vld [vmem:[#allocation6 + $0x1f4] ss:$8 sps:$4 sm:$0xff]   ;;  %v5580_v35 = vld [vmem:[#allocation6 + $0xf0] ss:$8 sps:$4 sm:$0xff]  }
  0x2c   :  { %2201 = vmatprep.subr.bf16.mxu1 %v5551_v14  ;;  %v5584_v36 = vld [vmem:[#allocation6 + $0xe4] ss:$8 sps:$4 sm:$0xff]   ;;  %v5583_v37 = vld [vmem:[#allocation6 + $0x1f0] ss:$8 sps:$4 sm:$0xff]   ;;  %v5586_v39 = vld [vmem:[#allocation6 + $0xe0] ss:$8 sps:$4 sm:$0xff]  }
  0x2d   :  { %v5587_v38 = vld [vmem:[#allocation6 + $0x1e4] ss:$8 sps:$4 sm:$0xff]   ;;  %v5590_v40 = vld [vmem:[#allocation6 + $0xd4] ss:$8 sps:$4 sm:$0xff]   ;;  %v5589_v41 = vld [vmem:[#allocation6 + $0x1e0] ss:$8 sps:$4 sm:$0xff]  }
  0x2e   :  { %2009 = vmatpush1.bf16.msra.mxu0 %v5550_v15  ;;  %v5593_v42 = vld [vmem:[#allocation6 + $0x1d4] ss:$8 sps:$4 sm:$0xff]   ;;  %v5592_v43 = vld [vmem:[#allocation6 + $0xd0] ss:$8 sps:$4 sm:$0xff]   ;;  %v5596_v44 = vld [vmem:[#allocation6 + $0xc4] ss:$8 sps:$4 sm:$0xff]  }
  0x2f   :  { %2010 = vmatprep.subr.bf16.mxu0 %v5554_v16  ;;  %2202 = vmatpush1.bf16.msra.mxu1 %v5553_v17  ;;  %v5595_v45 = vld [vmem:[#allocation6 + $0x1d0] ss:$8 sps:$4 sm:$0xff]   ;;  %v5599_v46 = vld [vmem:[#allocation6 + $0x1c4] ss:$8 sps:$4 sm:$0xff]   ;;  %v5598_v47 = vld [vmem:[#allocation6 + $0xc0] ss:$8 sps:$4 sm:$0xff]  }
  0x30   :  { %2203 = vmatprep.subr.bf16.mxu1 %v5557_v18  ;;  %v5627_v48 = vld [vmem:[#allocation3 + $0x4] ss:$40 sps:$4 sm:$0xff]   ;;  %v5602_v49 = vld [vmem:[#allocation6 + $0xb4] ss:$8 sps:$4 sm:$0xff]   ;;  %v5601_v50 = vld [vmem:[#allocation6 + $0x1c0] ss:$8 sps:$4 sm:$0xff]  }
  0x31   :  { %2034 = vmatprep.mubr.bf16.mxu0 %v5627_v48  ;;  %v5605_v51 = vld [vmem:[#allocation6 + $0x1b4] ss:$8 sps:$4 sm:$0xff]   ;;  %v5604_v53 = vld [vmem:[#allocation6 + $0xb0] ss:$8 sps:$4 sm:$0xff]   ;;  %v5608_v54 = vld [vmem:[#allocation6 + $0xa4] ss:$8 sps:$4 sm:$0xff]  }
  0x32   :  { %2011 = vmatpush1.bf16.msra.mxu0 %v5556_v19  ;;  %v5634_v52 = vld [vmem:[#allocation3 + $0xc] ss:$40 sps:$4 sm:$0xff]   ;;  %v5607_v55 = vld [vmem:[#allocation6 + $0x1b0] ss:$8 sps:$4 sm:$0xff]   ;;  %v5610_v57 = vld [vmem:[#allocation6 + $0xa0] ss:$8 sps:$4 sm:$0xff]  }
  0x33   :  { %2012 = vmatprep.subr.bf16.mxu0 %v5560_v20  ;;  %2204 = vmatpush1.bf16.msra.mxu1 %v5559_v21  ;;  %v5611_v56 = vld [vmem:[#allocation6 + $0x1a4] ss:$8 sps:$4 sm:$0xff]   ;;  %v5614_v58 = vld [vmem:[#allocation6 + $0x94] ss:$8 sps:$4 sm:$0xff]   ;;  %v5613_v59 = vld [vmem:[#allocation6 + $0x1a0] ss:$8 sps:$4 sm:$0xff]  }
  0x34   :  { %2205 = vmatprep.subr.bf16.mxu1 %v5563_v22  ;;  %2227 = vmatprep.mubr.bf16.mxu1 %v5634_v52  ;;  %v5617_v60 = vld [vmem:[#allocation6 + $0x194] ss:$8 sps:$4 sm:$0xff]   ;;  %v5616_v61 = vld [vmem:[#allocation6 + $0x90] ss:$8 sps:$4 sm:$0xff]   ;;  %v5620_v62 = vld [vmem:[#allocation6 + $0x84] ss:$8 sps:$4 sm:$0xff]  }
  0x35   :  { %v5619_v63 = vld [vmem:[#allocation6 + $0x190] ss:$8 sps:$4 sm:$0xff]   ;;  %v5623_v0 = vld [vmem:[#allocation6 + $0x184] ss:$8 sps:$4 sm:$0xff]   ;;  %v5622_v1 = vld [vmem:[#allocation6 + $0x80] ss:$8 sps:$4 sm:$0xff]  }
  0x36   :  { %2013 = vmatpush1.bf16.msra.mxu0 %v5562_v23  ;;  %v5631_v2 = vld [vmem:[#allocation6 + $0x274] ss:$8 sps:$4 sm:$0xff]   ;;  %v5628_v3 = vld [vmem:[#allocation6 + $0x180] ss:$8 sps:$4 sm:$0xff]   ;;  %v5629_v5 = vld [vmem:[#allocation6 + $0x270] ss:$8 sps:$4 sm:$0xff]  }
  0x37   :  { %2014 = vmatprep.subr.bf16.mxu0 %v5566_v24  ;;  %2206 = vmatpush1.bf16.msra.mxu1 %v5565_v25  ;;  %v5625_v4 = vld [vmem:[#allocation3] ss:$40 sps:$4 sm:$0xff]   ;;  %v5635_v7 = vld [vmem:[#allocation3 + $0x54] ss:$40 sps:$4 sm:$0xff]   ;;  %v5640_v8 = vld [vmem:[#allocation6 + $0x264] ss:$8 sps:$4 sm:$0xff]  }
  0x38   :  { %2207 = vmatprep.subr.bf16.mxu1 %v5569_v26  ;;  %v5632_v6 = vld [vmem:[#allocation3 + $0x8] ss:$40 sps:$4 sm:$0xff]   ;;  %v5641_v9 = vld [vmem:[#allocation3 + $0x5c] ss:$40 sps:$4 sm:$0xff]   ;;  %v5643_v13 = vld [vmem:[#allocation3 + $0x58] ss:$40 sps:$4 sm:$0xff]  }
  0x39   :  { %v5638_v10 = vld [vmem:[#allocation6 + $0x260] ss:$8 sps:$4 sm:$0xff]   ;;  %v5649_v11 = vld [vmem:[#allocation6 + $0x254] ss:$8 sps:$4 sm:$0xff]   ;;  %v5637_v12 = vld [vmem:[#allocation3 + $0x50] ss:$40 sps:$4 sm:$0xff]  }
  0x3a   :  { %2015 = vmatpush1.bf16.msra.mxu0 %v5568_v27  ;;  %v5644_v14 = vld [vmem:[#allocation3 + $0xa4] ss:$40 sps:$4 sm:$0xff]   ;;  %v5647_v15 = vld [vmem:[#allocation6 + $0x250] ss:$8 sps:$4 sm:$0xff]   ;;  %v5656_v18 = vld [vmem:[#allocation6 + $0x240] ss:$8 sps:$4 sm:$0xff]  }
  0x3b   :  { %2016 = vmatprep.subr.bf16.mxu0 %v5572_v28  ;;  %2208 = vmatpush1.bf16.msra.mxu1 %v5571_v29  ;;  %v5658_v16 = vld [vmem:[#allocation6 + $0x244] ss:$8 sps:$4 sm:$0xff]   ;;  %v5667_v19 = vld [vmem:[#allocation6 + $0x234] ss:$8 sps:$4 sm:$0xff]   ;;  %v5646_v20 = vld [vmem:[#allocation3 + $0xa0] ss:$40 sps:$4 sm:$0xff]  }
  0x3c   :  { %2209 = vmatprep.subr.bf16.mxu1 %v5575_v30  ;;  %v5650_v17 = vld [vmem:[#allocation3 + $0xac] ss:$40 sps:$4 sm:$0xff]   ;;  %v5652_v21 = vld [vmem:[#allocation3 + $0xa8] ss:$40 sps:$4 sm:$0xff]   ;;  %v5659_v24 = vld [vmem:[#allocation3 + $0xfc] ss:$40 sps:$4 sm:$0xff]  }
  0x3d   :  { %v5653_v22 = vld [vmem:[#allocation3 + $0xf4] ss:$40 sps:$4 sm:$0xff]   ;;  %v5665_v23 = vld [vmem:[#allocation6 + $0x230] ss:$8 sps:$4 sm:$0xff]   ;;  %v5676_v27 = vld [vmem:[#allocation6 + $0x224] ss:$8 sps:$4 sm:$0xff]  }
  0x3e   :  { %2017 = vmatpush1.bf16.msra.mxu0 %v5574_v31  ;;  %v5707_v25 = vld [vmem:[#allocation6 + $0x370] ss:$8 sps:$4 sm:$0xff]   ;;  %v5709_v26 = vld [vmem:[#allocation6 + $0x374] ss:$8 sps:$4 sm:$0xff]   ;;  %v5712_v28 = vld [vmem:[#allocation6 + $0x364] ss:$8 sps:$4 sm:$0xff]  }
  0x3f   :  { %2018 = vmatprep.subr.bf16.mxu0 %v5578_v32  ;;  %2210 = vmatpush1.bf16.msra.mxu1 %v5577_v33  ;;  %v5710_v29 = vld [vmem:[#allocation6 + $0x360] ss:$8 sps:$4 sm:$0xff]   ;;  %v5655_v31 = vld [vmem:[#allocation3 + $0xf0] ss:$40 sps:$4 sm:$0xff]   ;;  %v5685_v32 = vld [vmem:[#allocation6 + $0x214] ss:$8 sps:$4 sm:$0xff]  }
  0x40   :  { %2211 = vmatprep.subr.bf16.mxu1 %v5581_v34  ;;  %v5674_v30 = vld [vmem:[#allocation6 + $0x220] ss:$8 sps:$4 sm:$0xff]   ;;  %v5662_v33 = vld [vmem:[#allocation3 + $0x144] ss:$40 sps:$4 sm:$0xff]   ;;  %v5737_v48 = vld [vmem:[#allocation6 + $0x330] ss:$8 sps:$4 sm:$0xff]  }
  0x41   :  { %v5661_v34 = vld [vmem:[#allocation3 + $0xf8] ss:$40 sps:$4 sm:$0xff]   ;;  %v5742_v52 = vld [vmem:[#allocation6 + $0x324] ss:$8 sps:$4 sm:$0xff]   ;;  %vm3446_vm0 = vcmask 523264   ;;  %vm3699_vm1 = vcmask 261120  }
  0x42   :  { %2019 = vmatpush2.bf16.msra.mxu0 %v5580_v35  ;;  %v5722_v35 = vld [vmem:[#allocation6 + $0x350] ss:$8 sps:$4 sm:$0xff]   ;;  %vm4728_vm4 = vcmask 7168   ;;  %vm4825_vm5 = vcmask 1040384  }
  0x43   :  { %2020 = vmatprep.subr.bf16.mxu0 %v5584_v36  ;;  %2212 = vmatpush2.bf16.msra.mxu1 %v5583_v37  ;;  %v5724_v36 = vld [vmem:[#allocation6 + $0x354] ss:$8 sps:$4 sm:$0xff]  }
  0x44   :  { %2213 = vmatprep.subr.bf16.mxu1 %v5587_v38  ;;  %v5668_v37 = vld [vmem:[#allocation3 + $0x14c] ss:$40 sps:$4 sm:$0xff]   ;;  %v5683_v38 = vld [vmem:[#allocation6 + $0x210] ss:$8 sps:$4 sm:$0xff]  }
  0x46   :  { %2021 = vmatpush2.bf16.msra.mxu0 %v5586_v39  ;;  %v5694_v39 = vld [vmem:[#allocation6 + $0x204] ss:$8 sps:$4 sm:$0xff]  }
  0x47   :  { %2022 = vmatprep.subr.bf16.mxu0 %v5590_v40  ;;  %2214 = vmatpush2.bf16.msra.mxu1 %v5589_v41  ;;  %v5727_v40 = vld [vmem:[#allocation6 + $0x344] ss:$8 sps:$4 sm:$0xff]   ;;  %v5725_v41 = vld [vmem:[#allocation6 + $0x340] ss:$8 sps:$4 sm:$0xff]  }
  0x48   :  { %2215 = vmatprep.subr.bf16.mxu1 %v5593_v42  ;;  %v5692_v42 = vld [vmem:[#allocation6 + $0x200] ss:$8 sps:$4 sm:$0xff]  }
  0x4a   :  { %2023 = vmatpush2.bf16.msra.mxu0 %v5592_v43  ;;  %v5664_v43 = vld [vmem:[#allocation3 + $0x140] ss:$40 sps:$4 sm:$0xff]  }
  0x4b   :  { %2024 = vmatprep.subr.bf16.mxu0 %v5596_v44  ;;  %2216 = vmatpush2.bf16.msra.mxu1 %v5595_v45  ;;  %v5703_v44 = vld [vmem:[#allocation6 + $0x2f4] ss:$8 sps:$4 sm:$0xff]  }
  0x4c   :  { %2217 = vmatprep.subr.bf16.mxu1 %v5599_v46  ;;  %v5739_v45 = vld [vmem:[#allocation6 + $0x334] ss:$8 sps:$4 sm:$0xff]   ;;  %v5670_v46 = vld [vmem:[#allocation3 + $0x148] ss:$40 sps:$4 sm:$0xff]  }
  0x4e   :  { %2025 = vmatpush2.bf16.msra.mxu0 %v5598_v47  ;;  %v5671_v47 = vld [vmem:[#allocation3 + $0x194] ss:$40 sps:$4 sm:$0xff]  }
  0x4f   :  { %2026 = vmatprep.subr.bf16.mxu0 %v5602_v49  ;;  %2218 = vmatpush2.bf16.msra.mxu1 %v5601_v50  ;;  %v5677_v49 = vld [vmem:[#allocation3 + $0x19c] ss:$40 sps:$4 sm:$0xff]   ;;  %v5701_v50 = vld [vmem:[#allocation6 + $0x2f0] ss:$8 sps:$4 sm:$0xff]  }
  0x50   :  { %2219 = vmatprep.subr.bf16.mxu1 %v5605_v51  ;;  %v5718_v51 = vld [vmem:[#allocation6 + $0x2e4] ss:$8 sps:$4 sm:$0xff]  }
  0x52   :  { %2027 = vmatpush2.bf16.msra.mxu0 %v5604_v53  ;;  %v5740_v53 = vld [vmem:[#allocation6 + $0x320] ss:$8 sps:$4 sm:$0xff]  }
  0x53   :  { %2028 = vmatprep.subr.bf16.mxu0 %v5608_v54  ;;  %2220 = vmatpush2.bf16.msra.mxu1 %v5607_v55  ;;  %v5716_v54 = vld [vmem:[#allocation6 + $0x2e0] ss:$8 sps:$4 sm:$0xff]   ;;  %v5754_v55 = vld [vmem:[#allocation6 + $0x314] ss:$8 sps:$4 sm:$0xff]  }
  0x54   :  { %2221 = vmatprep.subr.bf16.mxu1 %v5611_v56  ;;  %v5733_v56 = vld [vmem:[#allocation6 + $0x2d4] ss:$8 sps:$4 sm:$0xff]  }
  0x56   :  { %2029 = vmatpush2.bf16.msra.mxu0 %v5610_v57  ;;  %v5673_v57 = vld [vmem:[#allocation3 + $0x190] ss:$40 sps:$4 sm:$0xff]  }
  0x57   :  { %2030 = vmatprep.subr.bf16.mxu0 %v5614_v58  ;;  %2222 = vmatpush2.bf16.msra.mxu1 %v5613_v59  ;;  %v5679_v58 = vld [vmem:[#allocation3 + $0x198] ss:$40 sps:$4 sm:$0xff]   ;;  %v5680_v59 = vld [vmem:[#allocation3 + $0x1e4] ss:$40 sps:$4 sm:$0xff]  }
  0x58   :  { %2223 = vmatprep.subr.bf16.mxu1 %v5617_v60  ;;  %v5752_v60 = vld [vmem:[#allocation6 + $0x310] ss:$8 sps:$4 sm:$0xff]  }
  0x5a   :  { %2031 = vmatpush2.bf16.msra.mxu0 %v5616_v61  ;;  %v5686_v61 = vld [vmem:[#allocation3 + $0x1ec] ss:$40 sps:$4 sm:$0xff]  }
  0x5b   :  { %2032 = vmatprep.subr.bf16.mxu0 %v5620_v62  ;;  %2224 = vmatpush2.bf16.msra.mxu1 %v5619_v63  ;;  %v5731_v62 = vld [vmem:[#allocation6 + $0x2d0] ss:$8 sps:$4 sm:$0xff]   ;;  %v5748_v63 = vld [vmem:[#allocation6 + $0x2c4] ss:$8 sps:$4 sm:$0xff]  }
  0x5c   :  { %2225 = vmatprep.subr.bf16.mxu1 %v5623_v0  ;;  %v5757_v0 = vld [vmem:[#allocation6 + $0x304] ss:$8 sps:$4 sm:$0xff]  }
  0x5e   :  { %2033 = vmatpush2.bf16.msra.mxu0 %v5622_v1  ;;  %v5755_v1 = vld [vmem:[#allocation6 + $0x300] ss:$8 sps:$4 sm:$0xff]  }
  0x5f   :  { %2388 = vmatprep.subr.bf16.mxu0 %v5631_v2  ;;  %2226 = vmatpush2.bf16.msra.mxu1 %v5628_v3  ;;  %v5746_v2 = vld [vmem:[#allocation6 + $0x2c0] ss:$8 sps:$4 sm:$0xff]   ;;  %v5769_v3 = vld [vmem:[#allocation6 + $0x3f4] ss:$8 sps:$4 sm:$0xff]  }
  0x60   :  { %2581 = vmatprep.subr.bf16.mxu1 %v5709_v26  ;;  %v5808_v26 = vld [vmem:[#allocation6 + $0x284] ss:$8 sps:$4 sm:$0xff]  }
  0x61   :  { %2035 = vmatmul.mubr.bf16.vlgmr.msra.gmra.mxu0 %v5625_v4  ;;  %v5763_v4 = vld [vmem:[#allocation6 + $0x2b4] ss:$8 sps:$4 sm:$0xff]  }
  0x62   :  { %2389 = vmatpush1.bf16.msra.mxu0 %v5629_v5  ;;  %2044 = vmatprep.mubr.bf16.mxu0 %v5635_v7  ;;  %v5682_v5 = vld [vmem:[#allocation3 + $0x1e0] ss:$40 sps:$4 sm:$0xff]   ;;  %v5689_v7 = vld [vmem:[#allocation3 + $0x234] ss:$40 sps:$4 sm:$0xff]  }
  0x63   :  { %2228 = vmatmul.mubr.bf16.vlgmr.msra.gmra.mxu1 %v5632_v6  ;;  %2390 = vmatprep.subr.bf16.mxu0 %v5640_v8  ;;  %v5688_v6 = vld [vmem:[#allocation3 + $0x1e8] ss:$40 sps:$4 sm:$0xff]  }
  0x64   :  { %2237 = vmatprep.mubr.bf16.mxu1 %v5641_v9  ;;  %2582 = vmatpush1.bf16.msra.mxu1 %v5707_v25  ;;  %v5767_v8 = vld [vmem:[#allocation6 + $0x3f0] ss:$8 sps:$4 sm:$0xff]   ;;  %v5695_v9 = vld [vmem:[#allocation3 + $0x23c] ss:$40 sps:$4 sm:$0xff]  }
  0x65   :  { %2583 = vmatprep.subr.bf16.mxu1 %v5712_v28  ;;  %v5799_v25 = vld [vmem:[#allocation6 + $0x3b4] ss:$8 sps:$4 sm:$0xff]   ;;  %v5700_v28 = vld [vmem:[#allocation3 + $0x280] ss:$40 sps:$4 sm:$0xff]  }
  0x66   :  { %2391 = vmatpush1.bf16.msra.mxu0 %v5638_v10  ;;  %v5761_v10 = vld [vmem:[#allocation6 + $0x2b0] ss:$8 sps:$4 sm:$0xff]  }
  0x67   :  { %2392 = vmatprep.subr.bf16.mxu0 %v5649_v11  ;;  %v5772_v11 = vld [vmem:[#allocation6 + $0x3e4] ss:$8 sps:$4 sm:$0xff]  }
  0x68   :  { %2584 = vmatpush1.bf16.msra.mxu1 %v5710_v29  ;;  %v5797_v29 = vld [vmem:[#allocation6 + $0x3b0] ss:$8 sps:$4 sm:$0xff]  }
  0x69   :  { %2045 = vmatmul.mubr.bf16.gmra.mxu0 %v5637_v12  ;;  %2585 = vmatprep.subr.bf16.mxu1 %v5724_v36  ;;  %v5778_v12 = vld [vmem:[#allocation6 + $0x2a4] ss:$8 sps:$4 sm:$0xff]   ;;  %v5814_v36 = vld [vmem:[#allocation6 + $0x394] ss:$8 sps:$4 sm:$0xff]  }
  0x6a   :  { %2054 = vmatprep.mubr.bf16.mxu0 %v5644_v14  ;;  %2393 = vmatpush1.bf16.msra.mxu0 %v5647_v15  ;;  %v5776_v14 = vld [vmem:[#allocation6 + $0x2a0] ss:$8 sps:$4 sm:$0xff]   ;;  %v5784_v15 = vld [vmem:[#allocation6 + $0x3d4] ss:$8 sps:$4 sm:$0xff]  }
  0x6b   :  { %2238 = vmatmul.mubr.bf16.gmra.mxu1 %v5643_v13  ;;  %2394 = vmatprep.subr.bf16.mxu0 %v5658_v16  ;;  %v5770_v13 = vld [vmem:[#allocation6 + $0x3e0] ss:$8 sps:$4 sm:$0xff]   ;;  %v5691_v16 = vld [vmem:[#allocation3 + $0x230] ss:$40 sps:$4 sm:$0xff]  }
  0x6c   :  { %2247 = vmatprep.mubr.bf16.mxu1 %v5650_v17  ;;  %2586 = vmatpush1.bf16.msra.mxu1 %v5722_v35  ;;  %v5793_v17 = vld [vmem:[#allocation6 + $0x294] ss:$8 sps:$4 sm:$0xff]  }
  0x6d   :  { %2587 = vmatprep.subr.bf16.mxu1 %v5727_v40  ;;  %v5823_v35 = vld [vmem:[#allocation6 + $0x474] ss:$8 sps:$4 sm:$0xff]   ;;  %v5817_v40 = vld [vmem:[#allocation6 + $0x384] ss:$8 sps:$4 sm:$0xff]  }
  0x6e   :  { %2395 = vmatpush1.bf16.msra.mxu0 %v5656_v18  ;;  %v5697_v18 = vld [vmem:[#allocation3 + $0x238] ss:$40 sps:$4 sm:$0xff]  }
  0x6f   :  { %2396 = vmatprep.subr.bf16.mxu0 %v5667_v19  ;;  %v5782_v19 = vld [vmem:[#allocation6 + $0x3d0] ss:$8 sps:$4 sm:$0xff]  }
  0x70   :  { %2588 = vmatpush1.bf16.msra.mxu1 %v5725_v41  ;;  %v5721_v41 = vld [vmem:[#allocation3 + $0x2d8] ss:$40 sps:$4 sm:$0xff]  }
  0x71   :  { %2055 = vmatmul.mubr.bf16.gmra.mxu0 %v5646_v20  ;;  %2589 = vmatprep.subr.bf16.mxu1 %v5739_v45  ;;  %v5698_v20 = vld [vmem:[#allocation3 + $0x284] ss:$40 sps:$4 sm:$0xff]   ;;  %v5743_v45 = vld [vmem:[#allocation3 + $0x374] ss:$40 sps:$4 sm:$0xff]  }
  0x72   :  { %2064 = vmatprep.mubr.bf16.mxu0 %v5653_v22  ;;  %2397 = vmatpush1.bf16.msra.mxu0 %v5665_v23  ;;  %v5791_v22 = vld [vmem:[#allocation6 + $0x290] ss:$8 sps:$4 sm:$0xff]   ;;  %v5704_v23 = vld [vmem:[#allocation3 + $0x28c] ss:$40 sps:$4 sm:$0xff]  }
  0x73   :  { %2248 = vmatmul.mubr.bf16.gmra.mxu1 %v5652_v21  ;;  %2398 = vmatprep.subr.bf16.mxu0 %v5676_v27  ;;  %v5787_v21 = vld [vmem:[#allocation6 + $0x3c4] ss:$8 sps:$4 sm:$0xff]   ;;  %v5806_v27 = vld [vmem:[#allocation6 + $0x280] ss:$8 sps:$4 sm:$0xff]  }
  0x74   :  { %2257 = vmatprep.mubr.bf16.mxu1 %v5659_v24  ;;  %2590 = vmatpush1.bf16.msra.mxu1 %v5737_v48  ;;  %v5785_v24 = vld [vmem:[#allocation6 + $0x3c0] ss:$8 sps:$4 sm:$0xff]   ;;  %v5745_v48 = vld [vmem:[#allocation3 + $0x370] ss:$40 sps:$4 sm:$0xff]  }
  0x75   :  { %2591 = vmatprep.subr.bf16.mxu1 %v5742_v52  ;;  %v5760_v52 = vld [vmem:[#allocation3 + $0x3c0] ss:$40 sps:$4 sm:$0xff]  }
  0x76   :  { %2399 = vmatpush1.bf16.msra.mxu0 %v5674_v30  ;;  %v5713_v30 = vld [vmem:[#allocation3 + $0x2d4] ss:$40 sps:$4 sm:$0xff]  }
  0x77   :  { %2400 = vmatprep.subr.bf16.mxu0 %v5685_v32  ;;  %v5706_v32 = vld [vmem:[#allocation3 + $0x288] ss:$40 sps:$4 sm:$0xff]  }
  0x78   :  { %2592 = vmatpush1.bf16.msra.mxu1 %v5740_v53  ;;  %v5773_v53 = vld [vmem:[#allocation3 + $0x414] ss:$40 sps:$4 sm:$0xff]  }
  0x79   :  { %2065 = vmatmul.mubr.bf16.gmra.mxu0 %v5655_v31  ;;  %2593 = vmatprep.subr.bf16.mxu1 %v5754_v55  ;;  %v5802_v31 = vld [vmem:[#allocation6 + $0x3a4] ss:$8 sps:$4 sm:$0xff]  }
  0x7a   :  { %2074 = vmatprep.mubr.bf16.mxu0 %v5662_v33  ;;  %2401 = vmatpush1.bf16.msra.mxu0 %v5683_v38  ;;  %v5719_v33 = vld [vmem:[#allocation3 + $0x2dc] ss:$40 sps:$4 sm:$0xff]   ;;  %v5812_v38 = vld [vmem:[#allocation6 + $0x390] ss:$8 sps:$4 sm:$0xff]  }
  0x7b   :  { %2258 = vmatmul.mubr.bf16.gmra.mxu1 %v5661_v34  ;;  %2402 = vmatprep.subr.bf16.mxu0 %v5694_v39  ;;  %v5800_v34 = vld [vmem:[#allocation6 + $0x3a0] ss:$8 sps:$4 sm:$0xff]   ;;  %v5728_v39 = vld [vmem:[#allocation3 + $0x324] ss:$40 sps:$4 sm:$0xff]  }
  0x7c   :  { %2267 = vmatprep.mubr.bf16.mxu1 %v5668_v37  ;;  %2594 = vmatpush1.bf16.msra.mxu1 %v5752_v60  ;;  %v5715_v37 = vld [vmem:[#allocation3 + $0x2d0] ss:$40 sps:$4 sm:$0xff]   ;;  %v5779_v55 = vld [vmem:[#allocation3 + $0x41c] ss:$40 sps:$4 sm:$0xff]   ;;  %v5790_v60 = vld [vmem:[#allocation3 + $0x460] ss:$40 sps:$4 sm:$0xff]  }
  0x7d   :  { %2595 = vmatprep.subr.bf16.mxu1 %v5757_v0  ;;  %v5805_v0 = vld [vmem:[#allocation3 + $0x4b0] ss:$40 sps:$4 sm:$0xff]  }
  0x7e   :  { %2403 = vmatpush1.bf16.msra.mxu0 %v5692_v42  ;;  %v5734_v42 = vld [vmem:[#allocation3 + $0x32c] ss:$40 sps:$4 sm:$0xff]  }
  0x7f   :  { %2404 = vmatprep.subr.bf16.mxu0 %v5703_v44  ;;  %v5730_v44 = vld [vmem:[#allocation3 + $0x320] ss:$40 sps:$4 sm:$0xff]  }
  0x80   :  { %2596 = vmatpush1.bf16.msra.mxu1 %v5755_v1  ;;  %v5820_v1 = vld [vmem:[#allocation3 + $0x14] ss:$40 sps:$4 sm:$0xff]  }
  0x81   :  { %2075 = vmatmul.mubr.bf16.gmra.mxu0 %v5664_v43  ;;  %2597 = vmatprep.subr.bf16.mxu1 %v5769_v3  ;;  %v5815_v43 = vld [vmem:[#allocation6 + $0x380] ss:$8 sps:$4 sm:$0xff]   ;;  %v5826_v3 = vld [vmem:[#allocation3 + $0x1c] ss:$40 sps:$4 sm:$0xff]  }
  0x82   :  { %2084 = vmatprep.mubr.bf16.mxu0 %v5671_v47  ;;  %2405 = vmatpush2.bf16.msra.mxu0 %v5701_v50  ;;  %v5749_v47 = vld [vmem:[#allocation3 + $0x37c] ss:$40 sps:$4 sm:$0xff]   ;;  %v5751_v50 = vld [vmem:[#allocation3 + $0x378] ss:$40 sps:$4 sm:$0xff]  }
  0x83   :  { %2268 = vmatmul.mubr.bf16.gmra.mxu1 %v5670_v46  ;;  %2406 = vmatprep.subr.bf16.mxu0 %v5718_v51  ;;  %v5736_v46 = vld [vmem:[#allocation3 + $0x328] ss:$40 sps:$4 sm:$0xff]   ;;  %v5764_v51 = vld [vmem:[#allocation3 + $0x3cc] ss:$40 sps:$4 sm:$0xff]  }
  0x84   :  { %2277 = vmatprep.mubr.bf16.mxu1 %v5677_v49  ;;  %2598 = vmatpush2.bf16.msra.mxu1 %v5767_v8  ;;  %v5758_v49 = vld [vmem:[#allocation3 + $0x3c4] ss:$40 sps:$4 sm:$0xff]  }
  0x85   :  { %2599 = vmatprep.subr.bf16.mxu1 %v5772_v11  ;;  %v5832_v8 = vld [vmem:[#allocation6 + $0x464] ss:$8 sps:$4 sm:$0xff]   ;;  %v5841_v11 = vld [vmem:[#allocation6 + $0x454] ss:$8 sps:$4 sm:$0xff]  }
  0x86   :  { %2407 = vmatpush2.bf16.msra.mxu0 %v5716_v54  ;;  %v5766_v54 = vld [vmem:[#allocation3 + $0x3c8] ss:$40 sps:$4 sm:$0xff]  }
  0x87   :  { %2408 = vmatprep.subr.bf16.mxu0 %v5733_v56  ;;  %v5775_v56 = vld [vmem:[#allocation3 + $0x410] ss:$40 sps:$4 sm:$0xff]  }
  0x88   :  { %2600 = vmatpush2.bf16.msra.mxu1 %v5770_v13  ;;  %v5836_v13 = vld [vmem:[#allocation3 + $0xb4] ss:$40 sps:$4 sm:$0xff]  }
  0x89   :  { %2085 = vmatmul.mubr.bf16.gmra.mxu0 %v5673_v57  ;;  %2601 = vmatprep.subr.bf16.mxu1 %v5784_v15  ;;  %v5788_v57 = vld [vmem:[#allocation3 + $0x464] ss:$40 sps:$4 sm:$0xff]   ;;  %v5835_v15 = vld [vmem:[#allocation3 + $0x68] ss:$40 sps:$4 sm:$0xff]  }
  0x8a   :  { %2094 = vmatprep.mubr.bf16.mxu0 %v5680_v59  ;;  %2409 = vmatpush2.bf16.msra.mxu0 %v5731_v62  ;;  %v5794_v59 = vld [vmem:[#allocation3 + $0x46c] ss:$40 sps:$4 sm:$0xff]   ;;  %v5796_v62 = vld [vmem:[#allocation3 + $0x468] ss:$40 sps:$4 sm:$0xff]  }
  0x8b   :  { %2278 = vmatmul.mubr.bf16.gmra.mxu1 %v5679_v58  ;;  %2410 = vmatprep.subr.bf16.mxu0 %v5748_v63  ;;  %v5781_v58 = vld [vmem:[#allocation3 + $0x418] ss:$40 sps:$4 sm:$0xff]   ;;  %v5809_v63 = vld [vmem:[#allocation3 + $0x4bc] ss:$40 sps:$4 sm:$0xff]  }
  0x8c   :  { %2287 = vmatprep.mubr.bf16.mxu1 %v5686_v61  ;;  %2602 = vmatpush2.bf16.msra.mxu1 %v5782_v19  ;;  %v5803_v61 = vld [vmem:[#allocation3 + $0x4b4] ss:$40 sps:$4 sm:$0xff]  }
  0x8d   :  { %2603 = vmatprep.subr.bf16.mxu1 %v5787_v21  ;;  %v5859_v19 = vld [vmem:[#allocation6 + $0x434] ss:$8 sps:$4 sm:$0xff]   ;;  %v5845_v21 = vld [vmem:[#allocation3 + $0x104] ss:$40 sps:$4 sm:$0xff]  }
  0x8e   :  { %2411 = vmatpush2.bf16.msra.mxu0 %v5746_v2  ;;  %v5811_v2 = vld [vmem:[#allocation3 + $0x4b8] ss:$40 sps:$4 sm:$0xff]  }
  0x8f   :  { %2412 = vmatprep.subr.bf16.mxu0 %v5763_v4  ;;  %v5818_v4 = vld [vmem:[#allocation3 + $0x10] ss:$40 sps:$4 sm:$0xff]  }
  0x90   :  { %2604 = vmatpush2.bf16.msra.mxu1 %v5785_v24  ;;  %v5857_v24 = vld [vmem:[#allocation6 + $0x430] ss:$8 sps:$4 sm:$0xff]  }
  0x91   :  { %2095 = vmatmul.mubr.bf16.gmra.mxu0 %v5682_v5  ;;  %2605 = vmatprep.subr.bf16.mxu1 %v5799_v25  ;;  %v5821_v5 = vld [vmem:[#allocation6 + $0x470] ss:$8 sps:$4 sm:$0xff]   ;;  %v5868_v25 = vld [vmem:[#allocation6 + $0x424] ss:$8 sps:$4 sm:$0xff]  }
  0x92   :  { %2104 = vmatprep.mubr.bf16.mxu0 %v5689_v7  ;;  %2413 = vmatpush2.bf16.msra.mxu0 %v5761_v10  ;;  %v5827_v7 = vld [vmem:[#allocation3 + $0x64] ss:$40 sps:$4 sm:$0xff]  }
  0x93   :  { %2288 = vmatmul.mubr.bf16.gmra.mxu1 %v5688_v6  ;;  %2414 = vmatprep.subr.bf16.mxu0 %v5778_v12  ;;  %v5824_v6 = vld [vmem:[#allocation3 + $0x18] ss:$40 sps:$4 sm:$0xff]   ;;  %v5833_v10 = vld [vmem:[#allocation3 + $0x6c] ss:$40 sps:$4 sm:$0xff]  }
  0x94   :  { %2297 = vmatprep.mubr.bf16.mxu1 %v5695_v9  ;;  %2606 = vmatpush2.bf16.msra.mxu1 %v5797_v29  ;;  %v5830_v9 = vld [vmem:[#allocation6 + $0x460] ss:$8 sps:$4 sm:$0xff]   ;;  %v5854_v29 = vld [vmem:[#allocation3 + $0x154] ss:$40 sps:$4 sm:$0xff]  }
  0x95   :  { %2607 = vmatprep.subr.bf16.mxu1 %v5802_v31  ;;  %v5829_v12 = vld [vmem:[#allocation3 + $0x60] ss:$40 sps:$4 sm:$0xff]   ;;  %v5860_v31 = vld [vmem:[#allocation3 + $0x15c] ss:$40 sps:$4 sm:$0xff]  }
  0x96   :  { %2415 = vmatpush2.bf16.msra.mxu0 %v5776_v14  ;;  %v5839_v14 = vld [vmem:[#allocation6 + $0x450] ss:$8 sps:$4 sm:$0xff]  }
  0x97   :  { %2416 = vmatprep.subr.bf16.mxu0 %v5793_v17  ;;  %v5850_v17 = vld [vmem:[#allocation6 + $0x444] ss:$8 sps:$4 sm:$0xff]  }
  0x98   :  { %2608 = vmatpush2.bf16.msra.mxu1 %v5800_v34  ;;  %v5884_v34 = vld [vmem:[#allocation6 + $0x400] ss:$8 sps:$4 sm:$0xff]  }
  0x99   :  { %2105 = vmatmul.mubr.bf16.gmra.mxu0 %v5691_v16  ;;  %2609 = vmatprep.subr.bf16.mxu1 %v5814_v36  ;;  %v5842_v16 = vld [vmem:[#allocation3 + $0xbc] ss:$40 sps:$4 sm:$0xff]   ;;  %v5856_v36 = vld [vmem:[#allocation3 + $0x150] ss:$40 sps:$4 sm:$0xff]  }
  0x9a   :  { %2114 = vmatprep.mubr.bf16.mxu0 %v5698_v20  ;;  %2417 = vmatpush2.bf16.msra.mxu0 %v5791_v22  ;;  %v5838_v20 = vld [vmem:[#allocation3 + $0xb0] ss:$40 sps:$4 sm:$0xff]  }
  0x9b   :  { %2298 = vmatmul.mubr.bf16.gmra.mxu1 %v5697_v18  ;;  %2418 = vmatprep.subr.bf16.mxu0 %v5808_v26  ;;  %v5848_v18 = vld [vmem:[#allocation6 + $0x440] ss:$8 sps:$4 sm:$0xff]  }
  0x9c   :  { %2307 = vmatprep.mubr.bf16.mxu1 %v5704_v23  ;;  %2610 = vmatpush2.bf16.msra.mxu1 %v5812_v38  ;;  %v5844_v22 = vld [vmem:[#allocation3 + $0xb8] ss:$40 sps:$4 sm:$0xff]   ;;  %v5851_v23 = vld [vmem:[#allocation3 + $0x10c] ss:$40 sps:$4 sm:$0xff]  }
  0x9d   :  { %2611 = vmatprep.subr.bf16.mxu1 %v5817_v40  ;;  %v5866_v26 = vld [vmem:[#allocation6 + $0x420] ss:$8 sps:$4 sm:$0xff]   ;;  %v5893_v38 = vld [vmem:[#allocation6 + $0x4f0] ss:$8 sps:$4 sm:$0xff]   ;;  %v5904_v40 = vld [vmem:[#allocation6 + $0x4e4] ss:$8 sps:$4 sm:$0xff]  }
  0x9e   :  { %2419 = vmatpush2.bf16.msra.mxu0 %v5806_v27  ;;  %v5877_v27 = vld [vmem:[#allocation6 + $0x414] ss:$8 sps:$4 sm:$0xff]  }
  0x9f   :  { %2774 = vmatprep.subr.bf16.mxu0 %v5823_v35  ;;  %v5895_v35 = vld [vmem:[#allocation6 + $0x4f4] ss:$8 sps:$4 sm:$0xff]  }
  0xa0   :  { %2612 = vmatpush2.bf16.msra.mxu1 %v5815_v43  ;;  %v5913_v43 = vld [vmem:[#allocation6 + $0x4d4] ss:$8 sps:$4 sm:$0xff]  }
  0xa1   :  { %2115 = vmatmul.mubr.bf16.gmra.mxu0 %v5700_v28  ;;  %v5847_v28 = vld [vmem:[#allocation3 + $0x100] ss:$40 sps:$4 sm:$0xff]  }
  0xa2   :  { %2124 = vmatprep.mubr.bf16.mxu0 %v5713_v30  ;;  %v5853_v30 = vld [vmem:[#allocation3 + $0x108] ss:$40 sps:$4 sm:$0xff]  }
  0xa3   :  { %2308 = vmatmul.mubr.bf16.gmra.mxu1 %v5706_v32  ;;  %v5875_v32 = vld [vmem:[#allocation6 + $0x410] ss:$8 sps:$4 sm:$0xff]  }
  0xa4   :  { %2317 = vmatprep.mubr.bf16.mxu1 %v5719_v33  ;;  %v5886_v33 = vld [vmem:[#allocation6 + $0x404] ss:$8 sps:$4 sm:$0xff]  }
  0xa9   :  { %2125 = vmatmul.mubr.bf16.gmra.mxu0 %v5715_v37  ;;  %v5863_v37 = vld [vmem:[#allocation3 + $0x1a4] ss:$40 sps:$4 sm:$0xff]  }
  0xaa   :  { %2134 = vmatprep.mubr.bf16.mxu0 %v5728_v39  ;;  %v5862_v39 = vld [vmem:[#allocation3 + $0x158] ss:$40 sps:$4 sm:$0xff]  }
  0xab   :  { %2318 = vmatmul.mubr.bf16.gmra.mxu1 %v5721_v41  ;;  %v5869_v41 = vld [vmem:[#allocation3 + $0x1ac] ss:$40 sps:$4 sm:$0xff]  }
  0xac   :  { %2327 = vmatprep.mubr.bf16.mxu1 %v5734_v42  ;;  %v5902_v42 = vld [vmem:[#allocation6 + $0x4e0] ss:$8 sps:$4 sm:$0xff]  }
  0xb1   :  { %2135 = vmatmul.mubr.bf16.gmra.mxu0 %v5730_v44  ;;  %v5865_v44 = vld [vmem:[#allocation3 + $0x1a0] ss:$40 sps:$4 sm:$0xff]  }
  0xb2   :  { %2144 = vmatprep.mubr.bf16.mxu0 %v5743_v45  ;;  %v5872_v45 = vld [vmem:[#allocation3 + $0x1f4] ss:$40 sps:$4 sm:$0xff]  }
  0xb3   :  { %2328 = vmatmul.mubr.bf16.gmra.mxu1 %v5736_v46  ;;  %v5911_v46 = vld [vmem:[#allocation6 + $0x4d0] ss:$8 sps:$4 sm:$0xff]  }
  0xb4   :  { %2337 = vmatprep.mubr.bf16.mxu1 %v5749_v47  ;;  %v5871_v47 = vld [vmem:[#allocation3 + $0x1a8] ss:$40 sps:$4 sm:$0xff]  }
  0xb9   :  { %2145 = vmatmul.mubr.bf16.gmra.mxu0 %v5745_v48  ;;  %v5922_v48 = vld [vmem:[#allocation6 + $0x4c4] ss:$8 sps:$4 sm:$0xff]  }
  0xba   :  { %2154 = vmatprep.mubr.bf16.mxu0 %v5758_v49  ;;  %v5878_v49 = vld [vmem:[#allocation3 + $0x1fc] ss:$40 sps:$4 sm:$0xff]  }
  0xbb   :  { %2338 = vmatmul.mubr.bf16.gmra.mxu1 %v5751_v50  ;;  %v5920_v50 = vld [vmem:[#allocation6 + $0x4c0] ss:$8 sps:$4 sm:$0xff]  }
  0xbc   :  { %2347 = vmatprep.mubr.bf16.mxu1 %v5764_v51  ;;  %v5931_v51 = vld [vmem:[#allocation6 + $0x4b4] ss:$8 sps:$4 sm:$0xff]  }
  0xc1   :  { %2155 = vmatmul.mubr.bf16.gmra.mxu0 %v5760_v52  ;;  %v5874_v52 = vld [vmem:[#allocation3 + $0x1f0] ss:$40 sps:$4 sm:$0xff]  }
  0xc2   :  { %2164 = vmatprep.mubr.bf16.mxu0 %v5773_v53  ;;  %v5881_v53 = vld [vmem:[#allocation3 + $0x244] ss:$40 sps:$4 sm:$0xff]  }
  0xc3   :  { %2348 = vmatmul.mubr.bf16.gmra.mxu1 %v5766_v54  ;;  %v5929_v54 = vld [vmem:[#allocation6 + $0x4b0] ss:$8 sps:$4 sm:$0xff]  }
  0xc4   :  { %2357 = vmatprep.mubr.bf16.mxu1 %v5779_v55  ;;  %v5880_v55 = vld [vmem:[#allocation3 + $0x1f8] ss:$40 sps:$4 sm:$0xff]  }
  0xc9   :  { %2165 = vmatmul.mubr.bf16.gmra.mxu0 %v5775_v56  ;;  %v5940_v56 = vld [vmem:[#allocation6 + $0x4a4] ss:$8 sps:$4 sm:$0xff]  }
  0xca   :  { %2174 = vmatprep.mubr.bf16.mxu0 %v5788_v57  ;;  %v5887_v57 = vld [vmem:[#allocation3 + $0x24c] ss:$40 sps:$4 sm:$0xff]  }
  0xcb   :  { %2358 = vmatmul.mubr.bf16.gmra.mxu1 %v5781_v58  ;;  %v7061_v58 = vlaneseq }
  0xcc   :  { %2367 = vmatprep.mubr.bf16.mxu1 %v5794_v59  ;;  %v5938_v59 = vld [vmem:[#allocation6 + $0x4a0] ss:$8 sps:$4 sm:$0xff]  }
  0xd1   :  { %2175 = vmatmul.mubr.bf16.gmra.mxu0 %v5790_v60  ;;  %v5949_v60 = vld [vmem:[#allocation6 + $0x494] ss:$8 sps:$4 sm:$0xff]  }
  0xd2   :  { %2184 = vmatprep.mubr.bf16.mxu0 %v5803_v61  ;;  %v5883_v61 = vld [vmem:[#allocation3 + $0x240] ss:$40 sps:$4 sm:$0xff]  }
  0xd3   :  { %2368 = vmatmul.mubr.bf16.gmra.mxu1 %v5796_v62  ;;  %v5890_v62 = vld [vmem:[#allocation3 + $0x294] ss:$40 sps:$4 sm:$0xff]  }
  0xd4   :  { %2377 = vmatprep.mubr.bf16.mxu1 %v5809_v63  ;;  %v6177_v63 = vshrl.u32 %v7061_v58, 7 }
  0xd6   :  { %7064 = vst [vmem:[#allocation12_spill] sm:$0xff] %v6177_v63 }
  0xd9   :  { %2185 = vmatmul.mubr.bf16.gmra.mxu0 %v5805_v0  ;;  %v5947_v0 = vld [vmem:[#allocation6 + $0x490] ss:$8 sps:$4 sm:$0xff]  }
  0xda   :  { %2420 = vmatprep.mubr.bf16.mxu0 %v5820_v1  ;;  %v5889_v1 = vld [vmem:[#allocation3 + $0x248] ss:$40 sps:$4 sm:$0xff]  }
  0xdb   :  { %2378 = vmatmul.mubr.bf16.gmra.mxu1 %v5811_v2  ;;  %v5958_v2 = vld [vmem:[#allocation6 + $0x484] ss:$8 sps:$4 sm:$0xff]  }
  0xdc   :  { %2613 = vmatprep.mubr.bf16.mxu1 %v5826_v3  ;;  %v5896_v3 = vld [vmem:[#allocation3 + $0x29c] ss:$40 sps:$4 sm:$0xff]  }
  0xe1   :  { %2421 = vmatmul.mubr.bf16.vlgmr.msra.gmra.mxu0 %v5818_v4  ;;  %v7060_v4 = vsub.s32 0, %v6177_v63 }
  0xe2   :  { %2775 = vmatpush1.bf16.msra.mxu0 %v5821_v5  ;;  %2430 = vmatprep.mubr.bf16.mxu0 %v5827_v7  ;;  %v5956_v5 = vld [vmem:[#allocation6 + $0x480] ss:$8 sps:$4 sm:$0xff]   ;;  %v398_v7 = vsub.s32 1, %v6177_v63  ;;  %v5976_v63 = vld [vmem:[#allocation3 + $0x164] ss:$40 sps:$4 sm:$0xff]  }
  0xe3   :  { %2614 = vmatmul.mubr.bf16.vlgmr.msra.gmra.mxu1 %v5824_v6  ;;  %2776 = vmatprep.subr.bf16.mxu0 %v5832_v8  ;;  %v390_v6 = vld [vmem:[%s7052_s4] sm:$0x3]  ;;  %v5892_v8 = vld [vmem:[#allocation3 + $0x290] ss:$40 sps:$4 sm:$0xff]  }
  0xe4   :  { %2623 = vmatprep.mubr.bf16.mxu1 %v5833_v10  ;;  %v5899_v10 = vld [vmem:[#allocation3 + $0x2e4] ss:$40 sps:$4 sm:$0xff]  }
  0xe6   :  { %2777 = vmatpush1.bf16.msra.mxu0 %v5830_v9  ;;  %v6186_v9 = vrot.slane %v390_v6, %v7060_v4 }
  0xe7   :  { %2778 = vmatprep.subr.bf16.mxu0 %v5841_v11  ;;  %v5898_v11 = vld [vmem:[#allocation3 + $0x298] ss:$40 sps:$4 sm:$0xff]  }
  0xe9   :  { %2431 = vmatmul.mubr.bf16.gmra.mxu0 %v5829_v12  ;;  %v6188_v12 = vrot.slane %v390_v6, %v398_v7  ;;  %v5928_v6 = vld [vmem:[#allocation3 + $0x3d4] ss:$40 sps:$4 sm:$0xff]  }
  0xea   :  { %2440 = vmatprep.mubr.bf16.mxu0 %v5836_v13  ;;  %2779 = vmatpush1.bf16.msra.mxu0 %v5839_v14  ;;  %v5905_v13 = vld [vmem:[#allocation3 + $0x2ec] ss:$40 sps:$4 sm:$0xff]  }
  0xeb   :  { %2624 = vmatmul.mubr.bf16.gmra.mxu1 %v5835_v15  ;;  %2780 = vmatprep.subr.bf16.mxu0 %v5850_v17 }
  0xec   :  { %2633 = vmatprep.mubr.bf16.mxu1 %v5842_v16 }
  0xee   :  { %2781 = vmatpush1.bf16.msra.mxu0 %v5848_v18 }
  0xef   :  { %2782 = vmatprep.subr.bf16.mxu0 %v5859_v19 }
  0xf1   :  { %2441 = vmatmul.mubr.bf16.gmra.mxu0 %v5838_v20 }
  0xf2   :  { %2450 = vmatprep.mubr.bf16.mxu0 %v5845_v21  ;;  %2783 = vmatpush1.bf16.msra.mxu0 %v5857_v24 }
  0xf3   :  { %2634 = vmatmul.mubr.bf16.gmra.mxu1 %v5844_v22  ;;  %2784 = vmatprep.subr.bf16.mxu0 %v5868_v25  ;;  %v5901_v22 = vld [vmem:[#allocation3 + $0x2e0] ss:$40 sps:$4 sm:$0xff]   ;;  %v5908_v25 = vld [vmem:[#allocation3 + $0x334] ss:$40 sps:$4 sm:$0xff]  }
  0xf4   :  { %2643 = vmatprep.mubr.bf16.mxu1 %v5851_v23 }
  0xf6   :  { %2785 = vmatpush1.bf16.msra.mxu0 %v5866_v26 }
  0xf7   :  { %2786 = vmatprep.subr.bf16.mxu0 %v5877_v27 }
  0xf9   :  { %2451 = vmatmul.mubr.bf16.gmra.mxu0 %v5847_v28  ;;  %v5907_v28 = vld [vmem:[#allocation3 + $0x2e8] ss:$40 sps:$4 sm:$0xff]  }
  0xfa   :  { %2460 = vmatprep.mubr.bf16.mxu0 %v5854_v29  ;;  %2787 = vmatpush1.bf16.msra.mxu0 %v5875_v32 }
  0xfb   :  { %2644 = vmatmul.mubr.bf16.gmra.mxu1 %v5853_v30  ;;  %2788 = vmatprep.subr.bf16.mxu0 %v5886_v33 }
  0xfc   :  { %2653 = vmatprep.mubr.bf16.mxu1 %v5860_v31  ;;  %v5914_v31 = vld [vmem:[#allocation3 + $0x33c] ss:$40 sps:$4 sm:$0xff]  }
  0xfe   :  { %2789 = vmatpush1.bf16.msra.mxu0 %v5884_v34 }
  0xff   :  { %2790 = vmatprep.subr.bf16.mxu0 %v5895_v35 }
 0x101   :  { %2461 = vmatmul.mubr.bf16.gmra.mxu0 %v5856_v36 }
 0x102   :  { %2470 = vmatprep.mubr.bf16.mxu0 %v5863_v37  ;;  %2791 = vmatpush2.bf16.msra.mxu0 %v5893_v38 }
 0x103   :  { %2654 = vmatmul.mubr.bf16.gmra.mxu1 %v5862_v39  ;;  %2792 = vmatprep.subr.bf16.mxu0 %v5904_v40 }
 0x104   :  { %2663 = vmatprep.mubr.bf16.mxu1 %v5869_v41 }
 0x106   :  { %2793 = vmatpush2.bf16.msra.mxu0 %v5902_v42  ;;  %v5910_v42 = vld [vmem:[#allocation3 + $0x330] ss:$40 sps:$4 sm:$0xff]  }
 0x107   :  { %2794 = vmatprep.subr.bf16.mxu0 %v5913_v43 }
 0x109   :  { %2471 = vmatmul.mubr.bf16.gmra.mxu0 %v5865_v44 }
 0x10a   :  { %2480 = vmatprep.mubr.bf16.mxu0 %v5872_v45  ;;  %2795 = vmatpush2.bf16.msra.mxu0 %v5911_v46  ;;  %v5917_v45 = vld [vmem:[#allocation3 + $0x384] ss:$40 sps:$4 sm:$0xff]  }
 0x10b   :  { %2664 = vmatmul.mubr.bf16.gmra.mxu1 %v5871_v47  ;;  %2796 = vmatprep.subr.bf16.mxu0 %v5922_v48  ;;  %v5916_v48 = vld [vmem:[#allocation3 + $0x338] ss:$40 sps:$4 sm:$0xff]  }
 0x10c   :  { %2673 = vmatprep.mubr.bf16.mxu1 %v5878_v49 }
 0x10e   :  { %2797 = vmatpush2.bf16.msra.mxu0 %v5920_v50 }
 0x10f   :  { %2798 = vmatprep.subr.bf16.mxu0 %v5931_v51  ;;  %v5923_v51 = vld [vmem:[#allocation3 + $0x38c] ss:$40 sps:$4 sm:$0xff]  }
 0x111   :  { %2481 = vmatmul.mubr.bf16.gmra.mxu0 %v5874_v52  ;;  %v5992_v52 = vld [vmem:[%s7053_s5 + $0x78] sm:$0xff]  }
 0x112   :  { %2490 = vmatprep.mubr.bf16.mxu0 %v5881_v53  ;;  %2799 = vmatpush2.bf16.msra.mxu0 %v5929_v54  ;;  %v5996_v53 = vld [vmem:[%s7053_s5 + $0x38] sm:$0xff]  }
 0x113   :  { %2674 = vmatmul.mubr.bf16.gmra.mxu1 %v5880_v55  ;;  %2800 = vmatprep.subr.bf16.mxu0 %v5940_v56 }
 0x114   :  { %2683 = vmatprep.mubr.bf16.mxu1 %v5887_v57  ;;  %5255 = vmatprep.subr.bf16.mxu1 %v5992_v52 }
 0x115   :  { %5256 = vmatpush3.bf16.msra.mxu1 %v5996_v53 }
 0x116   :  { %2801 = vmatpush2.bf16.msra.mxu0 %v5938_v59 }
 0x117   :  { %2802 = vmatprep.subr.bf16.mxu0 %v5949_v60 }
 0x119   :  { %2491 = vmatmul.mubr.bf16.gmra.mxu0 %v5883_v61 }
 0x11a   :  { %2500 = vmatprep.mubr.bf16.mxu0 %v5890_v62  ;;  %2803 = vmatpush2.bf16.msra.mxu0 %v5947_v0 }
 0x11b   :  { %2684 = vmatmul.mubr.bf16.gmra.mxu1 %v5889_v1  ;;  %2804 = vmatprep.subr.bf16.mxu0 %v5958_v2  ;;  %v5919_v2 = vld [vmem:[#allocation3 + $0x380] ss:$40 sps:$4 sm:$0xff]  }
 0x11c   :  { %2693 = vmatprep.mubr.bf16.mxu1 %v5896_v3 }
 0x11e   :  { %2805 = vmatpush2.bf16.msra.mxu0 %v5956_v5 }
 0x121   :  { %v2036_v14 = vpop.f32.mrf.mxu0  ;;  %2501 = vmatmul.mubr.bf16.gmra.mxu0 %v5892_v8 }
 0x122   :  { %v2037_v15 = vadd.f32 %v2036_v14, %v6186_v9  ;;  %2510 = vmatprep.mubr.bf16.mxu0 %v5899_v10  ;;  %v5925_v10 = vld [vmem:[#allocation3 + $0x388] ss:$40 sps:$4 sm:$0xff]   ;;  %v5934_v14 = vld [vmem:[#allocation3 + $0x3dc] ss:$40 sps:$4 sm:$0xff]  }
 0x123   :  { %v2038_v16 = vpop.f32.mrf.mxu0  ;;  %v2229_v17 = vpop.f32.mrf.mxu1  ;;  %2694 = vmatmul.mubr.bf16.gmra.mxu1 %v5898_v11 }
 0x124   :  { %v2039_v18 = vadd.f32 %v2038_v16, %v6188_v12  ;;  %v6192_v19 = vadd.f32 %v2229_v17, %v2037_v15  ;;  %2703 = vmatprep.mubr.bf16.mxu1 %v5905_v13 }
 0x125   :  { %v2040_v20 = vpop.f32.mrf.mxu0  ;;  %v2231_v21 = vpop.f32.mrf.mxu1 }
 0x126   :  { %v2041_v23 = vadd.f32 %v2040_v20, %v6186_v9  ;;  %v6195_v24 = vadd.f32 %v2231_v21, %v2039_v18 }
 0x127   :  { %v2042_v26 = vpop.f32.mrf.mxu0  ;;  %v2233_v27 = vpop.f32.mrf.mxu1 }
 0x128   :  { %v2043_v29 = vadd.f32 %v2042_v26, %v6188_v12  ;;  %v6198_v30 = vadd.f32 %v2233_v27, %v2041_v23  ;;  %v5926_v27 = vld [vmem:[#allocation3 + $0x3d0] ss:$40 sps:$4 sm:$0xff]  }
 0x129   :  { %v2046_v32 = vpop.f32.mrf.mxu0  ;;  %v2235_v33 = vpop.f32.mrf.mxu1  ;;  %2511 = vmatmul.mubr.bf16.gmra.mxu0 %v5901_v22 }
 0x12a   :  { %v2047_v34 = vadd.f32 %v2046_v32, %v6186_v9  ;;  %v6201_v35 = vadd.f32 %v2235_v33, %v2043_v29  ;;  %2520 = vmatprep.mubr.bf16.mxu0 %v5908_v25 }
 0x12b   :  { %v2048_v36 = vpop.f32.mrf.mxu0  ;;  %v2239_v37 = vpop.f32.mrf.mxu1  ;;  %2704 = vmatmul.mubr.bf16.gmra.mxu1 %v5907_v28 }
 0x12c   :  { %v2049_v38 = vadd.f32 %v2048_v36, %v6188_v12  ;;  %v6204_v39 = vadd.f32 %v2239_v37, %v2047_v34  ;;  %2713 = vmatprep.mubr.bf16.mxu1 %v5914_v31  ;;  %v5937_v31 = vld [vmem:[#allocation3 + $0x424] ss:$40 sps:$4 sm:$0xff]   ;;  %v5932_v34 = vld [vmem:[#allocation3 + $0x3d8] ss:$40 sps:$4 sm:$0xff]  }
 0x12d   :  { %v2050_v40 = vpop.f32.mrf.mxu0  ;;  %v2241_v41 = vpop.f32.mrf.mxu1 }
 0x12e   :  { %v2051_v43 = vadd.f32 %v2050_v40, %v6186_v9  ;;  %v6207_v44 = vadd.f32 %v2241_v41, %v2049_v38  ;;  %v5943_v38 = vld [vmem:[#allocation3 + $0x42c] ss:$40 sps:$4 sm:$0xff]  }
 0x12f   :  { %v2052_v46 = vpop.f32.mrf.mxu0  ;;  %v2243_v47 = vpop.f32.mrf.mxu1  ;;  %v6000_v40 = vld [vmem:[%s7053_s5 + $0x70] sm:$0xff]  }
 0x130   :  { %v2053_v49 = vadd.f32 %v2052_v46, %v6188_v12  ;;  %v6210_v50 = vadd.f32 %v2243_v47, %v2051_v43  ;;  %v6004_v41 = vld [vmem:[%s7053_s5 + $0x30] sm:$0xff]   ;;  %5257 = vmatprep.subr.bf16.mxu1 %v6000_v40 }
 0x131   :  { %v2056_v54 = vpop.f32.mrf.mxu0  ;;  %v2245_v55 = vpop.f32.mrf.mxu1  ;;  %2521 = vmatmul.mubr.bf16.gmra.mxu0 %v5910_v42  ;;  %5258 = vmatpush3.bf16.msra.mxu1 %v6004_v41 }
 0x132   :  { %v2057_v56 = vadd.f32 %v2056_v54, %v6186_v9  ;;  %v6219_v57 = vadd.f32 %v2245_v55, %v2053_v49  ;;  %2530 = vmatprep.mubr.bf16.mxu0 %v5917_v45  ;;  %v5935_v54 = vld [vmem:[#allocation3 + $0x420] ss:$40 sps:$4 sm:$0xff]  }
 0x133   :  { %v2058_v59 = vpop.f32.mrf.mxu0  ;;  %v2249_v60 = vpop.f32.mrf.mxu1  ;;  %2714 = vmatmul.mubr.bf16.gmra.mxu1 %v5916_v48 }
 0x134   :  { %v2059_v61 = vadd.f32 %v2058_v59, %v6188_v12  ;;  %v6222_v62 = vadd.f32 %v2249_v60, %v2057_v56  ;;  %2723 = vmatprep.mubr.bf16.mxu1 %v5923_v51  ;;  %v5946_v59 = vld [vmem:[#allocation3 + $0x474] ss:$40 sps:$4 sm:$0xff]  }
 0x135   :  { %v2060_v0 = vpop.f32.mrf.mxu0  ;;  %v2251_v1 = vpop.f32.mrf.mxu1 }
 0x136   :  { %v2061_v3 = vadd.f32 %v2060_v0, %v6186_v9  ;;  %v6225_v5 = vadd.f32 %v2251_v1, %v2059_v61  ;;  %v5941_v0 = vld [vmem:[#allocation3 + $0x428] ss:$40 sps:$4 sm:$0xff]  }
 0x137   :  { %v2062_v7 = vpop.f32.mrf.mxu0  ;;  %v2253_v8 = vpop.f32.mrf.mxu1 }
 0x138   :  { %v2063_v11 = vadd.f32 %v2062_v7, %v6188_v12  ;;  %v6228_v13 = vadd.f32 %v2253_v8, %v2061_v3 }
 0x139   :  { %v2066_v15 = vpop.f32.mrf.mxu0  ;;  %v2255_v16 = vpop.f32.mrf.mxu1  ;;  %2531 = vmatmul.mubr.bf16.gmra.mxu0 %v5919_v2  ;;  %v5952_v2 = vld [vmem:[#allocation3 + $0x47c] ss:$40 sps:$4 sm:$0xff]  }
 0x13a   :  { %v2067_v17 = vadd.f32 %v2066_v15, %v6186_v9  ;;  %v6231_v18 = vadd.f32 %v2255_v16, %v2063_v11  ;;  %2540 = vmatprep.mubr.bf16.mxu0 %v5928_v6 }
 0x13b   :  { %v2068_v20 = vpop.f32.mrf.mxu0  ;;  %v2259_v21 = vpop.f32.mrf.mxu1  ;;  %2724 = vmatmul.mubr.bf16.gmra.mxu1 %v5925_v10 }
 0x13c   :  { %v2069_v22 = vadd.f32 %v2068_v20, %v6188_v12  ;;  %v6234_v23 = vadd.f32 %v2259_v21, %v2067_v17  ;;  %2733 = vmatprep.mubr.bf16.mxu1 %v5934_v14  ;;  %v5944_v17 = vld [vmem:[#allocation3 + $0x470] ss:$40 sps:$4 sm:$0xff]  }
 0x13d   :  { %v2070_v25 = vpop.f32.mrf.mxu0  ;;  %v2261_v26 = vpop.f32.mrf.mxu1 }
 0x13e   :  { %v2071_v28 = vadd.f32 %v2070_v25, %v6186_v9  ;;  %v6237_v29 = vadd.f32 %v2261_v26, %v2069_v22  ;;  %v5955_v22 = vld [vmem:[#allocation3 + $0x4c4] ss:$40 sps:$4 sm:$0xff]  }
 0x13f   :  { %v2072_v32 = vpop.f32.mrf.mxu0  ;;  %v2263_v33 = vpop.f32.mrf.mxu1 }
 0x140   :  { %v2073_v36 = vadd.f32 %v2072_v32, %v6188_v12  ;;  %v6240_v37 = vadd.f32 %v2263_v33, %v2071_v28  ;;  %v6008_v32 = vld [vmem:[%s7053_s5 + $0x68] sm:$0xff]  }
 0x141   :  { %v2076_v42 = vpop.f32.mrf.mxu0  ;;  %v2265_v43 = vpop.f32.mrf.mxu1  ;;  %2541 = vmatmul.mubr.bf16.gmra.mxu0 %v5926_v27  ;;  %v5950_v27 = vld [vmem:[#allocation3 + $0x478] ss:$40 sps:$4 sm:$0xff]   ;;  %v6012_v33 = vld [vmem:[%s7053_s5 + $0x28] sm:$0xff]   ;;  %5259 = vmatprep.subr.bf16.mxu1 %v6008_v32 }
 0x142   :  { %v2077_v45 = vadd.f32 %v2076_v42, %v6186_v9  ;;  %v6249_v46 = vadd.f32 %v2265_v43, %v2073_v36  ;;  %2550 = vmatprep.mubr.bf16.mxu0 %v5937_v31  ;;  %v5961_v31 = vld [vmem:[#allocation3 + $0x4cc] ss:$40 sps:$4 sm:$0xff]   ;;  %5260 = vmatpush3.bf16.msra.mxu1 %v6012_v33  ;;  %v6016_v33 = vld [vmem:[%s7053_s5 + $0x60] sm:$0xff]  }
 0x143   :  { %v2078_v47 = vpop.f32.mrf.mxu0  ;;  %v2269_v48 = vpop.f32.mrf.mxu1  ;;  %2734 = vmatmul.mubr.bf16.gmra.mxu1 %v5932_v34  ;;  %5261 = vmatprep.subr.bf16.mxu1 %v6016_v33 }
 0x144   :  { %v2079_v49 = vadd.f32 %v2078_v47, %v6188_v12  ;;  %v6252_v51 = vadd.f32 %v2269_v48, %v2077_v45  ;;  %2743 = vmatprep.mubr.bf16.mxu1 %v5943_v38  ;;  %v5953_v48 = vld [vmem:[#allocation3 + $0x4c0] ss:$40 sps:$4 sm:$0xff]  }
 0x145   :  { %v2080_v52 = vpop.f32.mrf.mxu0  ;;  %v2271_v53 = vpop.f32.mrf.mxu1 }
 0x146   :  { %v2081_v55 = vadd.f32 %v2080_v52, %v6186_v9  ;;  %v6255_v56 = vadd.f32 %v2271_v53, %v2079_v49  ;;  %v5964_v53 = vld [vmem:[#allocation3 + $0x24] ss:$40 sps:$4 sm:$0xff]  }
 0x147   :  { %v6257_v60 = vpop.f32.mrf.mxu0  ;;  %v2273_v61 = vpop.f32.mrf.mxu1 }
 0x148   :  { %7065 = vst [vmem:[#allocation13_spill] sm:$0xff] %v6257_v60  ;;  %v6259_v1 = vadd.f32 %v2273_v61, %v2081_v55 }
 0x149   :  { %v2086_v3 = vpop.f32.mrf.mxu0  ;;  %v6261_v6 = vpop.f32.mrf.mxu1  ;;  %2551 = vmatmul.mubr.bf16.gmra.mxu0 %v5935_v54 }
 0x14a   :  { %7066 = vst [vmem:[#allocation14_spill] sm:$0xff] %v6261_v6  ;;  %v2087_v7 = vadd.f32 %v2086_v3, %v6186_v9  ;;  %2560 = vmatprep.mubr.bf16.mxu0 %v5946_v59  ;;  %v5959_v59 = vld [vmem:[#allocation3 + $0x4c8] ss:$40 sps:$4 sm:$0xff]  }
 0x14b   :  { %v2088_v8 = vpop.f32.mrf.mxu0  ;;  %v2279_v10 = vpop.f32.mrf.mxu1  ;;  %2744 = vmatmul.mubr.bf16.gmra.mxu1 %v5941_v0 }
 0x14c   :  { %v2089_v11 = vadd.f32 %v2088_v8, %v6188_v12  ;;  %v6265_v14 = vadd.f32 %v2279_v10, %v2087_v7  ;;  %2753 = vmatprep.mubr.bf16.mxu1 %v5952_v2 }
 0x14d   :  { %v2090_v15 = vpop.f32.mrf.mxu0  ;;  %v2281_v16 = vpop.f32.mrf.mxu1 }
 0x14e   :  { %v2091_v20 = vadd.f32 %v2090_v15, %v6186_v9  ;;  %v6268_v21 = vadd.f32 %v2281_v16, %v2089_v11 }
 0x14f   :  { %v6270_v25 = vpop.f32.mrf.mxu0  ;;  %v2283_v26 = vpop.f32.mrf.mxu1 }
 0x150   :  { %7067 = vst [vmem:[#allocation15_spill] sm:$0xff] %v6270_v25  ;;  %v6272_v28 = vadd.f32 %v2283_v26, %v2091_v20  ;;  %v5967_v26 = vld [vmem:[#allocation3 + $0x74] ss:$40 sps:$4 sm:$0xff]  }
 0x151   :  { %v2096_v34 = vpop.f32.mrf.mxu0  ;;  %v6280_v36 = vpop.f32.mrf.mxu1  ;;  %2561 = vmatmul.mubr.bf16.gmra.mxu0 %v5944_v17  ;;  %v5962_v17 = vld [vmem:[#allocation3 + $0x20] ss:$40 sps:$4 sm:$0xff]  }
 0x152   :  { %7068 = vst [vmem:[#allocation16_spill] sm:$0xff] %v6280_v36  ;;  %v2097_v38 = vadd.f32 %v2096_v34, %v6186_v9  ;;  %2570 = vmatprep.mubr.bf16.mxu0 %v5955_v22  ;;  %v6017_v34 = vld [vmem:[%s7053_s5 + $0x20] sm:$0xff]  }
 0x153   :  { %v2098_v40 = vpop.f32.mrf.mxu0  ;;  %v2289_v41 = vpop.f32.mrf.mxu1  ;;  %2754 = vmatmul.mubr.bf16.gmra.mxu1 %v5950_v27 }
 0x154   :  { %v2099_v42 = vadd.f32 %v2098_v40, %v6188_v12  ;;  %v6284_v43 = vadd.f32 %v2289_v41, %v2097_v38  ;;  %2763 = vmatprep.mubr.bf16.mxu1 %v5961_v31  ;;  %5262 = vmatpush3.bf16.msra.mxu1 %v6017_v34 }
 0x155   :  { %v2100_v45 = vpop.f32.mrf.mxu0  ;;  %v2291_v47 = vpop.f32.mrf.mxu1 }
 0x156   :  { %v2101_v49 = vadd.f32 %v2100_v45, %v6186_v9  ;;  %v6287_v52 = vadd.f32 %v2291_v47, %v2099_v42 }
 0x157   :  { %v6289_v54 = vpop.f32.mrf.mxu0  ;;  %v2293_v55 = vpop.f32.mrf.mxu1 }
 0x158   :  { %7069 = vst [vmem:[#allocation17_spill] sm:$0xff] %v6289_v54  ;;  %v6291_v61 = vadd.f32 %v2293_v55, %v2101_v49  ;;  %v5965_v55 = vld [vmem:[#allocation3 + $0x70] ss:$40 sps:$4 sm:$0xff]   ;;  %v5980_v54 = vld [vmem:[#allocation3 + $0x200] ss:$40 sps:$4 sm:$0xff]  }
 0x159   :  { %v2106_v0 = vpop.f32.mrf.mxu0  ;;  %v6293_v2 = vpop.f32.mrf.mxu1  ;;  %2571 = vmatmul.mubr.bf16.gmra.mxu0 %v5953_v48 }
 0x15a   :  { %7070 = vst [vmem:[#allocation18_spill] sm:$0xff] %v6293_v2  ;;  %v2107_v3 = vadd.f32 %v2106_v0, %v6186_v9  ;;  %2806 = vmatprep.mubr.bf16.mxu0 %v5964_v53 }
 0x15b   :  { %v2108_v7 = vpop.f32.mrf.mxu0  ;;  %v2299_v8 = vpop.f32.mrf.mxu1  ;;  %2764 = vmatmul.mubr.bf16.gmra.mxu1 %v5959_v59 }
 0x15c   :  { %v2109_v10 = vadd.f32 %v2108_v7, %v6188_v12  ;;  %v6297_v11 = vadd.f32 %v2299_v8, %v2107_v3  ;;  %v5970_v3 = vld [vmem:[#allocation3 + $0xc4] ss:$40 sps:$4 sm:$0xff]  }
 0x15d   :  { %v2110_v15 = vpop.f32.mrf.mxu0  ;;  %v2301_v16 = vpop.f32.mrf.mxu1 }
 0x15e   :  { %v2111_v20 = vadd.f32 %v2110_v15, %v6186_v9  ;;  %v6300_v22 = vadd.f32 %v2301_v16, %v2109_v10 }
 0x15f   :  { %v6302_v27 = vpop.f32.mrf.mxu0  ;;  %v2303_v31 = vpop.f32.mrf.mxu1 }
 0x160   :  { %7071 = vst [vmem:[#allocation19_spill] sm:$0xff] %v6302_v27  ;;  %v6304_v32 = vadd.f32 %v2303_v31, %v2111_v20 }
 0x161   :  { %v2116_v38 = vpop.f32.mrf.mxu0  ;;  %v6312_v40 = vpop.f32.mrf.mxu1  ;;  %2807 = vmatmul.mubr.bf16.vlgmr.msra.gmra.mxu0 %v5962_v17 }
 0x162   :  { %7072 = vst [vmem:[#allocation20_spill] sm:$0xff] %v6312_v40  ;;  %v2117_v41 = vadd.f32 %v2116_v38, %v6186_v9  ;;  %2816 = vmatprep.mubr.bf16.mxu0 %v5967_v26 }
 0x163   :  { %v2118_v42 = vpop.f32.mrf.mxu0  ;;  %v2309_v45 = vpop.f32.mrf.mxu1 }
 0x164   :  { %v2119_v47 = vadd.f32 %v2118_v42, %v6188_v12  ;;  %v6316_v48 = vadd.f32 %v2309_v45, %v2117_v41  ;;  %v5968_v41 = vld [vmem:[#allocation3 + $0xc0] ss:$40 sps:$4 sm:$0xff]  }
 0x165   :  { %v2120_v49 = vpop.f32.mrf.mxu0  ;;  %v2311_v53 = vpop.f32.mrf.mxu1 }
 0x166   :  { %v2121_v59 = vadd.f32 %v2120_v49, %v6186_v9  ;;  %v6319_v0 = vadd.f32 %v2311_v53, %v2119_v47  ;;  %v5973_v47 = vld [vmem:[#allocation3 + $0x114] ss:$40 sps:$4 sm:$0xff]  }
 0x167   :  { %v6321_v7 = vpop.f32.mrf.mxu0  ;;  %v2313_v8 = vpop.f32.mrf.mxu1 }
 0x168   :  { %7073 = vst [vmem:[#allocation21_spill] sm:$0xff] %v6321_v7  ;;  %v6323_v10 = vadd.f32 %v2313_v8, %v2121_v59  ;;  %v6018_v59 = vld [vmem:[%s7053_s5 + $0x58] sm:$0xff]  }
 0x169   :  { %v2126_v15 = vpop.f32.mrf.mxu0  ;;  %v6325_v16 = vpop.f32.mrf.mxu1  ;;  %2817 = vmatmul.mubr.bf16.gmra.mxu0 %v5965_v55  ;;  %5263 = vmatprep.subr.bf16.mxu1 %v6018_v59  ;;  %v5977_v7 = vld [vmem:[#allocation3 + $0x1b0] ss:$40 sps:$4 sm:$0xff]  }
 0x16a   :  { %7074 = vst [vmem:[#allocation22_spill] sm:$0xff] %v6325_v16  ;;  %v2127_v17 = vadd.f32 %v2126_v15, %v6186_v9  ;;  %2826 = vmatprep.mubr.bf16.mxu0 %v5970_v3  ;;  %v6019_v3 = vld [vmem:[%s7053_s5 + $0x18] sm:$0xff]  }
 0x16b   :  { %v2128_v20 = vpop.f32.mrf.mxu0  ;;  %v2319_v26 = vpop.f32.mrf.mxu1  ;;  %5264 = vmatpush3.bf16.msra.mxu1 %v6019_v3 }
 0x16c   :  { %v2129_v31 = vadd.f32 %v2128_v20, %v6188_v12  ;;  %v6329_v33 = vadd.f32 %v2319_v26, %v2127_v17 }
 0x16d   :  { %v2130_v34 = vpop.f32.mrf.mxu0  ;;  %v2321_v38 = vpop.f32.mrf.mxu1 }
 0x16e   :  { %v2131_v42 = vadd.f32 %v2130_v34, %v6186_v9  ;;  %v6332_v45 = vadd.f32 %v2321_v38, %v2129_v31 }
 0x16f   :  { %v6334_v49 = vpop.f32.mrf.mxu0  ;;  %v2323_v53 = vpop.f32.mrf.mxu1 }
 0x170   :  { %7075 = vst [vmem:[#allocation23_spill] sm:$0xff] %v6334_v49  ;;  %v6336_v55 = vadd.f32 %v2323_v53, %v2131_v42  ;;  %v5971_v53 = vld [vmem:[#allocation3 + $0x110] ss:$40 sps:$4 sm:$0xff]   ;;  %v5974_v49 = vld [vmem:[#allocation3 + $0x160] ss:$40 sps:$4 sm:$0xff]  }
 0x171   :  { %v2136_v8 = vpop.f32.mrf.mxu0  ;;  %v6344_v15 = vpop.f32.mrf.mxu1  ;;  %2827 = vmatmul.mubr.bf16.gmra.mxu0 %v5968_v41 }
 0x172   :  { %7076 = vst [vmem:[#allocation24_spill] sm:$0xff] %v6344_v15  ;;  %v2137_v17 = vadd.f32 %v2136_v8, %v6186_v9  ;;  %2836 = vmatprep.mubr.bf16.mxu0 %v5973_v47 }
 0x173   :  { %v2138_v20 = vpop.f32.mrf.mxu0  ;;  %v2329_v26 = vpop.f32.mrf.mxu1 }
 0x174   :  { %v2139_v31 = vadd.f32 %v2138_v20, %v6188_v12  ;;  %v6348_v34 = vadd.f32 %v2329_v26, %v2137_v17 }
 0x175   :  { %v2140_v38 = vpop.f32.mrf.mxu0  ;;  %v2331_v42 = vpop.f32.mrf.mxu1 }
 0x176   :  { %v2141_v4 = vadd.f32 %v2140_v38, %v6186_v9  ;;  %v6351_v58 = vadd.f32 %v2331_v42, %v2139_v31 }
 0x177   :  { %v6353_v41 = vpop.f32.mrf.mxu0  ;;  %v2333_v8 = vpop.f32.mrf.mxu1 }
 0x178   :  { %7077 = vst [vmem:[#allocation25_spill] sm:$0xff] %v6353_v41  ;;  %v6355_v47 = vadd.f32 %v2333_v8, %v2141_v4  ;;  %v5979_v8 = vld [vmem:[#allocation3 + $0x1b4] ss:$40 sps:$4 sm:$0xff]  }
 0x179   :  { %v2146_v59 = vpop.f32.mrf.mxu0  ;;  %v6357_v15 = vpop.f32.mrf.mxu1  ;;  %2837 = vmatmul.mubr.bf16.gmra.mxu0 %v5971_v53 }
 0x17a   :  { %7078 = vst [vmem:[#allocation26_spill] sm:$0xff] %v6357_v15  ;;  %v2147_v3 = vadd.f32 %v2146_v59, %v6186_v9  ;;  %2846 = vmatprep.mubr.bf16.mxu0 %v5976_v63  ;;  %v6020_v63 = vld [vmem:[%s7053_s5 + $0x50] sm:$0xff]  }
 0x17b   :  { %v2148_v17 = vpop.f32.mrf.mxu0  ;;  %v2339_v20 = vpop.f32.mrf.mxu1  ;;  %v6021_v59 = vld [vmem:[%s7053_s5 + $0x10] sm:$0xff]   ;;  %5265 = vmatprep.subr.bf16.mxu1 %v6020_v63 }
 0x17c   :  { %v2149_v26 = vadd.f32 %v2148_v17, %v6188_v12  ;;  %v6361_v38 = vadd.f32 %v2339_v20, %v2147_v3  ;;  %5266 = vmatpush3.bf16.msra.mxu1 %v6021_v59 }
 0x17d   :  { %v2150_v31 = vpop.f32.mrf.mxu0  ;;  %v2341_v42 = vpop.f32.mrf.mxu1 }
 0x17e   :  { %v2151_v41 = vadd.f32 %v2150_v31, %v6186_v9  ;;  %v6364_v4 = vadd.f32 %v2341_v42, %v2149_v26 }
 0x17f   :  { %v6366_v16 = vpop.f32.mrf.mxu0  ;;  %v2343_v53 = vpop.f32.mrf.mxu1 }
 0x180   :  { %7079 = vst [vmem:[#allocation27_spill] sm:$0xff] %v6366_v16  ;;  %v6368_v15 = vadd.f32 %v2343_v53, %v2151_v41 }
 0x181   :  { %v2156_v3 = vpop.f32.mrf.mxu0  ;;  %v6376_v17 = vpop.f32.mrf.mxu1  ;;  %2847 = vmatmul.mubr.bf16.gmra.mxu0 %v5974_v49 }
 0x182   :  { %7080 = vst [vmem:[#allocation28_spill] sm:$0xff] %v6376_v17  ;;  %v2157_v20 = vadd.f32 %v2156_v3, %v6186_v9  ;;  %2856 = vmatprep.mubr.bf16.mxu0 %v5979_v8  ;;  %v5982_v17 = vld [vmem:[#allocation3 + $0x204] ss:$40 sps:$4 sm:$0xff]  }
 0x183   :  { %v2158_v26 = vpop.f32.mrf.mxu0  ;;  %v2349_v31 = vpop.f32.mrf.mxu1 }
 0x184   :  { %v2159_v41 = vadd.f32 %v2158_v26, %v6188_v12  ;;  %v6380_v42 = vadd.f32 %v2349_v31, %v2157_v20 }
 0x185   :  { %v2160_v53 = vpop.f32.mrf.mxu0  ;;  %v2351_v16 = vpop.f32.mrf.mxu1 }
 0x186   :  { %v2161_v40 = vadd.f32 %v2160_v53, %v6186_v9  ;;  %v6383_v27 = vadd.f32 %v2351_v16, %v2159_v41 }
 0x187   :  { %v6385_v49 = vpop.f32.mrf.mxu0  ;;  %v2353_v3 = vpop.f32.mrf.mxu1 }
 0x188   :  { %v6387_v8 = vadd.f32 %v2353_v3, %v2161_v40  ;;  %v5985_v3 = vld [vmem:[#allocation3 + $0x254] ss:$40 sps:$4 sm:$0xff]  }
 0x189   :  { %v2166_v63 = vpop.f32.mrf.mxu0  ;;  %v6389_v2 = vpop.f32.mrf.mxu1  ;;  %2857 = vmatmul.mubr.bf16.gmra.mxu0 %v5977_v7 }
 0x18a   :  { %v2167_v59 = vadd.f32 %v2166_v63, %v6186_v9  ;;  %2866 = vmatprep.mubr.bf16.mxu0 %v5982_v17  ;;  %v6022_v17 = vld [vmem:[%s7053_s5 + $0x48] sm:$0xff]  }
 0x18b   :  { %v2168_v20 = vpop.f32.mrf.mxu0  ;;  %v2359_v26 = vpop.f32.mrf.mxu1  ;;  %v6023_v63 = vld [vmem:[%s7053_s5 + $0x8] sm:$0xff]   ;;  %5267 = vmatprep.subr.bf16.mxu1 %v6022_v17 }
 0x18c   :  { %v2169_v31 = vadd.f32 %v2168_v20, %v6188_v12  ;;  %v6393_v53 = vadd.f32 %v2359_v26, %v2167_v59  ;;  %5268 = vmatpush3.bf16.msra.mxu1 %v6023_v63 }
 0x18d   :  { %v2170_v16 = vpop.f32.mrf.mxu0  ;;  %v2361_v41 = vpop.f32.mrf.mxu1 }
 0x18e   :  { %7081 = vst [vmem:[#allocation29_spill] sm:$0xff] %v6393_v53  ;;  %v2171_v36 = vadd.f32 %v2170_v16, %v6186_v9  ;;  %v6396_v40 = vadd.f32 %v2361_v41, %v2169_v31 }
 0x18f   :  { %v6398_v25 = vpop.f32.mrf.mxu0  ;;  %v2363_v7 = vpop.f32.mrf.mxu1 }
 0x190   :  { %7082 = vst [vmem:[#allocation30_spill] sm:$0xff] %v6396_v40  ;;  %7083 = vst [vmem:[#allocation31_spill] sm:$0xff] %v6398_v25  ;;  %v6400_v6 = vadd.f32 %v2363_v7, %v2171_v36 }
 0x191   :  { %v2176_v59 = vpop.f32.mrf.mxu0  ;;  %v6408_v20 = vpop.f32.mrf.mxu1  ;;  %2867 = vmatmul.mubr.bf16.gmra.mxu0 %v5980_v54 }
 0x192   :  { %7084 = vst [vmem:[#allocation32_spill] sm:$0xff] %v6400_v6  ;;  %7085 = vst [vmem:[#allocation33_spill] sm:$0xff] %v6408_v20  ;;  %v2177_v26 = vadd.f32 %v2176_v59, %v6186_v9  ;;  %2876 = vmatprep.mubr.bf16.mxu0 %v5985_v3  ;;  %v5983_v6 = vld [vmem:[#allocation3 + $0x250] ss:$40 sps:$4 sm:$0xff]   ;;  %v5988_v20 = vld [vmem:[#allocation3 + $0x2a4] ss:$40 sps:$4 sm:$0xff]  }
 0x193   :  { %v2178_v31 = vpop.f32.mrf.mxu0  ;;  %v2369_v16 = vpop.f32.mrf.mxu1 }
 0x194   :  { %v2179_v36 = vadd.f32 %v2178_v31, %v6188_v12  ;;  %v6412_v41 = vadd.f32 %v2369_v16, %v2177_v26 }
 0x195   :  { %v2180_v7 = vpop.f32.mrf.mxu0  ;;  %v2371_v60 = vpop.f32.mrf.mxu1 }
 0x196   :  { %7086 = vst [vmem:[#allocation34_spill] sm:$0xff] %v6412_v41  ;;  %v2181_v40 = vadd.f32 %v2180_v7, %v6186_v9  ;;  %v6415_v53 = vadd.f32 %v2371_v60, %v2179_v36 }
 0x197   :  { %v6417_v54 = vpop.f32.mrf.mxu0  ;;  %v2373_v59 = vpop.f32.mrf.mxu1 }
 0x198   :  { %7087 = vst [vmem:[#allocation35_spill] sm:$0xff] %v6415_v53  ;;  %v6419_v3 = vadd.f32 %v2373_v59, %v2181_v40  ;;  %v5986_v53 = vld [vmem:[#allocation3 + $0x2a0] ss:$40 sps:$4 sm:$0xff]   ;;  %v5991_v59 = vld [vmem:[#allocation3 + $0x2f4] ss:$40 sps:$4 sm:$0xff]  }
 0x199   :  { %v2186_v17 = vpop.f32.mrf.mxu0  ;;  %v6421_v25 = vpop.f32.mrf.mxu1  ;;  %2877 = vmatmul.mubr.bf16.gmra.mxu0 %v5983_v6 }
 0x19a   :  { %7088 = vst [vmem:[#allocation36_spill] sm:$0xff] %v6419_v3  ;;  %7089 = vst [vmem:[#allocation37_spill] sm:$0xff] %v6421_v25  ;;  %v2187_v63 = vadd.f32 %v2186_v17, %v6186_v9  ;;  %2886 = vmatprep.mubr.bf16.mxu0 %v5988_v20  ;;  %v6024_v20 = vld [vmem:[%s7053_s5 + $0x40] sm:$0xff]  }
 0x19b   :  { %v2188_v26 = vpop.f32.mrf.mxu0  ;;  %v2379_v31 = vpop.f32.mrf.mxu1  ;;  %v6025_v17 = vld [vmem:[%s7053_s5] sm:$0xff]   ;;  %5269 = vmatprep.subr.bf16.mxu1 %v6024_v20 }
 0x19c   :  { %v2189_v16 = vadd.f32 %v2188_v26, %v6188_v12  ;;  %v6425_v7 = vadd.f32 %v2379_v31, %v2187_v63  ;;  %5270 = vmatpush3.bf16.msra.mxu1 %v6025_v17 }
 0x19d   :  { %v2190_v60 = vpop.f32.mrf.mxu0  ;;  %v2381_v36 = vpop.f32.mrf.mxu1 }
 0x19e   :  { %v2191_v41 = vadd.f32 %v2190_v60, %v6186_v9  ;;  %v6428_v40 = vadd.f32 %v2381_v36, %v2189_v16 }
 0x19f   :  { %v6430_v3 = vpop.f32.mrf.mxu0  ;;  %v2383_v6 = vpop.f32.mrf.mxu1 }
 0x1a0   :  { %v6432_v25 = vadd.f32 %v2383_v6, %v2191_v41  ;;  %v5989_v6 = vld [vmem:[#allocation3 + $0x2f0] ss:$40 sps:$4 sm:$0xff]  }
 0x1a1   :  { %v6440_v63 = vpop.f32.mrf.mxu1  ;;  %v2422_v26 = vpop.f32.mrf.mxu0  ;;  %2887 = vmatmul.mubr.bf16.gmra.mxu0 %v5986_v53  ;;  %v5995_v53 = vld [vmem:[#allocation3 + $0x344] ss:$40 sps:$4 sm:$0xff]  }
 0x1a2   :  { %7090 = vst [vmem:[#allocation38_spill] sm:$0xff] %v6432_v25  ;;  %7091 = vst [vmem:[#allocation39_spill] sm:$0xff] %v6440_v63  ;;  %v6443_v9 = vadd.f32 %v2422_v26, %v6192_v19  ;;  %2896 = vmatprep.mubr.bf16.mxu0 %v5991_v59 }
 0x1a3   :  { %v2424_v31 = vpop.f32.mrf.mxu0  ;;  %v6445_v41 = vpop.f32.mrf.mxu1 }
 0x1a4   :  { %v6448_v16 = vadd.f32 %v2424_v31, %v6195_v24 }
 0x1a5   :  { %v2426_v60 = vpop.f32.mrf.mxu0  ;;  %v6450_v36 = vpop.f32.mrf.mxu1 }
 0x1a6   :  { %v6453_v25 = vadd.f32 %v2426_v60, %v6198_v30  ;;  %v5993_v60 = vld [vmem:[#allocation3 + $0x340] ss:$40 sps:$4 sm:$0xff]  }
 0x1a7   :  { %v2428_v63 = vpop.f32.mrf.mxu0  ;;  %v6455_v19 = vpop.f32.mrf.mxu1 }
 0x1a8   :  { %7092 = vst [vmem:[#allocation40_spill] sm:$0xff] %v6453_v25  ;;  %7093 = vst [vmem:[#allocation41_spill] sm:$0xff] %v6455_v19  ;;  %v6458_v59 = vadd.f32 %v2428_v63, %v6201_v35  ;;  %v5999_v19 = vld [vmem:[#allocation3 + $0x394] ss:$40 sps:$4 sm:$0xff]  }
 0x1a9   :  { %v2432_v20 = vpop.f32.mrf.mxu0  ;;  %2897 = vmatmul.mubr.bf16.gmra.mxu0 %v5989_v6  ;;  %v6463_v24 = vpop.f32.mrf.mxu1 }
 0x1aa   :  { %v6461_v17 = vadd.f32 %v2432_v20, %v6204_v39  ;;  %2906 = vmatprep.mubr.bf16.mxu0 %v5995_v53 }
 0x1ab   :  { %v2434_v26 = vpop.f32.mrf.mxu0  ;;  %v6471_v35 = vpop.f32.mrf.mxu1 }
 0x1ac   :  { %v6466_v31 = vadd.f32 %v2434_v26, %v6207_v44 }
 0x1ad   :  { %v2436_v30 = vpop.f32.mrf.mxu0  ;;  %v6479_v44 = vpop.f32.mrf.mxu1 }
 0x1ae   :  { %7094 = vst [vmem:[#allocation42_spill] sm:$0xff] %v6466_v31  ;;  %v6469_v25 = vadd.f32 %v2436_v30, %v6210_v50  ;;  %v5997_v30 = vld [vmem:[#allocation3 + $0x390] ss:$40 sps:$4 sm:$0xff]   ;;  %v6003_v31 = vld [vmem:[#allocation3 + $0x3e4] ss:$40 sps:$4 sm:$0xff]  }
 0x1af   :  { %v2438_v63 = vpop.f32.mrf.mxu0 }
 0x1b0   :  { %7095 = vst [vmem:[#allocation43_spill] sm:$0xff] %v6469_v25  ;;  %v6474_v6 = vadd.f32 %v2438_v63, %v6219_v57  ;;  %v6487_v57 = vpop.f32.mrf.mxu1 }
 0x1b1   :  { %v2442_v39 = vpop.f32.mrf.mxu0  ;;  %2907 = vmatmul.mubr.bf16.gmra.mxu0 %v5993_v60 }
 0x1b2   :  { %v6477_v53 = vadd.f32 %v2442_v39, %v6222_v62  ;;  %2916 = vmatprep.mubr.bf16.mxu0 %v5999_v19 }
 0x1b3   :  { %v2444_v20 = vpop.f32.mrf.mxu0 }
 0x1b4   :  { %v6482_v26 = vadd.f32 %v2444_v20, %v6225_v5  ;;  %v6495_v5 = vpop.f32.mrf.mxu1 }
 0x1b5   :  { %v2446_v50 = vpop.f32.mrf.mxu0 }
 0x1b6   :  { %7096 = vst [vmem:[#allocation44_spill] sm:$0xff] %v6482_v26  ;;  %v6485_v25 = vadd.f32 %v2446_v50, %v6228_v13  ;;  %v6001_v50 = vld [vmem:[#allocation3 + $0x3e0] ss:$40 sps:$4 sm:$0xff]   ;;  %v6007_v26 = vld [vmem:[#allocation3 + $0x434] ss:$40 sps:$4 sm:$0xff]  }
 0x1b7   :  { %v2448_v63 = vpop.f32.mrf.mxu0 }
 0x1b8   :  { %7097 = vst [vmem:[#allocation45_spill] sm:$0xff] %v6485_v25  ;;  %v6490_v60 = vadd.f32 %v2448_v63, %v6231_v18  ;;  %v6503_v18 = vpop.f32.mrf.mxu1 }
 0x1b9   :  { %v2452_v62 = vpop.f32.mrf.mxu0  ;;  %2917 = vmatmul.mubr.bf16.gmra.mxu0 %v5997_v30 }
 0x1ba   :  { %v6493_v19 = vadd.f32 %v2452_v62, %v6234_v23  ;;  %2926 = vmatprep.mubr.bf16.mxu0 %v6003_v31 }
 0x1bb   :  { %v2454_v39 = vpop.f32.mrf.mxu0 }
 0x1bc   :  { %v6498_v20 = vadd.f32 %v2454_v39, %v6237_v29  ;;  %v6511_v29 = vpop.f32.mrf.mxu1 }
 0x1bd   :  { %v2456_v13 = vpop.f32.mrf.mxu0 }
 0x1be   :  { %7098 = vst [vmem:[#allocation46_spill] sm:$0xff] %v6498_v20  ;;  %v6501_v25 = vadd.f32 %v2456_v13, %v6240_v37  ;;  %v6005_v13 = vld [vmem:[#allocation3 + $0x430] ss:$40 sps:$4 sm:$0xff]   ;;  %v6011_v20 = vld [vmem:[#allocation3 + $0x484] ss:$40 sps:$4 sm:$0xff]  }
 0x1bf   :  { %v2458_v63 = vpop.f32.mrf.mxu0 }
 0x1c0   :  { %7099 = vst [vmem:[#allocation47_spill] sm:$0xff] %v6501_v25  ;;  %v6506_v30 = vadd.f32 %v2458_v63, %v6249_v46  ;;  %v6519_v46 = vpop.f32.mrf.mxu1 }
 0x1c1   :  { %v2462_v23 = vpop.f32.mrf.mxu0  ;;  %2927 = vmatmul.mubr.bf16.gmra.mxu0 %v6001_v50 }
 0x1c2   :  { %v6509_v31 = vadd.f32 %v2462_v23, %v6252_v51  ;;  %2936 = vmatprep.mubr.bf16.mxu0 %v6007_v26  ;;  %v6526_v26 = vpop.f32.mrf.mxu1 }
 0x1c3   :  { %v2464_v62 = vpop.f32.mrf.mxu0 }
 0x1c4   :  { %v6514_v39 = vadd.f32 %v2464_v62, %v6255_v56 }
 0x1c5   :  { %v2466_v37 = vpop.f32.mrf.mxu0 }
 0x1c6   :  { %7100 = vst [vmem:[#allocation48_spill] sm:$0xff] %v6514_v39  ;;  %v6517_v25 = vadd.f32 %v2466_v37, %v6259_v1  ;;  %v6009_v1 = vld [vmem:[#allocation3 + $0x480] ss:$40 sps:$4 sm:$0xff]   ;;  %v6534_v39 = vpop.f32.mrf.mxu1 }
 0x1c7   :  { %v6521_v63 = vpop.f32.mrf.mxu0 }
 0x1c8   :  { %7101 = vst [vmem:[#allocation49_spill] sm:$0xff] %v6517_v25  ;;  %7102 = vst [vmem:[#allocation50_spill] sm:$0xff] %v6521_v63  ;;  %v6015_v25 = vld [vmem:[#allocation3 + $0x4d4] ss:$40 sps:$4 sm:$0xff]  }
 0x1c9   :  { %v2472_v50 = vpop.f32.mrf.mxu0  ;;  %2937 = vmatmul.mubr.bf16.gmra.mxu0 %v6005_v13 }
 0x1ca   :  { %v6524_v51 = vadd.f32 %v2472_v50, %v6265_v14  ;;  %2946 = vmatprep.mubr.bf16.mxu0 %v6011_v20  ;;  %v6541_v20 = vpop.f32.mrf.mxu1 }
 0x1cb   :  { %v2474_v56 = vpop.f32.mrf.mxu0 }
 0x1cc   :  { %v6529_v23 = vadd.f32 %v2474_v56, %v6268_v21 }
 0x1cd   :  { %v2476_v62 = vpop.f32.mrf.mxu0 }
 0x1ce   :  { %7103 = vst [vmem:[#allocation51_spill] sm:$0xff] %v6529_v23  ;;  %v6532_v37 = vadd.f32 %v2476_v62, %v6272_v28  ;;  %v6013_v28 = vld [vmem:[#allocation3 + $0x4d0] ss:$40 sps:$4 sm:$0xff]  }
 0x1cf   :  { %v6536_v63 = vpop.f32.mrf.mxu0 }
 0x1d0   :  { %7104 = vst [vmem:[#allocation52_spill] sm:$0xff] %v6532_v37  ;;  %v6549_v37 = vpop.f32.mrf.mxu1 }
 0x1d1   :  { %v2482_v13 = vpop.f32.mrf.mxu0  ;;  %2947 = vmatmul.mubr.bf16.gmra.mxu0 %v6009_v1 }
 0x1d2   :  { %v6539_v14 = vadd.f32 %v2482_v13, %v6284_v43  ;;  %2956 = vmatprep.mubr.bf16.mxu0 %v6015_v25  ;;  %v6556_v25 = vpop.f32.mrf.mxu1 }
 0x1d3   :  { %v2484_v21 = vpop.f32.mrf.mxu0 }
 0x1d4   :  { %v6544_v50 = vadd.f32 %v2484_v21, %v6287_v52 }
 0x1d5   :  { %v2486_v56 = vpop.f32.mrf.mxu0 }
 0x1d6   :  { %7105 = vst [vmem:[#allocation53_spill] sm:$0xff] %v6544_v50  ;;  %v6547_v62 = vadd.f32 %v2486_v56, %v6291_v61  ;;  %v6564_v61 = vpop.f32.mrf.mxu1 }
 0x1d7   :  { %v6551_v23 = vpop.f32.mrf.mxu0 }
 0x1d8   :  { %7106 = vst [vmem:[#allocation54_spill] sm:$0xff] %v6547_v62 }
 0x1d9   :  { %v2492_v1 = vpop.f32.mrf.mxu0  ;;  %2957 = vmatmul.mubr.bf16.gmra.mxu0 %v6013_v28 }
 0x1da   :  { %v6554_v43 = vadd.f32 %v2492_v1, %v6297_v11  ;;  %v6571_v11 = vpop.f32.mrf.mxu1 }
 0x1db   :  { %v2494_v13 = vpop.f32.mrf.mxu0 }
 0x1dc   :  { %7107 = vst [vmem:[#allocation55_spill] sm:$0xff] %v6554_v43  ;;  %v6559_v52 = vadd.f32 %v2494_v13, %v6300_v22 }
 0x1dd   :  { %v2496_v21 = vpop.f32.mrf.mxu0 }
 0x1de   :  { %7108 = vst [vmem:[#allocation56_spill] sm:$0xff] %v6559_v52  ;;  %v6562_v50 = vadd.f32 %v2496_v21, %v6304_v32  ;;  %v6579_v32 = vpop.f32.mrf.mxu1 }
 0x1df   :  { %v6566_v56 = vpop.f32.mrf.mxu0 }
 0x1e0   :  { %7109 = vst [vmem:[#allocation57_spill] sm:$0xff] %v6562_v50 }
 0x1e1   :  { %v2502_v62 = vpop.f32.mrf.mxu0 }
 0x1e2   :  { %v6569_v28 = vadd.f32 %v2502_v62, %v6316_v48  ;;  %v6586_v48 = vpop.f32.mrf.mxu1 }
 0x1e3   :  { %v2504_v1 = vpop.f32.mrf.mxu0 }
 0x1e4   :  { %7110 = vst [vmem:[#allocation58_spill] sm:$0xff] %v6569_v28  ;;  %v6574_v43 = vadd.f32 %v2504_v1, %v6319_v0 }
 0x1e5   :  { %v2506_v22 = vpop.f32.mrf.mxu0 }
 0x1e6   :  { %7111 = vst [vmem:[#allocation59_spill] sm:$0xff] %v6574_v43  ;;  %v6577_v13 = vadd.f32 %v2506_v22, %v6323_v10  ;;  %v6594_v10 = vpop.f32.mrf.mxu1 }
 0x1e7   :  { %v6581_v21 = vpop.f32.mrf.mxu0 }
 0x1e8   :  { %7112 = vst [vmem:[#allocation60_spill] sm:$0xff] %v6577_v13  ;;  %7113 = vst [vmem:[#allocation61_spill] sm:$0xff] %v6581_v21 }
 0x1e9   :  { %v2512_v50 = vpop.f32.mrf.mxu0 }
 0x1ea   :  { %v6584_v52 = vadd.f32 %v2512_v50, %v6329_v33  ;;  %v6601_v33 = vpop.f32.mrf.mxu1 }
 0x1eb   :  { %v2514_v62 = vpop.f32.mrf.mxu0 }
 0x1ec   :  { %7114 = vst [vmem:[#allocation62_spill] sm:$0xff] %v6584_v52  ;;  %v6589_v28 = vadd.f32 %v2514_v62, %v6332_v45 }
 0x1ed   :  { %v2516_v0 = vpop.f32.mrf.mxu0 }
 0x1ee   :  { %7115 = vst [vmem:[#allocation63_spill] sm:$0xff] %v6589_v28  ;;  %v6592_v1 = vadd.f32 %v2516_v0, %v6336_v55  ;;  %v6609_v55 = vpop.f32.mrf.mxu1 }
 0x1ef   :  { %v6596_v22 = vpop.f32.mrf.mxu0 }
 0x1f0   :  { %7116 = vst [vmem:[#allocation64_spill] sm:$0xff] %v6592_v1  ;;  %7117 = vst [vmem:[#allocation65_spill] sm:$0xff] %v6596_v22  ;;  %v7139_v22 = vld [vmem:[#allocation34_spill] sm:$0xff] }
 0x1f1   :  { %v2522_v13 = vpop.f32.mrf.mxu0 }
 0x1f2   :  { %v6599_v43 = vadd.f32 %v2522_v13, %v6348_v34  ;;  %v6616_v34 = vpop.f32.mrf.mxu1 }
 0x1f3   :  { %v2524_v50 = vpop.f32.mrf.mxu0 }
 0x1f4   :  { %7118 = vst [vmem:[#allocation66_spill] sm:$0xff] %v6599_v43  ;;  %v6604_v52 = vadd.f32 %v2524_v50, %v6351_v58 }
 0x1f5   :  { %v2526_v45 = vpop.f32.mrf.mxu0 }
 0x1f6   :  { %7119 = vst [vmem:[#allocation67_spill] sm:$0xff] %v6604_v52  ;;  %v6607_v62 = vadd.f32 %v2526_v45, %v6355_v47  ;;  %v6624_v47 = vpop.f32.mrf.mxu1  ;;  %v2163_v52 = vadd.f32 %v6385_v49, %v6188_v12 }
 0x1f7   :  { %v6611_v0 = vpop.f32.mrf.mxu0 }
 0x1f8   :  { %7120 = vst [vmem:[#allocation68_spill] sm:$0xff] %v6607_v62  ;;  %7121 = vst [vmem:[#allocation69_spill] sm:$0xff] %v6611_v0 }
 0x1f9   :  { %v2532_v1 = vpop.f32.mrf.mxu0 }
 0x1fa   :  { %v6614_v28 = vadd.f32 %v2532_v1, %v6361_v38  ;;  %v6633_v1 = vpop.f32.mrf.mxu1 }
 0x1fb   :  { %v2534_v13 = vpop.f32.mrf.mxu0 }
 0x1fc   :  { %7122 = vst [vmem:[#allocation70_spill] sm:$0xff] %v6614_v28  ;;  %v6619_v43 = vadd.f32 %v2534_v13, %v6364_v4 }
 0x1fd   :  { %v2536_v58 = vpop.f32.mrf.mxu0 }
 0x1fe   :  { %7123 = vst [vmem:[#allocation71_spill] sm:$0xff] %v6619_v43  ;;  %v6622_v50 = vadd.f32 %v2536_v58, %v6368_v15  ;;  %v2356_v15 = vadd.f32 %v6389_v2, %v2163_v52  ;;  %v7133_v52 = vld [vmem:[#allocation30_spill] sm:$0xff] }
 0x1ff   :  { %v6626_v45 = vpop.f32.mrf.mxu0 }
 0x200   :  { %7124 = vst [vmem:[#allocation72_spill] sm:$0xff] %v6622_v50  ;;  %7125 = vst [vmem:[#allocation73_spill] sm:$0xff] %v6626_v45  ;;  %v6642_v50 = vpop.f32.mrf.mxu1 }
 0x201   :  { %v2542_v62 = vpop.f32.mrf.mxu0 }
 0x202   :  { %v6631_v38 = vadd.f32 %v2542_v62, %v6380_v42  ;;  %v7130_v42 = vld [vmem:[#allocation31_spill] sm:$0xff]  ;;  %v6654_v2 = vpop.f32.mrf.mxu1 }
 0x203   :  { %v2544_v28 = vpop.f32.mrf.mxu0  ;;  %v2173_v62 = vadd.f32 %v7130_v42, %v6188_v12 }
 0x204   :  { %7126 = vst [vmem:[#allocation74_spill] sm:$0xff] %v6631_v38  ;;  %v6636_v4 = vadd.f32 %v2544_v28, %v6383_v27  ;;  %v7131_v38 = vld [vmem:[#allocation29_spill] sm:$0xff] }
 0x205   :  { %v2546_v13 = vpop.f32.mrf.mxu0  ;;  %v6026_v27 = vld [vmem:[%s7055_s7 + $0x18] sm:$0xff]  }
 0x206   :  { %7127 = vst [vmem:[#allocation75_spill] sm:$0xff] %v6636_v4  ;;  %v6640_v58 = vadd.f32 %v2546_v13, %v6387_v8  ;;  %5423 = vmatprep.subr.bf16.mxu0 %v6026_v27  ;;  %v7135_v13 = vld [vmem:[#allocation33_spill] sm:$0xff]  ;;  %v2183_v4 = vadd.f32 %v6417_v54, %v6188_v12 }
 0x207   :  { %v2548_v43 = vpop.f32.mrf.mxu0  ;;  %5424 = vmatpush3.bf16.msra.mxu0 %v6026_v27 }
 0x208   :  { %7128 = vst [vmem:[#allocation76_spill] sm:$0xff] %v6640_v58  ;;  %v6644_v45 = vadd.f32 %v2548_v43, %v2356_v15  ;;  %v2366_v15 = vadd.f32 %v7135_v13, %v2173_v62 }
 0x209   :  { %v2552_v49 = vpop.f32.mrf.mxu0 }
 0x20a   :  { %7129 = vst [vmem:[#allocation77_spill] sm:$0xff] %v6644_v45  ;;  %v6649_v0 = vadd.f32 %v2552_v49, %v7131_v38  ;;  %v7136_v45 = vld [vmem:[#allocation32_spill] sm:$0xff]  ;;  %v6663_v38 = vpop.f32.mrf.mxu1 }
 0x20b   :  { %v2554_v8 = vpop.f32.mrf.mxu0 }
 0x20c   :  { %7132 = vst [vmem:[#allocation31_spill] sm:$0xff] %v6649_v0  ;;  %v6657_v28 = vadd.f32 %v2554_v8, %v7133_v52  ;;  %v6672_v52 = vpop.f32.mrf.mxu1 }
 0x20d   :  { %v2556_v43 = vpop.f32.mrf.mxu0 }
 0x20e   :  { %7134 = vst [vmem:[#allocation29_spill] sm:$0xff] %v6657_v28  ;;  %v6661_v42 = vadd.f32 %v2556_v43, %v7136_v45  ;;  %v7141_v28 = vld [vmem:[#allocation35_spill] sm:$0xff]  ;;  %v7143_v43 = vld [vmem:[#allocation37_spill] sm:$0xff] }
 0x20f   :  { %v2558_v49 = vpop.f32.mrf.mxu0  ;;  %v2376_v13 = vadd.f32 %v7143_v43, %v2183_v4 }
 0x210   :  { %7137 = vst [vmem:[#allocation30_spill] sm:$0xff] %v6661_v42  ;;  %v6665_v0 = vadd.f32 %v2558_v49, %v2366_v15  ;;  %v7144_v42 = vld [vmem:[#allocation36_spill] sm:$0xff]  ;;  %v6681_v15 = vpop.f32.mrf.mxu1 }
 0x211   :  { %v2562_v58 = vpop.f32.mrf.mxu0 }
 0x212   :  { %7138 = vst [vmem:[#allocation33_spill] sm:$0xff] %v6665_v0  ;;  %v6670_v8 = vadd.f32 %v2562_v58, %v7139_v22  ;;  %v2193_v22 = vadd.f32 %v6430_v3, %v6188_v12 }
 0x213   :  { %v2564_v27 = vpop.f32.mrf.mxu0 }
 0x214   :  { %7140 = vst [vmem:[#allocation32_spill] sm:$0xff] %v6670_v8  ;;  %v6675_v62 = vadd.f32 %v2564_v27, %v7141_v28  ;;  %v6690_v28 = vpop.f32.mrf.mxu1 }
 0x215   :  { %v2566_v45 = vpop.f32.mrf.mxu0 }
 0x216   :  { %7142 = vst [vmem:[#allocation34_spill] sm:$0xff] %v6675_v62  ;;  %v6679_v21 = vadd.f32 %v2566_v45, %v7144_v42  ;;  %v7149_v45 = vld [vmem:[#allocation39_spill] sm:$0xff] }
 0x217   :  { %v2568_v49 = vpop.f32.mrf.mxu0  ;;  %v2386_v43 = vadd.f32 %v7149_v45, %v2193_v22  ;;  %v7154_v22 = vld [vmem:[#allocation41_spill] sm:$0xff] }
 0x218   :  { %7145 = vst [vmem:[#allocation35_spill] sm:$0xff] %v6679_v21  ;;  %v6683_v0 = vadd.f32 %v2568_v49, %v2376_v13  ;;  %v7150_v21 = vld [vmem:[#allocation38_spill] sm:$0xff]  ;;  %v6699_v13 = vpop.f32.mrf.mxu1 }
 0x219   :  { %v2572_v54 = vpop.f32.mrf.mxu0 }
 0x21a   :  { %7146 = vst [vmem:[#allocation37_spill] sm:$0xff] %v6683_v0  ;;  %v6688_v58 = vadd.f32 %v2572_v54, %v6425_v7  ;;  %v2616_v7 = vadd.f32 %v6445_v41, %v6443_v9  ;;  %v6705_v54 = vpop.f32.mrf.mxu1  ;;  %v6027_v9 = vld [vmem:[%s7055_s7 + $0x10] sm:$0xff]  }
 0x21b   :  { %v2574_v27 = vpop.f32.mrf.mxu0  ;;  %5425 = vmatprep.subr.bf16.mxu0 %v6027_v9 }
 0x21c   :  { %7147 = vst [vmem:[#allocation36_spill] sm:$0xff] %v6688_v58  ;;  %v6693_v4 = vadd.f32 %v2574_v27, %v6428_v40  ;;  %v2618_v40 = vadd.f32 %v6450_v36, %v6448_v16  ;;  %v7153_v27 = vld [vmem:[#allocation40_spill] sm:$0xff]  ;;  %v6716_v41 = vpop.f32.mrf.mxu1  ;;  %5426 = vmatpush3.bf16.msra.mxu0 %v6027_v9 }
 0x21d   :  { %v2576_v42 = vpop.f32.mrf.mxu0  ;;  %v2620_v45 = vadd.f32 %v7154_v22, %v7153_v27  ;;  %v6028_v16 = vld [vmem:[%s7055_s7 + $0x8] sm:$0xff]   ;;  %v6029_v22 = vld [vmem:[%s7055_s7] sm:$0xff]  }
 0x21e   :  { %7148 = vst [vmem:[#allocation78_spill] sm:$0xff] %v6693_v4  ;;  %v6697_v62 = vadd.f32 %v2576_v42, %v7150_v21  ;;  %5427 = vmatprep.subr.bf16.mxu0 %v6028_v16 }
 0x21f   :  { %v2578_v49 = vpop.f32.mrf.mxu0 }
 0x220   :  { %7151 = vst [vmem:[#allocation39_spill] sm:$0xff] %v6697_v62  ;;  %v6701_v0 = vadd.f32 %v2578_v49, %v2386_v43  ;;  %v2622_v62 = vadd.f32 %v6463_v24, %v6458_v59  ;;  %v2626_v59 = vadd.f32 %v6471_v35, %v6461_v17  ;;  %5428 = vmatpush3.bf16.msra.mxu0 %v6028_v16 }
 0x221   :  { %v2808_v3 = vpop.f32.mrf.mxu0  ;;  %v2632_v35 = vadd.f32 %v6495_v5, %v6474_v6  ;;  %5429 = vmatprep.subr.bf16.mxu0 %v6029_v22 }
 0x222   :  { %7152 = vst [vmem:[#allocation38_spill] sm:$0xff] %v6701_v0  ;;  %v2809_v21 = vadd.f32 %v2808_v3, %v2616_v7 }
 0x223   :  { %v2810_v58 = vpop.f32.mrf.mxu0 }
 0x224   :  { %v2811_v43 = vadd.f32 %v2810_v58, %v2618_v40  ;;  %v2967_v36 = vmax.f32 %v2809_v21, 0.0  ;;  %v7156_v21 = vld [vmem:[#allocation42_spill] sm:$0xff]  ;;  %5430 = vmatpush3.bf16.msra.mxu0 %v6029_v22  ;;  %v2642_v22 = vadd.f32 %v6526_v26, %v6490_v60 }
 0x225   :  { %v2812_v42 = vpop.f32.mrf.mxu0 }
 0x226   :  { %v2813_v49 = vadd.f32 %v2812_v42, %v2620_v45  ;;  %v2968_v24 = vmax.f32 %v2811_v43, 0.0  ;;  %v6726_v45 = vpop.f32.mrf.mxu1 }
 0x227   :  { %v2814_v0 = vpop.f32.mrf.mxu0  ;;  %7155 = vst [vmem:[#allocation40_spill] sm:$0xff] %v6726_v45 }
 0x228   :  { %v2969_v27 = vmax.f32 %v2813_v49, 0.0  ;;  %v2815_v3 = vadd.f32 %v2814_v0, %v2622_v62  ;;  %v2628_v0 = vadd.f32 %v6479_v44, %v7156_v21  ;;  %v7157_v62 = vld [vmem:[#allocation43_spill] sm:$0xff] }
 0x229   :  { %v2818_v7 = vpop.f32.mrf.mxu0  ;;  %v2630_v49 = vadd.f32 %v6487_v57, %v7157_v62  ;;  %v2636_v57 = vadd.f32 %v6503_v18, %v6477_v53 }
 0x22a   :  { %v3031_v58 = vpack.c.bf16 %v2969_v27, %v2967_v36  ;;  %v2970_v40 = vmax.f32 %v2815_v3, 0.0  ;;  %v2819_v4 = vadd.f32 %v2818_v7, %v2626_v59  ;;  %v6734_v27 = vpop.f32.mrf.mxu1 }
 0x22b   :  { %v2820_v42 = vpop.f32.mrf.mxu0 }
 0x22c   :  { %v3032_v9 = vpack.c.bf16 %v2970_v40, %v2968_v24  ;;  %v2821_v43 = vadd.f32 %v2820_v42, %v2628_v0  ;;  %v2971_v8 = vmax.f32 %v2819_v4, 0.0  ;;  %v6738_v6 = vpop.f32.mrf.mxu1  ;;  %v7158_v24 = vld [vmem:[#allocation44_spill] sm:$0xff]  ;;  %v7159_v42 = vld [vmem:[#allocation45_spill] sm:$0xff] }
 0x22d   :  { %v2822_v17 = vpop.f32.mrf.mxu0  ;;  %v2638_v40 = vadd.f32 %v6511_v29, %v7158_v24 }
 0x22e   :  { %v2823_v36 = vadd.f32 %v2822_v17, %v2630_v49  ;;  %3230 = vmatprep.mubr.bf16.mxu1 %v3032_v9  ;;  %v2972_v16 = vmax.f32 %v2821_v43, 0.0  ;;  %v6746_v18 = vpop.f32.mrf.mxu1 }
 0x22f   :  { %v2824_v3 = vpop.f32.mrf.mxu0  ;;  %3231 = vmatmul.mubr.bf16.vlgmr.msra.gmra.mxu1 %v3031_v58  ;;  %v2640_v58 = vadd.f32 %v6519_v46, %v7159_v42  ;;  %v2646_v46 = vadd.f32 %v6534_v39, %v6493_v19  ;;  %v2652_v19 = vadd.f32 %v6556_v25, %v6506_v30 }
 0x230   :  { %v2973_v44 = vmax.f32 %v2823_v36, 0.0  ;;  %v2825_v21 = vadd.f32 %v2824_v3, %v2632_v35  ;;  %v7160_v3 = vld [vmem:[#allocation13_spill] sm:$0xff]  ;;  %v6752_v26 = vpop.f32.mrf.mxu1 }
 0x231   :  { %v2828_v45 = vpop.f32.mrf.mxu0  ;;  %v2083_v60 = vadd.f32 %v7160_v3, %v6188_v12 }
 0x232   :  { %v3033_v7 = vpack.c.bf16 %v2973_v44, %v2971_v8  ;;  %v2974_v59 = vmax.f32 %v2825_v21, 0.0  ;;  %v2829_v0 = vadd.f32 %v2828_v45, %v2636_v57  ;;  %v7161_v21 = vld [vmem:[#allocation46_spill] sm:$0xff]  ;;  %v6760_v42 = vpop.f32.mrf.mxu1 }
 0x233   :  { %v2830_v5 = vpop.f32.mrf.mxu0  ;;  %v2648_v57 = vadd.f32 %v6541_v20, %v7161_v21 }
 0x234   :  { %v3034_v4 = vpack.c.bf16 %v2974_v59, %v2972_v16  ;;  %v2831_v49 = vadd.f32 %v2830_v5, %v2638_v40  ;;  %v2975_v9 = vmax.f32 %v2829_v0, 0.0  ;;  %v7162_v16 = vld [vmem:[#allocation47_spill] sm:$0xff] }
 0x235   :  { %v2832_v62 = vpop.f32.mrf.mxu0 }
 0x236   :  { %v2833_v53 = vadd.f32 %v2832_v62, %v2640_v58  ;;  %3238 = vmatprep.mubr.bf16.mxu1 %v3034_v4  ;;  %v2976_v43 = vmax.f32 %v2831_v49, 0.0  ;;  %v7163_v4 = vld [vmem:[#allocation14_spill] sm:$0xff] }
 0x237   :  { %v2834_v8 = vpop.f32.mrf.mxu0  ;;  %3239 = vmatmul.mubr.bf16.gmra.mxu1 %v3033_v7  ;;  %v2650_v7 = vadd.f32 %v6549_v37, %v7162_v16  ;;  %v2276_v0 = vadd.f32 %v7163_v4, %v2083_v60  ;;  %v2656_v37 = vadd.f32 %v6564_v61, %v6509_v31 }
 0x238   :  { %v2977_v17 = vmax.f32 %v2833_v53, 0.0  ;;  %v2835_v35 = vadd.f32 %v2834_v8, %v2642_v22  ;;  %v7164_v53 = vld [vmem:[#allocation50_spill] sm:$0xff] }
 0x239   :  { %v2838_v29 = vpop.f32.mrf.mxu0  ;;  %v2469_v8 = vadd.f32 %v7164_v53, %v2276_v0  ;;  %v7169_v0 = vld [vmem:[#allocation17_spill] sm:$0xff]  ;;  %v7171_v53 = vld [vmem:[#allocation52_spill] sm:$0xff] }
 0x23a   :  { %v3035_v45 = vpack.c.bf16 %v2977_v17, %v2975_v9  ;;  %v2978_v36 = vmax.f32 %v2835_v35, 0.0  ;;  %v2839_v5 = vadd.f32 %v2838_v29, %v2646_v46  ;;  %v7165_v17 = vld [vmem:[#allocation15_spill] sm:$0xff]  ;;  %v6768_v29 = vpop.f32.mrf.mxu1 }
 0x23b   :  { %v2840_v44 = vpop.f32.mrf.mxu0  ;;  %v2093_v35 = vadd.f32 %v7165_v17, %v6188_v12 }
 0x23c   :  { %v3036_v59 = vpack.c.bf16 %v2978_v36, %v2976_v43  ;;  %v2841_v39 = vadd.f32 %v2840_v44, %v2648_v57  ;;  %v2979_v62 = vmax.f32 %v2839_v5, 0.0  ;;  %v7166_v43 = vld [vmem:[#allocation48_spill] sm:$0xff]  ;;  %v7167_v36 = vld [vmem:[#allocation49_spill] sm:$0xff]  ;;  %v2662_v44 = vadd.f32 %v6586_v48, %v2469_v8  ;;  %v6775_v16 = vpop.f32.mrf.mxu1 }
 0x23d   :  { %v2842_v24 = vpop.f32.mrf.mxu0  ;;  %v2660_v3 = vadd.f32 %v6579_v32, %v7167_v36  ;;  %v2666_v32 = vadd.f32 %v6594_v10, %v6524_v51  ;;  %v2670_v8 = vadd.f32 %v6609_v55, %v7171_v53  ;;  %v2676_v55 = vadd.f32 %v6624_v47, %v6539_v14 }
 0x23e   :  { %v2843_v40 = vadd.f32 %v2842_v24, %v2650_v7  ;;  %3246 = vmatprep.mubr.bf16.mxu1 %v3036_v59  ;;  %v2980_v9 = vmax.f32 %v2841_v39, 0.0  ;;  %v7168_v59 = vld [vmem:[#allocation16_spill] sm:$0xff] }
 0x23f   :  { %v2844_v58 = vpop.f32.mrf.mxu0  ;;  %3247 = vmatmul.mubr.bf16.gmra.mxu1 %v3035_v45  ;;  %v2658_v45 = vadd.f32 %v6571_v11, %v7166_v43  ;;  %v2286_v5 = vadd.f32 %v7168_v59, %v2093_v35  ;;  %v7174_v59 = vld [vmem:[#allocation53_spill] sm:$0xff] }
 0x240   :  { %v2981_v20 = vmax.f32 %v2843_v40, 0.0  ;;  %v2845_v22 = vadd.f32 %v2844_v58, %v2652_v19 }
 0x241   :  { %v2848_v49 = vpop.f32.mrf.mxu0  ;;  %v2479_v40 = vadd.f32 %v6536_v63, %v2286_v5  ;;  %v2678_v5 = vadd.f32 %v6633_v1, %v7174_v59 }
 0x242   :  { %v3037_v30 = vpack.c.bf16 %v2981_v20, %v2979_v62  ;;  %v2982_v25 = vmax.f32 %v2845_v22, 0.0  ;;  %v2849_v31 = vadd.f32 %v2848_v49, %v2656_v37  ;;  %v2103_v62 = vadd.f32 %v7169_v0, %v6188_v12  ;;  %v6783_v20 = vpop.f32.mrf.mxu1  ;;  %v7170_v37 = vld [vmem:[#allocation51_spill] sm:$0xff] }
 0x243   :  { %v2850_v46 = vpop.f32.mrf.mxu0  ;;  %v2668_v49 = vadd.f32 %v6601_v33, %v7170_v37  ;;  %v2672_v63 = vadd.f32 %v6616_v34, %v2479_v40 }
 0x244   :  { %v3038_v60 = vpack.c.bf16 %v2982_v25, %v2980_v9  ;;  %v2851_v21 = vadd.f32 %v2850_v46, %v2658_v45  ;;  %v2983_v24 = vmax.f32 %v2849_v31, 0.0  ;;  %v6790_v17 = vpop.f32.mrf.mxu1  ;;  %v7172_v46 = vld [vmem:[#allocation18_spill] sm:$0xff] }
 0x245   :  { %v2852_v61 = vpop.f32.mrf.mxu0  ;;  %v2296_v43 = vadd.f32 %v7172_v46, %v2103_v62 }
 0x246   :  { %v2853_v57 = vadd.f32 %v2852_v61, %v2660_v3  ;;  %3254 = vmatprep.mubr.bf16.mxu1 %v3038_v60  ;;  %v2984_v58 = vmax.f32 %v2851_v21, 0.0 }
 0x247   :  { %v2854_v7 = vpop.f32.mrf.mxu0  ;;  %3255 = vmatmul.mubr.bf16.gmra.mxu1 %v3037_v30  ;;  %v2489_v60 = vadd.f32 %v6551_v23, %v2296_v43 }
 0x248   :  { %v2985_v19 = vmax.f32 %v2853_v57, 0.0  ;;  %v2855_v11 = vadd.f32 %v2854_v7, %v2662_v44  ;;  %v7173_v44 = vld [vmem:[#allocation19_spill] sm:$0xff]  ;;  %v6798_v57 = vpop.f32.mrf.mxu1 }
 0x249   :  { %v2858_v39 = vpop.f32.mrf.mxu0  ;;  %v2113_v21 = vadd.f32 %v7173_v44, %v6188_v12  ;;  %v2682_v23 = vadd.f32 %v6654_v2, %v2489_v60  ;;  %v7181_v60 = vld [vmem:[#allocation22_spill] sm:$0xff] }
 0x24a   :  { %v3039_v48 = vpack.c.bf16 %v2985_v19, %v2983_v24  ;;  %v2986_v4 = vmax.f32 %v2855_v11, 0.0  ;;  %v2859_v51 = vadd.f32 %v2858_v39, %v2666_v32  ;;  %v7175_v24 = vld [vmem:[#allocation54_spill] sm:$0xff]  ;;  %v6805_v40 = vpop.f32.mrf.mxu1 }
 0x24b   :  { %v2860_v22 = vpop.f32.mrf.mxu0  ;;  %v2680_v19 = vadd.f32 %v6642_v50, %v7175_v24  ;;  %v7182_v44 = vld [vmem:[#allocation58_spill] sm:$0xff] }
 0x24c   :  { %v3040_v9 = vpack.c.bf16 %v2986_v4, %v2984_v58  ;;  %v2861_v30 = vadd.f32 %v2860_v22, %v2668_v49  ;;  %v2987_v45 = vmax.f32 %v2859_v51, 0.0  ;;  %v7177_v22 = vld [vmem:[#allocation55_spill] sm:$0xff] }
 0x24d   :  { %v2862_v10 = vpop.f32.mrf.mxu0  ;;  %v2686_v50 = vadd.f32 %v6663_v38, %v7177_v22 }
 0x24e   :  { %v2863_v25 = vadd.f32 %v2862_v10, %v2670_v8  ;;  %3262 = vmatprep.mubr.bf16.mxu1 %v3040_v9  ;;  %v2988_v31 = vmax.f32 %v2861_v30, 0.0  ;;  %v7178_v9 = vld [vmem:[#allocation21_spill] sm:$0xff]  ;;  %v6813_v10 = vpop.f32.mrf.mxu1  ;;  %v7179_v30 = vld [vmem:[#allocation56_spill] sm:$0xff] }
 0x24f   :  { %v2864_v35 = vpop.f32.mrf.mxu0  ;;  %3263 = vmatmul.mubr.bf16.gmra.mxu1 %v3039_v48  ;;  %v7176_v48 = vld [vmem:[#allocation20_spill] sm:$0xff]  ;;  %v2123_v51 = vadd.f32 %v7178_v9, %v6188_v12  ;;  %v7189_v9 = vld [vmem:[#allocation62_spill] sm:$0xff] }
 0x250   :  { %v2989_v36 = vmax.f32 %v2863_v25, 0.0  ;;  %v2865_v33 = vadd.f32 %v2864_v35, %v2672_v63  ;;  %v2306_v4 = vadd.f32 %v7176_v48, %v2113_v21  ;;  %v2688_v25 = vadd.f32 %v6672_v52, %v7179_v30  ;;  %v7180_v35 = vld [vmem:[#allocation57_spill] sm:$0xff] }
 0x251   :  { %v2868_v3 = vpop.f32.mrf.mxu0  ;;  %v2690_v46 = vadd.f32 %v6681_v15, %v7180_v35  ;;  %v2696_v15 = vadd.f32 %v6699_v13, %v7182_v44 }
 0x252   :  { %v3041_v34 = vpack.c.bf16 %v2989_v36, %v2987_v45  ;;  %v2990_v61 = vmax.f32 %v2865_v33, 0.0  ;;  %v2869_v14 = vadd.f32 %v2868_v3, %v2676_v55  ;;  %v2499_v49 = vadd.f32 %v6566_v56, %v2306_v4  ;;  %v6820_v55 = vpop.f32.mrf.mxu1 }
 0x253   :  { %v2870_v7 = vpop.f32.mrf.mxu0 }
 0x254   :  { %v3042_v11 = vpack.c.bf16 %v2990_v61, %v2988_v31  ;;  %v2871_v32 = vadd.f32 %v2870_v7, %v2678_v5  ;;  %v2991_v0 = vmax.f32 %v2869_v14, 0.0  ;;  %v2692_v56 = vadd.f32 %v6690_v28, %v2499_v49  ;;  %v7183_v7 = vld [vmem:[#allocation61_spill] sm:$0xff]  ;;  %v6828_v14 = vpop.f32.mrf.mxu1  ;;  %v7188_v49 = vld [vmem:[#allocation24_spill] sm:$0xff] }
 0x255   :  { %v2872_v47 = vpop.f32.mrf.mxu0  ;;  %v2316_v31 = vadd.f32 %v7181_v60, %v2123_v51 }
 0x256   :  { %v2873_v39 = vadd.f32 %v2872_v47, %v2680_v19  ;;  %3270 = vmatprep.mubr.bf16.mxu1 %v3042_v11  ;;  %v2992_v53 = vmax.f32 %v2871_v32, 0.0  ;;  %v7184_v19 = vld [vmem:[#allocation23_spill] sm:$0xff] }
 0x257   :  { %v2874_v58 = vpop.f32.mrf.mxu0  ;;  %3271 = vmatmul.mubr.bf16.gmra.mxu1 %v3041_v34  ;;  %v2509_v59 = vadd.f32 %v7183_v7, %v2316_v31  ;;  %v2133_v11 = vadd.f32 %v7184_v19, %v6188_v12  ;;  %v7194_v7 = vld [vmem:[#allocation26_spill] sm:$0xff] }
 0x258   :  { %v2993_v62 = vmax.f32 %v2873_v39, 0.0  ;;  %v2875_v1 = vadd.f32 %v2874_v58, %v2682_v23  ;;  %v7185_v23 = vld [vmem:[#allocation59_spill] sm:$0xff]  ;;  %v7186_v39 = vld [vmem:[#allocation60_spill] sm:$0xff] }
 0x259   :  { %v2878_v37 = vpop.f32.mrf.mxu0  ;;  %v2698_v32 = vadd.f32 %v6705_v54, %v7185_v23  ;;  %v2700_v58 = vadd.f32 %v6716_v41, %v7186_v39  ;;  %v2706_v41 = vadd.f32 %v6734_v27, %v7189_v9  ;;  %v7197_v39 = vld [vmem:[#allocation27_spill] sm:$0xff] }
 0x25a   :  { %v3043_v2 = vpack.c.bf16 %v2993_v62, %v2991_v0  ;;  %v2994_v8 = vmax.f32 %v2875_v1, 0.0  ;;  %v2879_v38 = vadd.f32 %v2878_v37, %v2686_v50  ;;  %v7187_v0 = vld [vmem:[#allocation40_spill] sm:$0xff]  ;;  %v6835_v50 = vpop.f32.mrf.mxu1 }
 0x25b   :  { %v2880_v63 = vpop.f32.mrf.mxu0  ;;  %v2702_v62 = vadd.f32 %v7187_v0, %v2509_v59 }
 0x25c   :  { %v3044_v43 = vpack.c.bf16 %v2994_v8, %v2992_v53  ;;  %v2881_v36 = vadd.f32 %v2880_v63, %v2688_v25  ;;  %v2995_v34 = vmax.f32 %v2879_v38, 0.0  ;;  %v2326_v53 = vadd.f32 %v7188_v49, %v2133_v11  ;;  %v7190_v63 = vld [vmem:[#allocation65_spill] sm:$0xff] }
 0x25d   :  { %v2882_v45 = vpop.f32.mrf.mxu0  ;;  %v7196_v11 = vld [vmem:[#allocation69_spill] sm:$0xff] }
 0x25e   :  { %v2883_v33 = vadd.f32 %v2882_v45, %v2690_v46  ;;  %3278 = vmatprep.mubr.bf16.mxu1 %v3044_v43  ;;  %v2996_v5 = vmax.f32 %v2881_v36, 0.0  ;;  %v2519_v30 = vadd.f32 %v7190_v63, %v2326_v53  ;;  %v7191_v43 = vld [vmem:[#allocation25_spill] sm:$0xff]  ;;  %v6843_v45 = vpop.f32.mrf.mxu1  ;;  %v7192_v36 = vld [vmem:[#allocation63_spill] sm:$0xff] }
 0x25f   :  { %v2884_v3 = vpop.f32.mrf.mxu0  ;;  %3279 = vmatmul.mubr.bf16.gmra.mxu1 %v3043_v2  ;;  %v2143_v38 = vadd.f32 %v7191_v43, %v6188_v12 }
 0x260   :  { %v2997_v61 = vmax.f32 %v2883_v33, 0.0  ;;  %v2885_v52 = vadd.f32 %v2884_v3, %v2692_v56  ;;  %v2708_v33 = vadd.f32 %v6738_v6, %v7192_v36  ;;  %v7193_v3 = vld [vmem:[#allocation64_spill] sm:$0xff]  ;;  %v7203_v36 = vld [vmem:[#allocation71_spill] sm:$0xff] }
 0x261   :  { %v2888_v21 = vpop.f32.mrf.mxu0  ;;  %v2710_v60 = vadd.f32 %v6746_v18, %v7193_v3  ;;  %v2336_v59 = vadd.f32 %v7194_v7, %v2143_v38  ;;  %v7204_v3 = vld [vmem:[#allocation72_spill] sm:$0xff] }
 0x262   :  { %v3045_v28 = vpack.c.bf16 %v2997_v61, %v2995_v34  ;;  %v2998_v24 = vmax.f32 %v2885_v52, 0.0  ;;  %v2889_v13 = vadd.f32 %v2888_v21, %v2696_v15  ;;  %v2712_v61 = vadd.f32 %v6752_v26, %v2519_v30  ;;  %v6850_v15 = vpop.f32.mrf.mxu1 }
 0x263   :  { %v2890_v47 = vpop.f32.mrf.mxu0 }
 0x264   :  { %v3046_v48 = vpack.c.bf16 %v2998_v24, %v2996_v5  ;;  %v2891_v1 = vadd.f32 %v2890_v47, %v2698_v32  ;;  %v2999_v2 = vmax.f32 %v2889_v13, 0.0  ;;  %v7195_v24 = vld [vmem:[#allocation66_spill] sm:$0xff]  ;;  %v2529_v47 = vadd.f32 %v7196_v11, %v2336_v59 }
 0x265   :  { %v2892_v4 = vpop.f32.mrf.mxu0  ;;  %v2716_v18 = vadd.f32 %v6760_v42, %v7195_v24 }
 0x266   :  { %v2893_v22 = vadd.f32 %v2892_v4, %v2700_v58  ;;  %3286 = vmatprep.mubr.bf16.mxu1 %v3046_v48  ;;  %v3000_v25 = vmax.f32 %v2891_v1, 0.0  ;;  %v2153_v58 = vadd.f32 %v7197_v39, %v6188_v12  ;;  %v6858_v48 = vpop.f32.mrf.mxu1  ;;  %v7198_v4 = vld [vmem:[#allocation67_spill] sm:$0xff]  ;;  %v2722_v49 = vadd.f32 %v6783_v20, %v2529_v47  ;;  %v7200_v12 = vld [vmem:[#allocation28_spill] sm:$0xff] }
 0x267   :  { %v2894_v37 = vpop.f32.mrf.mxu0  ;;  %3287 = vmatmul.mubr.bf16.gmra.mxu1 %v3045_v28  ;;  %v2718_v0 = vadd.f32 %v6768_v29, %v7198_v4  ;;  %v7201_v29 = vld [vmem:[#allocation70_spill] sm:$0xff]  ;;  %v7206_v47 = vld [vmem:[#allocation75_spill] sm:$0xff] }
 0x268   :  { %v3001_v8 = vmax.f32 %v2893_v22, 0.0  ;;  %v2895_v54 = vadd.f32 %v2894_v37, %v2702_v62  ;;  %v7199_v62 = vld [vmem:[#allocation68_spill] sm:$0xff]  ;;  %v2346_v9 = vadd.f32 %v7200_v12, %v2153_v58  ;;  %v2726_v30 = vadd.f32 %v6790_v17, %v7201_v29 }
 0x269   :  { %v2898_v51 = vpop.f32.mrf.mxu0  ;;  %v2720_v1 = vadd.f32 %v6775_v16, %v7199_v62 }
 0x26a   :  { %v3047_v35 = vpack.c.bf16 %v3001_v8, %v2999_v2  ;;  %v3002_v46 = vmax.f32 %v2895_v54, 0.0  ;;  %v2899_v27 = vadd.f32 %v2898_v51, %v2706_v41  ;;  %v2749_v8 = vpop.f32.mrf.mxu1 }
 0x26b   :  { %v2900_v56 = vpop.f32.mrf.mxu0 }
 0x26c   :  { %v3048_v31 = vpack.c.bf16 %v3002_v46, %v3000_v25  ;;  %v2901_v52 = vadd.f32 %v2900_v56, %v2708_v33  ;;  %v3003_v5 = vmax.f32 %v2899_v27, 0.0  ;;  %v7202_v25 = vld [vmem:[#allocation73_spill] sm:$0xff]  ;;  %v2751_v38 = vpop.f32.mrf.mxu1  ;;  %v2728_v33 = vadd.f32 %v6798_v57, %v7203_v36 }
 0x26d   :  { %v2902_v34 = vpop.f32.mrf.mxu0 }
 0x26e   :  { %v2903_v44 = vadd.f32 %v2902_v34, %v2710_v60  ;;  %3294 = vmatprep.mubr.bf16.mxu1 %v3048_v31  ;;  %v3004_v23 = vmax.f32 %v2901_v52, 0.0  ;;  %v2730_v60 = vadd.f32 %v6805_v40, %v7204_v3 }
 0x26f   :  { %v2904_v21 = vpop.f32.mrf.mxu0  ;;  %3295 = vmatmul.mubr.bf16.gmra.mxu1 %v3047_v35  ;;  %v2539_v35 = vadd.f32 %v7202_v25, %v2346_v9  ;;  %v7212_v25 = vld [vmem:[#allocation33_spill] sm:$0xff] }
 0x270   :  { %v3005_v28 = vmax.f32 %v2903_v44, 0.0  ;;  %v2905_v6 = vadd.f32 %v2904_v21, %v2712_v61  ;;  %v2755_v44 = vpop.f32.mrf.mxu1 }
 0x271   :  { %v2908_v19 = vpop.f32.mrf.mxu0  ;;  %v2732_v61 = vadd.f32 %v6813_v10, %v2539_v35  ;;  %v2738_v10 = vadd.f32 %v6828_v14, %v7206_v47  ;;  %v7209_v14 = vld [vmem:[#allocation31_spill] sm:$0xff]  ;;  %v2752_v35 = vadd.f32 %v2751_v38, %v7212_v25  ;;  %v6902_v25 = vld [vmem:[%s7054_s6] ss:$0 sm:$0xff] }
 0x272   :  { %v3049_v26 = vpack.c.bf16 %v3005_v28, %v3003_v5  ;;  %v3006_v32 = vmax.f32 %v2905_v6, 0.0  ;;  %v2909_v42 = vadd.f32 %v2908_v19, %v2716_v18  ;;  %v7205_v6 = vld [vmem:[#allocation74_spill] sm:$0xff]  ;;  %v2757_v19 = vpop.f32.mrf.mxu1  ;;  %v7215_v38 = vld [vmem:[#allocation35_spill] sm:$0xff] }
 0x273   :  { %v2910_v13 = vpop.f32.mrf.mxu0  ;;  %v2736_v57 = vadd.f32 %v6820_v55, %v7205_v6 }
 0x274   :  { %v3050_v22 = vpack.c.bf16 %v3006_v32, %v3004_v23  ;;  %v2911_v53 = vadd.f32 %v2910_v13, %v2718_v0  ;;  %v3007_v41 = vmax.f32 %v2909_v42, 0.0  ;;  %v7207_v23 = vld [vmem:[#allocation76_spill] sm:$0xff]  ;;  %v7208_v13 = vld [vmem:[#allocation77_spill] sm:$0xff]  ;;  %v2759_v55 = vpop.f32.mrf.mxu1 }
 0x275   :  { %v2912_v37 = vpop.f32.mrf.mxu0  ;;  %v2742_v4 = vadd.f32 %v6843_v45, %v7208_v13 }
 0x276   :  { %v2913_v2 = vadd.f32 %v2912_v37, %v2720_v1  ;;  %3302 = vmatprep.mubr.bf16.mxu1 %v3050_v22  ;;  %v3008_v46 = vmax.f32 %v2911_v53, 0.0  ;;  %v2746_v53 = vadd.f32 %v6850_v15, %v7209_v14  ;;  %v2761_v12 = vpop.f32.mrf.mxu1 }
 0x277   :  { %v2914_v54 = vpop.f32.mrf.mxu0  ;;  %3303 = vmatmul.mubr.bf16.gmra.mxu1 %v3049_v26  ;;  %v2740_v26 = vadd.f32 %v6835_v50, %v7207_v23  ;;  %v7217_v23 = vld [vmem:[#allocation36_spill] sm:$0xff] }
 0x278   :  { %v3009_v51 = vmax.f32 %v2913_v2, 0.0  ;;  %v2915_v63 = vadd.f32 %v2914_v54, %v2722_v49 }
 0x279   :  { %v2918_v16 = vpop.f32.mrf.mxu0 }
 0x27a   :  { %v3051_v43 = vpack.c.bf16 %v3009_v51, %v3007_v41  ;;  %v3010_v20 = vmax.f32 %v2915_v63, 0.0  ;;  %v2919_v27 = vadd.f32 %v2918_v16, %v2726_v30  ;;  %v7210_v41 = vld [vmem:[#allocation29_spill] sm:$0xff]  ;;  %v7211_v51 = vld [vmem:[#allocation30_spill] sm:$0xff] }
 0x27b   :  { %v2920_v56 = vpop.f32.mrf.mxu0  ;;  %v2748_v45 = vadd.f32 %v6858_v48, %v7210_v41  ;;  %v2750_v63 = vadd.f32 %v2749_v8, %v7211_v51 }
 0x27c   :  { %v3052_v31 = vpack.c.bf16 %v3010_v20, %v3008_v46  ;;  %v2921_v17 = vadd.f32 %v2920_v56, %v2728_v33  ;;  %v3011_v7 = vmax.f32 %v2919_v27, 0.0  ;;  %v2765_v20 = vpop.f32.mrf.mxu1 }
 0x27d   :  { %v2922_v34 = vpop.f32.mrf.mxu0 }
 0x27e   :  { %v2923_v52 = vadd.f32 %v2922_v34, %v2730_v60  ;;  %3310 = vmatprep.mubr.bf16.mxu1 %v3052_v31  ;;  %v3012_v24 = vmax.f32 %v2921_v17, 0.0  ;;  %v7213_v60 = vld [vmem:[#allocation32_spill] sm:$0xff]  ;;  %v2767_v34 = vpop.f32.mrf.mxu1  ;;  %v7214_v17 = vld [vmem:[#allocation34_spill] sm:$0xff] }
 0x27f   :  { %v2924_v21 = vpop.f32.mrf.mxu0  ;;  %3311 = vmatmul.mubr.bf16.gmra.mxu1 %v3051_v43  ;;  %v2756_v31 = vadd.f32 %v2755_v44, %v7213_v60 }
 0x280   :  { %v3013_v59 = vmax.f32 %v2923_v52, 0.0  ;;  %v2925_v5 = vadd.f32 %v2924_v21, %v2732_v61  ;;  %v2758_v52 = vadd.f32 %v2757_v19, %v7214_v17  ;;  %v2760_v21 = vadd.f32 %v2759_v55, %v7215_v38 }
 0x281   :  { %v2928_v28 = vpop.f32.mrf.mxu0 }
 0x282   :  { %v3053_v40 = vpack.c.bf16 %v3013_v59, %v3011_v7  ;;  %v3014_v18 = vmax.f32 %v2925_v5, 0.0  ;;  %v2929_v39 = vadd.f32 %v2928_v28, %v2736_v57  ;;  %v7216_v28 = vld [vmem:[#allocation37_spill] sm:$0xff] }
 0x283   :  { %v2930_v11 = vpop.f32.mrf.mxu0  ;;  %v2762_v6 = vadd.f32 %v2761_v12, %v7216_v28 }
 0x284   :  { %v3054_v32 = vpack.c.bf16 %v3014_v18, %v3012_v24  ;;  %v2931_v0 = vadd.f32 %v2930_v11, %v2738_v10  ;;  %v3015_v22 = vmax.f32 %v2929_v39, 0.0 }
 0x285   :  { %v2932_v58 = vpop.f32.mrf.mxu0 }
 0x286   :  { %v2933_v62 = vadd.f32 %v2932_v58, %v2740_v26  ;;  %3318 = vmatprep.mubr.bf16.mxu1 %v3054_v32  ;;  %v3016_v50 = vmax.f32 %v2931_v0, 0.0  ;;  %v2766_v26 = vadd.f32 %v2765_v20, %v7217_v23 }
 0x287   :  { %v2934_v1 = vpop.f32.mrf.mxu0  ;;  %3319 = vmatmul.mubr.bf16.gmra.mxu1 %v3053_v40  ;;  %v2769_v40 = vpop.f32.mrf.mxu1 }
 0x288   :  { %v3017_v42 = vmax.f32 %v2933_v62, 0.0  ;;  %v2935_v37 = vadd.f32 %v2934_v1, %v2742_v4  ;;  %v7218_v4 = vld [vmem:[#allocation78_spill] sm:$0xff]  ;;  %v7219_v62 = vld [vmem:[#allocation39_spill] sm:$0xff] }
 0x289   :  { %v2938_v49 = vpop.f32.mrf.mxu0  ;;  %v2771_v58 = vpop.f32.mrf.mxu1  ;;  %v2768_v0 = vadd.f32 %v2767_v34, %v7218_v4  ;;  %v2770_v55 = vadd.f32 %v2769_v40, %v7219_v62 }
 0x28a   :  { %v3055_v2 = vpack.c.bf16 %v3017_v42, %v3015_v22  ;;  %v3018_v54 = vmax.f32 %v2935_v37, 0.0  ;;  %v2939_v30 = vadd.f32 %v2938_v49, %v2746_v53  ;;  %v7220_v37 = vld [vmem:[#allocation38_spill] sm:$0xff] }
 0x28b   :  { %v2940_v9 = vpop.f32.mrf.mxu0  ;;  %v2772_v49 = vadd.f32 %v2771_v58, %v7220_v37 }
 0x28c   :  { %v3056_v29 = vpack.c.bf16 %v3018_v54, %v3016_v50  ;;  %v2941_v46 = vadd.f32 %v2940_v9, %v2748_v45  ;;  %v3019_v56 = vmax.f32 %v2939_v30, 0.0 }
 0x28d   :  { %v2942_v16 = vpop.f32.mrf.mxu0 }
 0x28e   :  { %v2943_v43 = vadd.f32 %v2942_v16, %v2750_v63  ;;  %3326 = vmatprep.mubr.bf16.mxu1 %v3056_v29  ;;  %v3020_v48 = vmax.f32 %v2941_v46, 0.0  ;;  %v3691_v63 = vld [vmem:[%s7057_s9 + $0x18] sm:$0xff]  ;;  %v3690_v46 = vld [vmem:[%s7057_s9 + $0x10] sm:$0xff] }
 0x28f   :  { %v2944_v15 = vpop.f32.mrf.mxu0  ;;  %3327 = vmatmul.mubr.bf16.gmra.mxu1 %v3055_v2  ;;  %5463 = vmatprep.subr.mxu1 %v3691_v63 }
 0x290   :  { %v3021_v36 = vmax.f32 %v2943_v43, 0.0  ;;  %v2945_v33 = vadd.f32 %v2944_v15, %v2752_v35  ;;  %5464 = vmatpush3.msra.mxu1 %v3691_v63 }
 0x291   :  { %v2948_v3 = vpop.f32.mrf.mxu0  ;;  %5465 = vmatprep.subr.mxu1 %v3690_v46 }
 0x292   :  { %v3057_v27 = vpack.c.bf16 %v3021_v36, %v3019_v56  ;;  %v3022_v8 = vmax.f32 %v2945_v33, 0.0  ;;  %v2949_v59 = vadd.f32 %v2948_v3, %v2756_v31  ;;  %5466 = vmatpush3.msra.mxu1 %v3690_v46  ;;  %v3689_v56 = vld [vmem:[%s7057_s9 + $0x8] sm:$0xff]  ;;  %v3688_v36 = vld [vmem:[%s7057_s9] sm:$0xff] }
 0x293   :  { %v2950_v61 = vpop.f32.mrf.mxu0  ;;  %5467 = vmatprep.subr.mxu1 %v3689_v56 }
 0x294   :  { %v3058_v7 = vpack.c.bf16 %v3022_v8, %v3020_v48  ;;  %v2951_v57 = vadd.f32 %v2950_v61, %v2758_v52  ;;  %v3023_v44 = vmax.f32 %v2949_v59, 0.0  ;;  %5468 = vmatpush3.msra.mxu1 %v3689_v56 }
 0x295   :  { %v2952_v5 = vpop.f32.mrf.mxu0  ;;  %5469 = vmatprep.subr.mxu1 %v3688_v36 }
 0x296   :  { %v2953_v24 = vadd.f32 %v2952_v5, %v2760_v21  ;;  %3334 = vmatprep.mubr.bf16.mxu1 %v3058_v7  ;;  %v3024_v19 = vmax.f32 %v2951_v57, 0.0  ;;  %5470 = vmatpush3.msra.mxu1 %v3688_v36 }
 0x297   :  { %v2954_v18 = vpop.f32.mrf.mxu0  ;;  %3335 = vmatmul.mubr.bf16.gmra.mxu1 %v3057_v27 }
 0x298   :  { %v3025_v11 = vmax.f32 %v2953_v24, 0.0  ;;  %v2955_v47 = vadd.f32 %v2954_v18, %v2762_v6 }
 0x299   :  { %v2958_v10 = vpop.f32.mrf.mxu0 }
 0x29a   :  { %v3059_v32 = vpack.c.bf16 %v3025_v11, %v3023_v44  ;;  %v3026_v39 = vmax.f32 %v2955_v47, 0.0  ;;  %v2959_v22 = vadd.f32 %v2958_v10, %v2766_v26 }
 0x29b   :  { %v2960_v13 = vpop.f32.mrf.mxu0 }
 0x29c   :  { %v3060_v1 = vpack.c.bf16 %v3026_v39, %v3024_v19  ;;  %v2961_v14 = vadd.f32 %v2960_v13, %v2768_v0  ;;  %v3027_v2 = vmax.f32 %v2959_v22, 0.0 }
 0x29d   :  { %v2962_v42 = vpop.f32.mrf.mxu0 }
 0x29e   :  { %v2963_v53 = vadd.f32 %v2962_v42, %v2770_v55  ;;  %3342 = vmatprep.mubr.bf16.mxu1 %v3060_v1  ;;  %v3028_v9 = vmax.f32 %v2961_v14, 0.0 }
 0x29f   :  { %v2964_v50 = vpop.f32.mrf.mxu0  ;;  %3343 = vmatmul.mubr.bf16.gmra.mxu1 %v3059_v32 }
 0x2a0   :  { %v3029_v54 = vmax.f32 %v2963_v53, 0.0  ;;  %v2965_v12 = vadd.f32 %v2964_v50, %v2772_v49 }
 0x2a2   :  { %v3061_v41 = vpack.c.bf16 %v3029_v54, %v3027_v2  ;;  %v3030_v45 = vmax.f32 %v2965_v12, 0.0 }
 0x2a4   :  { %v3062_v51 = vpack.c.bf16 %v3030_v45, %v3028_v9 }
 0x2a6   :  { %3350 = vmatprep.mubr.bf16.mxu1 %v3062_v51 }
 0x2a7   :  { %3351 = vmatmul.mubr.bf16.gmra.mxu1 %v3061_v41 }
 0x2ef   :  { %v5271_v29 = vpop.f32.mrf.mxu1 }
 0x2f1   :  { %v5272_v30 = vpop.f32.mrf.mxu1 }
 0x2f2   :  { %v5273_v16 = vadd.f32 %v5272_v30, %v5271_v29 }
 0x2f3   :  { %v5274_v35 = vpop.f32.mrf.mxu1 }
 0x2f4   :  { %v3233_v20 = vadd.f32 %v5273_v16, %v6902_v25 }
 0x2f5   :  { %v5275_v43 = vpop.f32.mrf.mxu1 }
 0x2f6   :  { %v5276_v15 = vadd.f32 %v5275_v43, %v5274_v35  ;;  %v3359_v31 = vmax.f32 %v3233_v20, 0.0 }
 0x2f7   :  { %v5277_v33 = vpop.f32.mrf.mxu1 }
 0x2f8   :  { %v3236_v3 = vadd.f32 %v5276_v15, %v6902_v25 }
 0x2f9   :  { %v5278_v60 = vpop.f32.mrf.mxu1 }
 0x2fa   :  { %v3360_v48 = vmax.f32 %v3236_v3, 0.0  ;;  %v5279_v27 = vadd.f32 %v5278_v60, %v5277_v33 }
 0x2fb   :  { %v5280_v8 = vpop.f32.mrf.mxu1 }
 0x2fc   :  { %v3391_v34 = vpack.c.bf16 %v3360_v48, %v3359_v31  ;;  %v3241_v17 = vadd.f32 %v5279_v27, %v6902_v25 }
 0x2fd   :  { %v5281_v61 = vpop.f32.mrf.mxu1 }
 0x2fe   :  { %v5282_v52 = vadd.f32 %v5281_v61, %v5280_v8  ;;  %5431 = vmatprep.mubr.msk.bf16.mxu0 %vm3446_vm0, %v3391_v34  ;;  %v3361_v59 = vmax.f32 %v3241_v17, 0.0 }
 0x2ff   :  { %v5283_v38 = vpop.f32.mrf.mxu1 }
 0x300   :  { %v3244_v21 = vadd.f32 %v5282_v52, %v6902_v25 }
 0x301   :  { %v5284_v7 = vpop.f32.mrf.mxu1 }
 0x302   :  { %v3362_v5 = vmax.f32 %v3244_v21, 0.0  ;;  %v5285_v28 = vadd.f32 %v5284_v7, %v5283_v38 }
 0x303   :  { %v5286_v6 = vpop.f32.mrf.mxu1 }
 0x304   :  { %v3392_v57 = vpack.c.bf16 %v3362_v5, %v3361_v59  ;;  %v3249_v40 = vadd.f32 %v5285_v28, %v6902_v25 }
 0x305   :  { %v5287_v24 = vpop.f32.mrf.mxu1 }
 0x306   :  { %v5288_v18 = vadd.f32 %v5287_v24, %v5286_v6  ;;  %5432 = vmatmul.mubr.msk.bf16.vlgmr.msra.gmra.mxu0 %vm3446_vm0, %v3392_v57  ;;  %v3363_v10 = vmax.f32 %v3249_v40, 0.0 }
 0x307   :  { %v5289_v44 = vpop.f32.mrf.mxu1 }
 0x308   :  { %v3252_v11 = vadd.f32 %v5288_v18, %v6902_v25 }
 0x309   :  { %v5290_v47 = vpop.f32.mrf.mxu1 }
 0x30a   :  { %v3364_v23 = vmax.f32 %v3252_v11, 0.0  ;;  %v5291_v26 = vadd.f32 %v5290_v47, %v5289_v44 }
 0x30b   :  { %v5292_v19 = vpop.f32.mrf.mxu1 }
 0x30c   :  { %v3393_v32 = vpack.c.bf16 %v3364_v23, %v3363_v10  ;;  %v3257_v58 = vadd.f32 %v5291_v26, %v6902_v25 }
 0x30d   :  { %v5293_v39 = vpop.f32.mrf.mxu1 }
 0x30e   :  { %v5294_v13 = vadd.f32 %v5293_v39, %v5292_v19  ;;  %5435 = vmatprep.mubr.msk.bf16.mxu0 %vm3446_vm0, %v3393_v32  ;;  %v3365_v55 = vmax.f32 %v3257_v58, 0.0 }
 0x30f   :  { %v5295_v4 = vpop.f32.mrf.mxu1 }
 0x310   :  { %v3260_v0 = vadd.f32 %v5294_v13, %v6902_v25 }
 0x311   :  { %v5296_v62 = vpop.f32.mrf.mxu1 }
 0x312   :  { %v3366_v1 = vmax.f32 %v3260_v0, 0.0  ;;  %v5297_v22 = vadd.f32 %v5296_v62, %v5295_v4 }
 0x313   :  { %v5298_v42 = vpop.f32.mrf.mxu1 }
 0x314   :  { %v3394_v37 = vpack.c.bf16 %v3366_v1, %v3365_v55  ;;  %v3265_v14 = vadd.f32 %v5297_v22, %v6902_v25 }
 0x315   :  { %v5299_v49 = vpop.f32.mrf.mxu1 }
 0x316   :  { %v5300_v53 = vadd.f32 %v5299_v49, %v5298_v42  ;;  %5436 = vmatmul.mubr.msk.bf16.gmra.mxu0 %vm3446_vm0, %v3394_v37  ;;  %v3367_v12 = vmax.f32 %v3265_v14, 0.0 }
 0x317   :  { %v5301_v50 = vpop.f32.mrf.mxu1 }
 0x318   :  { %v3268_v2 = vadd.f32 %v5300_v53, %v6902_v25 }
 0x319   :  { %v5302_v54 = vpop.f32.mrf.mxu1 }
 0x31a   :  { %v3368_v9 = vmax.f32 %v3268_v2, 0.0  ;;  %v5303_v41 = vadd.f32 %v5302_v54, %v5301_v50 }
 0x31b   :  { %v5304_v45 = vpop.f32.mrf.mxu1 }
 0x31c   :  { %v3395_v51 = vpack.c.bf16 %v3368_v9, %v3367_v12  ;;  %v3273_v29 = vadd.f32 %v5303_v41, %v6902_v25 }
 0x31d   :  { %v5305_v63 = vpop.f32.mrf.mxu1 }
 0x31e   :  { %v5306_v30 = vadd.f32 %v5305_v63, %v5304_v45  ;;  %5439 = vmatprep.mubr.msk.bf16.mxu0 %vm3446_vm0, %v3395_v51  ;;  %v3369_v43 = vmax.f32 %v3273_v29, 0.0 }
 0x31f   :  { %v5307_v16 = vpop.f32.mrf.mxu1 }
 0x320   :  { %v3276_v35 = vadd.f32 %v5306_v30, %v6902_v25 }
 0x321   :  { %v5308_v46 = vpop.f32.mrf.mxu1 }
 0x322   :  { %v3370_v20 = vmax.f32 %v3276_v35, 0.0  ;;  %v5309_v15 = vadd.f32 %v5308_v46, %v5307_v16 }
 0x323   :  { %v5310_v56 = vpop.f32.mrf.mxu1 }
 0x324   :  { %v3396_v36 = vpack.c.bf16 %v3370_v20, %v3369_v43  ;;  %v3281_v3 = vadd.f32 %v5309_v15, %v6902_v25 }
 0x325   :  { %v5311_v33 = vpop.f32.mrf.mxu1 }
 0x326   :  { %v5312_v60 = vadd.f32 %v5311_v33, %v5310_v56  ;;  %5440 = vmatmul.mubr.msk.bf16.gmra.mxu0 %vm3446_vm0, %v3396_v36  ;;  %v3371_v8 = vmax.f32 %v3281_v3, 0.0 }
 0x327   :  { %v5313_v31 = vpop.f32.mrf.mxu1 }
 0x328   :  { %v3284_v48 = vadd.f32 %v5312_v60, %v6902_v25 }
 0x329   :  { %v5314_v27 = vpop.f32.mrf.mxu1 }
 0x32a   :  { %v3372_v34 = vmax.f32 %v3284_v48, 0.0  ;;  %v5315_v61 = vadd.f32 %v5314_v27, %v5313_v31 }
 0x32b   :  { %v5316_v17 = vpop.f32.mrf.mxu1 }
 0x32c   :  { %v3397_v52 = vpack.c.bf16 %v3372_v34, %v3371_v8  ;;  %v3289_v21 = vadd.f32 %v5315_v61, %v6902_v25 }
 0x32d   :  { %v5317_v38 = vpop.f32.mrf.mxu1 }
 0x32e   :  { %v5318_v7 = vadd.f32 %v5317_v38, %v5316_v17  ;;  %5443 = vmatprep.mubr.msk.bf16.mxu0 %vm3446_vm0, %v3397_v52  ;;  %v3373_v6 = vmax.f32 %v3289_v21, 0.0 }
 0x32f   :  { %v5319_v59 = vpop.f32.mrf.mxu1 }
 0x330   :  { %v3292_v5 = vadd.f32 %v5318_v7, %v6902_v25 }
 0x331   :  { %v5320_v28 = vpop.f32.mrf.mxu1 }
 0x332   :  { %v3374_v57 = vmax.f32 %v3292_v5, 0.0  ;;  %v5321_v24 = vadd.f32 %v5320_v28, %v5319_v59 }
 0x333   :  { %v5322_v40 = vpop.f32.mrf.mxu1 }
 0x334   :  { %v3398_v18 = vpack.c.bf16 %v3374_v57, %v3373_v6  ;;  %v3297_v11 = vadd.f32 %v5321_v24, %v6902_v25 }
 0x335   :  { %v5323_v44 = vpop.f32.mrf.mxu1 }
 0x336   :  { %v5324_v47 = vadd.f32 %v5323_v44, %v5322_v40  ;;  %5444 = vmatmul.mubr.msk.bf16.gmra.mxu0 %vm3446_vm0, %v3398_v18  ;;  %v3375_v19 = vmax.f32 %v3297_v11, 0.0 }
 0x337   :  { %v5325_v10 = vpop.f32.mrf.mxu1 }
 0x338   :  { %v3300_v23 = vadd.f32 %v5324_v47, %v6902_v25 }
 0x339   :  { %v5326_v26 = vpop.f32.mrf.mxu1 }
 0x33a   :  { %v3376_v32 = vmax.f32 %v3300_v23, 0.0  ;;  %v5327_v39 = vadd.f32 %v5326_v26, %v5325_v10 }
 0x33b   :  { %v5328_v58 = vpop.f32.mrf.mxu1 }
 0x33c   :  { %v3399_v13 = vpack.c.bf16 %v3376_v32, %v3375_v19  ;;  %v3305_v0 = vadd.f32 %v5327_v39, %v6902_v25 }
 0x33d   :  { %v5329_v4 = vpop.f32.mrf.mxu1 }
 0x33e   :  { %v5330_v62 = vadd.f32 %v5329_v4, %v5328_v58  ;;  %5447 = vmatprep.mubr.msk.bf16.mxu0 %vm3446_vm0, %v3399_v13  ;;  %v3377_v42 = vmax.f32 %v3305_v0, 0.0 }
 0x33f   :  { %v5331_v55 = vpop.f32.mrf.mxu1 }
 0x340   :  { %v3308_v1 = vadd.f32 %v5330_v62, %v6902_v25 }
 0x341   :  { %v5332_v22 = vpop.f32.mrf.mxu1 }
 0x342   :  { %v3378_v37 = vmax.f32 %v3308_v1, 0.0  ;;  %v5333_v49 = vadd.f32 %v5332_v22, %v5331_v55 }
 0x343   :  { %v5334_v14 = vpop.f32.mrf.mxu1 }
 0x344   :  { %v3400_v53 = vpack.c.bf16 %v3378_v37, %v3377_v42  ;;  %v3313_v2 = vadd.f32 %v5333_v49, %v6902_v25 }
 0x345   :  { %v5335_v50 = vpop.f32.mrf.mxu1 }
 0x346   :  { %v5336_v54 = vadd.f32 %v5335_v50, %v5334_v14  ;;  %5448 = vmatmul.mubr.msk.bf16.gmra.mxu0 %vm3446_vm0, %v3400_v53  ;;  %v3379_v45 = vmax.f32 %v3313_v2, 0.0  ;;  %v6964_v50 = vld [vmem:[%s7056_s8] ss:$0 sm:$0xff] }
 0x347   :  { %v5337_v12 = vpop.f32.mrf.mxu1 }
 0x348   :  { %v3316_v9 = vadd.f32 %v5336_v54, %v6902_v25 }
 0x349   :  { %v5338_v41 = vpop.f32.mrf.mxu1 }
 0x34a   :  { %v3380_v51 = vmax.f32 %v3316_v9, 0.0  ;;  %v5339_v63 = vadd.f32 %v5338_v41, %v5337_v12 }
 0x34b   :  { %v5340_v29 = vpop.f32.mrf.mxu1 }
 0x34c   :  { %v3401_v30 = vpack.c.bf16 %v3380_v51, %v3379_v45  ;;  %v3321_v35 = vadd.f32 %v5339_v63, %v6902_v25 }
 0x34d   :  { %v5341_v16 = vpop.f32.mrf.mxu1 }
 0x34e   :  { %v5342_v46 = vadd.f32 %v5341_v16, %v5340_v29  ;;  %5451 = vmatprep.mubr.msk.bf16.mxu0 %vm3446_vm0, %v3401_v30  ;;  %v3381_v56 = vmax.f32 %v3321_v35, 0.0 }
 0x34f   :  { %v5343_v43 = vpop.f32.mrf.mxu1 }
 0x350   :  { %v3324_v20 = vadd.f32 %v5342_v46, %v6902_v25 }
 0x351   :  { %v5344_v15 = vpop.f32.mrf.mxu1 }
 0x352   :  { %v3382_v36 = vmax.f32 %v3324_v20, 0.0  ;;  %v5345_v33 = vadd.f32 %v5344_v15, %v5343_v43 }
 0x353   :  { %v5346_v3 = vpop.f32.mrf.mxu1 }
 0x354   :  { %v3402_v60 = vpack.c.bf16 %v3382_v36, %v3381_v56  ;;  %v3329_v48 = vadd.f32 %v5345_v33, %v6902_v25 }
 0x355   :  { %v5347_v31 = vpop.f32.mrf.mxu1 }
 0x356   :  { %v5348_v27 = vadd.f32 %v5347_v31, %v5346_v3  ;;  %5452 = vmatmul.mubr.msk.bf16.gmra.mxu0 %vm3446_vm0, %v3402_v60  ;;  %v3383_v17 = vmax.f32 %v3329_v48, 0.0 }
 0x357   :  { %v5349_v8 = vpop.f32.mrf.mxu1 }
 0x358   :  { %v3332_v34 = vadd.f32 %v5348_v27, %v6902_v25 }
 0x359   :  { %v5350_v61 = vpop.f32.mrf.mxu1 }
 0x35a   :  { %v3384_v52 = vmax.f32 %v3332_v34, 0.0  ;;  %v5351_v38 = vadd.f32 %v5350_v61, %v5349_v8 }
 0x35b   :  { %v5352_v21 = vpop.f32.mrf.mxu1 }
 0x35c   :  { %v3403_v7 = vpack.c.bf16 %v3384_v52, %v3383_v17  ;;  %v3337_v5 = vadd.f32 %v5351_v38, %v6902_v25 }
 0x35d   :  { %v5353_v59 = vpop.f32.mrf.mxu1 }
 0x35e   :  { %v5354_v28 = vadd.f32 %v5353_v59, %v5352_v21  ;;  %5455 = vmatprep.mubr.msk.bf16.mxu0 %vm3446_vm0, %v3403_v7  ;;  %v3385_v40 = vmax.f32 %v3337_v5, 0.0 }
 0x35f   :  { %v5355_v6 = vpop.f32.mrf.mxu1 }
 0x360   :  { %v3340_v57 = vadd.f32 %v5354_v28, %v6902_v25 }
 0x361   :  { %v5356_v24 = vpop.f32.mrf.mxu1 }
 0x362   :  { %v3386_v18 = vmax.f32 %v3340_v57, 0.0  ;;  %v5357_v44 = vadd.f32 %v5356_v24, %v5355_v6 }
 0x363   :  { %v5358_v11 = vpop.f32.mrf.mxu1 }
 0x364   :  { %v3404_v47 = vpack.c.bf16 %v3386_v18, %v3385_v40  ;;  %v3345_v23 = vadd.f32 %v5357_v44, %v6902_v25 }
 0x365   :  { %v5359_v10 = vpop.f32.mrf.mxu1 }
 0x366   :  { %v5360_v26 = vadd.f32 %v5359_v10, %v5358_v11  ;;  %5456 = vmatmul.mubr.msk.bf16.gmra.mxu0 %vm3446_vm0, %v3404_v47  ;;  %v3387_v58 = vmax.f32 %v3345_v23, 0.0 }
 0x367   :  { %v5361_v19 = vpop.f32.mrf.mxu1 }
 0x368   :  { %v3348_v32 = vadd.f32 %v5360_v26, %v6902_v25 }
 0x369   :  { %v5362_v39 = vpop.f32.mrf.mxu1 }
 0x36a   :  { %v3388_v13 = vmax.f32 %v3348_v32, 0.0  ;;  %v5363_v4 = vadd.f32 %v5362_v39, %v5361_v19 }
 0x36b   :  { %v5364_v0 = vpop.f32.mrf.mxu1 }
 0x36c   :  { %v3405_v62 = vpack.c.bf16 %v3388_v13, %v3387_v58  ;;  %v3353_v1 = vadd.f32 %v5363_v4, %v6902_v25 }
 0x36d   :  { %v5365_v55 = vpop.f32.mrf.mxu1 }
 0x36e   :  { %v5366_v22 = vadd.f32 %v5365_v55, %v5364_v0  ;;  %5459 = vmatprep.mubr.msk.bf16.mxu0 %vm3446_vm0, %v3405_v62  ;;  %v3389_v37 = vmax.f32 %v3353_v1, 0.0 }
 0x370   :  { %v3356_v42 = vadd.f32 %v5366_v22, %v6902_v25 }
 0x372   :  { %v3390_v49 = vmax.f32 %v3356_v42, 0.0 }
 0x374   :  { %v3406_v14 = vpack.c.bf16 %v3390_v49, %v3389_v37 }
 0x376   :  { %5460 = vmatmul.mubr.msk.bf16.gmra.mxu0 %vm3446_vm0, %v3406_v14 }
 0x3c6   :  { %v5433_v53 = vpop.f32.mrf.mxu0 }
 0x3c7   :  { %v3538_v41 = vadd.f32 %v5433_v53, %v6964_v50 }
 0x3c8   :  { %v3529_v2 = vpop.f32.mrf.mxu0 }
 0x3c9   :  { %v3530_v54 = vadd.f32 %v6964_v50, %v3529_v2  ;;  %v3658_v29 = vmax.f32 %v3538_v41, 0.0 }
 0x3ca   :  { %v5434_v12 = vpop.f32.mrf.mxu0 }
 0x3cb   :  { %v3656_v9 = vmax.f32 %v3530_v54, 0.0  ;;  %v3541_v51 = vadd.f32 %v5434_v12, %v6964_v50 }
 0x3cc   :  { %v3532_v25 = vpop.f32.mrf.mxu0 }
 0x3cd   :  { %v3533_v45 = vadd.f32 %v6964_v50, %v3532_v25  ;;  %5471 = vmatprep.mubr.msk.f32.mxu1 %vm3699_vm1, %v3656_v9  ;;  %v3659_v30 = vmax.f32 %v3541_v51, 0.0 }
 0x3cf   :  { %v3657_v63 = vmax.f32 %v3533_v45, 0.0 }
 0x3d1   :  { %5472 = vmatmul.mubr.msk.f32.vlgmr.msra.gmra.mxu1 %vm3699_vm1, %v3657_v63 }
 0x3d2   :  { %5474 = vmatprep.mubr.msk.f32.mxu1 %vm3699_vm1, %v3658_v29 }
 0x3d5   :  { %5475 = vmatmul.mubr.msk.f32.gmra.mxu1 %vm3699_vm1, %v3659_v30 }
 0x3d6   :  { %v5437_v16 = vpop.f32.mrf.mxu0 }
 0x3d7   :  { %v3554_v15 = vadd.f32 %v5437_v16, %v6964_v50 }
 0x3d8   :  { %v3545_v35 = vpop.f32.mrf.mxu0 }
 0x3d9   :  { %v3546_v46 = vadd.f32 %v6964_v50, %v3545_v35  ;;  %v3662_v60 = vmax.f32 %v3554_v15, 0.0 }
 0x3da   :  { %v5438_v43 = vpop.f32.mrf.mxu0 }
 0x3db   :  { %v3660_v20 = vmax.f32 %v3546_v46, 0.0  ;;  %v3557_v33 = vadd.f32 %v5438_v43, %v6964_v50 }
 0x3dc   :  { %v3548_v56 = vpop.f32.mrf.mxu0 }
 0x3dd   :  { %v3549_v36 = vadd.f32 %v6964_v50, %v3548_v56  ;;  %5477 = vmatprep.mubr.msk.f32.mxu1 %vm3699_vm1, %v3660_v20  ;;  %v3663_v31 = vmax.f32 %v3557_v33, 0.0 }
 0x3df   :  { %v3661_v3 = vmax.f32 %v3549_v36, 0.0 }
 0x3e1   :  { %5478 = vmatmul.mubr.msk.f32.gmra.mxu1 %vm3699_vm1, %v3661_v3 }
 0x3e2   :  { %5480 = vmatprep.mubr.msk.f32.mxu1 %vm3699_vm1, %v3662_v60 }
 0x3e5   :  { %5481 = vmatmul.mubr.msk.f32.gmra.mxu1 %vm3699_vm1, %v3663_v31 }
 0x3e6   :  { %v5441_v48 = vpop.f32.mrf.mxu0 }
 0x3e7   :  { %v3570_v17 = vadd.f32 %v5441_v48, %v6964_v50 }
 0x3e8   :  { %v3561_v27 = vpop.f32.mrf.mxu0 }
 0x3e9   :  { %v3562_v8 = vadd.f32 %v6964_v50, %v3561_v27  ;;  %v3666_v59 = vmax.f32 %v3570_v17, 0.0 }
 0x3ea   :  { %v5442_v34 = vpop.f32.mrf.mxu0 }
 0x3eb   :  { %v3664_v61 = vmax.f32 %v3562_v8, 0.0  ;;  %v3573_v21 = vadd.f32 %v5442_v34, %v6964_v50 }
 0x3ec   :  { %v3564_v52 = vpop.f32.mrf.mxu0 }
 0x3ed   :  { %v3565_v38 = vadd.f32 %v6964_v50, %v3564_v52  ;;  %5483 = vmatprep.mubr.msk.f32.mxu1 %vm3699_vm1, %v3664_v61  ;;  %v3667_v5 = vmax.f32 %v3573_v21, 0.0 }
 0x3ef   :  { %v3665_v7 = vmax.f32 %v3565_v38, 0.0 }
 0x3f1   :  { %5484 = vmatmul.mubr.msk.f32.gmra.mxu1 %vm3699_vm1, %v3665_v7 }
 0x3f2   :  { %5486 = vmatprep.mubr.msk.f32.mxu1 %vm3699_vm1, %v3666_v59  ;;  %v5222_v59 = vld [vmem:[#allocation2] ss:$0 sm:$0xff] }
 0x3f5   :  { %5487 = vmatmul.mubr.msk.f32.gmra.mxu1 %vm3699_vm1, %v3667_v5 }
 0x3f6   :  { %v5445_v28 = vpop.f32.mrf.mxu0 }
 0x3f7   :  { %v3586_v18 = vadd.f32 %v5445_v28, %v6964_v50 }
 0x3f8   :  { %v3577_v6 = vpop.f32.mrf.mxu0 }
 0x3f9   :  { %v3578_v57 = vadd.f32 %v6964_v50, %v3577_v6  ;;  %v3670_v23 = vmax.f32 %v3586_v18, 0.0 }
 0x3fa   :  { %v5446_v24 = vpop.f32.mrf.mxu0 }
 0x3fb   :  { %v3668_v40 = vmax.f32 %v3578_v57, 0.0  ;;  %v3589_v47 = vadd.f32 %v5446_v24, %v6964_v50 }
 0x3fc   :  { %v3580_v44 = vpop.f32.mrf.mxu0 }
 0x3fd   :  { %v3581_v11 = vadd.f32 %v6964_v50, %v3580_v44  ;;  %5489 = vmatprep.mubr.msk.f32.mxu1 %vm3699_vm1, %v3668_v40  ;;  %v3671_v26 = vmax.f32 %v3589_v47, 0.0 }
 0x3ff   :  { %v3669_v10 = vmax.f32 %v3581_v11, 0.0 }
 0x401   :  { %5490 = vmatmul.mubr.msk.f32.gmra.mxu1 %vm3699_vm1, %v3669_v10 }
 0x402   :  { %5492 = vmatprep.mubr.msk.f32.mxu1 %vm3699_vm1, %v3670_v23 }
 0x405   :  { %5493 = vmatmul.mubr.msk.f32.gmra.mxu1 %vm3699_vm1, %v3671_v26  ;;  %v4801_v26 = vld [vmem:[%s7050_s2] sm:$0x3]  ;;  %s6106_s2 = smov [#allocation8]  }
 0x406   :  { %v5449_v19 = vpop.f32.mrf.mxu0  ;;  %s4854_s17 = sshll.u32 %s6106_s2, 4  ;;  %s4855_s17 = int_to_ptr.vmem [resolvable:$true] %s4854_s17 }
 0x407   :  { %v3602_v4 = vadd.f32 %v5449_v19, %v6964_v50  ;;  %s6074_s19 = scalar_lea.vmem %s4855_s17, 128  ;;  %p6079_p11 = scmp.lt.s32.totalorder %s4855_s17, %s4855_s17 }
 0x408   :  { %v3593_v32 = vpop.f32.mrf.mxu0  ;;  %p6075_p10 = scmp.ne.s32.totalorder %s4855_s17, %s6074_s19  ;;  %p6080_p12 = scmp.lt.s32.totalorder %s6074_s19, %s6074_s19 }
 0x409   :  { %v3594_v39 = vadd.f32 %v6964_v50, %v3593_v32  ;;  %v3674_v22 = vmax.f32 %v3602_v4, 0.0 }
 0x40a   :  { %v5450_v58 = vpop.f32.mrf.mxu0  ;;  %p6081_p13 = por %p6080_p12, %p6079_p11 }
 0x40b   :  { %v3672_v13 = vmax.f32 %v3594_v39, 0.0  ;;  %v3605_v55 = vadd.f32 %v5450_v58, %v6964_v50  ;;  %v4809_v39 = vsub.f32 1.0, %v4801_v26 }
 0x40c   :  { %v3596_v0 = vpop.f32.mrf.mxu0  ;;  %p6082_p0 = pnand %p6081_p13, %p6075_p10 }
 0x40d   :  { %v3597_v62 = vadd.f32 %v6964_v50, %v3596_v0  ;;  %5495 = vmatprep.mubr.msk.f32.mxu1 %vm3699_vm1, %v3672_v13  ;;  %v3675_v42 = vmax.f32 %v3605_v55, 0.0  ;;  %v7221_v13 = vlaneseq  ;;  %v4021_v0 = vld [vmem:[%s7049_s1] sm:$0xff] }
 0x40f   :  { %v3673_v1 = vmax.f32 %v3597_v62, 0.0  ;;  %v7034_v4 = vand.u32 127, %v7221_v13 }
 0x411   :  { %5496 = vmatmul.mubr.msk.f32.gmra.mxu1 %vm3699_vm1, %v3673_v1  ;;  %v7222_v1 = vld [vmem:[#allocation12_spill] sm:$0xff]  ;;  %vm4807_vm2 = vcmp.lt.s32.totalorder %v7034_v4, 8  ;;  %vm4841_vm7 = vcmp.eq.s32.totalorder %v7034_v4, 1  ;;  %vm4839_vm8 = vcmp.eq.s32.totalorder %v7034_v4, 0 }
 0x412   :  { %5498 = vmatprep.mubr.msk.f32.mxu1 %vm3699_vm1, %v3674_v22  ;;  %v7223_v22 = vsub.s32 0, %v7222_v1  ;;  %vm4838_vm6 = vcmp.eq.s32.totalorder %v7222_v1, 0 }
 0x413   :  { %vm4842_vm9 = vmand %vm4838_vm6, %vm4841_vm7 }
 0x414   :  { %vm4840_vm10 = vmand %vm4838_vm6, %vm4839_vm8 }
 0x415   :  { %5499 = vmatmul.mubr.msk.f32.gmra.mxu1 %vm3699_vm1, %v3675_v42  ;;  %v4814_v42 = vrot.slane %v4809_v39, %v7223_v22 }
 0x416   :  { %v5453_v37 = vpop.f32.mrf.mxu0 }
 0x417   :  { %v3618_v54 = vadd.f32 %v5453_v37, %v6964_v50 }
 0x418   :  { %v3609_v49 = vpop.f32.mrf.mxu0 }
 0x419   :  { %v3610_v14 = vadd.f32 %v6964_v50, %v3609_v49  ;;  %v3678_v45 = vmax.f32 %v3618_v54, 0.0 }
 0x41a   :  { %v5454_v53 = vpop.f32.mrf.mxu0 }
 0x41b   :  { %v3676_v2 = vmax.f32 %v3610_v14, 0.0  ;;  %v3621_v41 = vadd.f32 %v5454_v53, %v6964_v50 }
 0x41c   :  { %v3612_v12 = vpop.f32.mrf.mxu0 }
 0x41d   :  { %v3613_v9 = vadd.f32 %v6964_v50, %v3612_v12  ;;  %5501 = vmatprep.mubr.msk.f32.mxu1 %vm3699_vm1, %v3676_v2  ;;  %v3679_v51 = vmax.f32 %v3621_v41, 0.0 }
 0x41f   :  { %v3677_v25 = vmax.f32 %v3613_v9, 0.0  ;;  %v4821_v9 = vsel %vm4807_vm2, %v4814_v42, 0.0 }
 0x421   :  { %5502 = vmatmul.mubr.msk.f32.gmra.mxu1 %vm3699_vm1, %v3677_v25 }
 0x422   :  { %5504 = vmatprep.mubr.msk.f32.mxu1 %vm3699_vm1, %v3678_v45 }
 0x425   :  { %5505 = vmatmul.mubr.msk.f32.gmra.mxu1 %vm3699_vm1, %v3679_v51  ;;  %v4823_v51 = vmul.f32 %v4821_v9, %v4821_v9 }
 0x426   :  { %v5457_v63 = vpop.f32.mrf.mxu0 }
 0x427   :  { %v3634_v46 = vadd.f32 %v5457_v63, %v6964_v50 }
 0x428   :  { %v3625_v29 = vpop.f32.mrf.mxu0 }
 0x429   :  { %v3626_v30 = vadd.f32 %v6964_v50, %v3625_v29  ;;  %v3682_v36 = vmax.f32 %v3634_v46, 0.0 }
 0x42a   :  { %v5458_v16 = vpop.f32.mrf.mxu0 }
 0x42b   :  { %v3680_v35 = vmax.f32 %v3626_v30, 0.0  ;;  %v3637_v15 = vadd.f32 %v5458_v16, %v6964_v50  ;;  %v4826_v30 = vsel %vm4825_vm5, %v4823_v51, 0.0 }
 0x42c   :  { %v3628_v43 = vpop.f32.mrf.mxu0 }
 0x42d   :  { %v3629_v20 = vadd.f32 %v6964_v50, %v3628_v43  ;;  %5507 = vmatprep.mubr.msk.f32.mxu1 %vm3699_vm1, %v3680_v35  ;;  %v3683_v33 = vmax.f32 %v3637_v15, 0.0 }
 0x42f   :  { %v3681_v56 = vmax.f32 %v3629_v20, 0.0 }
 0x431   :  { %5508 = vmatmul.mubr.msk.f32.gmra.mxu1 %vm3699_vm1, %v3681_v56 }
 0x432   :  { %5510 = vmatprep.mubr.msk.f32.mxu1 %vm3699_vm1, %v3682_v36 }
 0x435   :  { %5511 = vmatmul.mubr.msk.f32.gmra.mxu1 %vm3699_vm1, %v3683_v33 }
 0x436   :  { %v5461_v3 = vpop.f32.mrf.mxu0 }
 0x437   :  { %v3650_v8 = vadd.f32 %v5461_v3, %v6964_v50 }
 0x438   :  { %v3641_v60 = vpop.f32.mrf.mxu0 }
 0x439   :  { %v3642_v31 = vadd.f32 %v6964_v50, %v3641_v60  ;;  %v3686_v38 = vmax.f32 %v3650_v8, 0.0 }
 0x43a   :  { %v5462_v48 = vpop.f32.mrf.mxu0 }
 0x43b   :  { %v3684_v27 = vmax.f32 %v3642_v31, 0.0  ;;  %v3653_v17 = vadd.f32 %v5462_v48, %v6964_v50 }
 0x43c   :  { %v3644_v34 = vpop.f32.mrf.mxu0 }
 0x43d   :  { %v3645_v61 = vadd.f32 %v6964_v50, %v3644_v34  ;;  %5513 = vmatprep.mubr.msk.f32.mxu1 %vm3699_vm1, %v3684_v27  ;;  %v3687_v21 = vmax.f32 %v3653_v17, 0.0 }
 0x43f   :  { %v3685_v52 = vmax.f32 %v3645_v61, 0.0 }
 0x441   :  { %5514 = vmatmul.mubr.msk.f32.gmra.mxu1 %vm3699_vm1, %v3685_v52 }
 0x442   :  { %5516 = vmatprep.mubr.msk.f32.mxu1 %vm3699_vm1, %v3686_v38 }
 0x445   :  { %5517 = vmatmul.mubr.msk.f32.gmra.mxu1 %vm3699_vm1, %v3687_v21 }
 0x491   :  { %v5473_v7 = vpop.f32.mrf.mxu1 }
 0x493   :  { %v3862_v5 = vpop.f32.mrf.mxu1 }
 0x494   :  { %v3863_v28 = vadd.f32 %v5222_v59, %v3862_v5 }
 0x495   :  { %v5476_v6 = vpop.f32.mrf.mxu1 }
 0x496   :  { %v4149_v57 = vand.u32 2147483647, %v3863_v28  ;;  %v4053_v37 = vmax.f32 %v3863_v28, 0.0  ;;  %v4085_v49 = vmul.f32 %v4021_v0, %v3863_v28 }
 0x497   :  { %v3872_v24 = vpop.f32.mrf.mxu1 }
 0x498   :  { %v4181_v40 = vsub.f32 0.0, %v4149_v57  ;;  %v4117_v41 = vsub.f32 %v4053_v37, %v4085_v49 }
 0x49a   :  { %v4213_v18 = vmul.f32 1.442695, %v4181_v40 }
 0x49c   :  { %6030 = vpow2.f32 %v4213_v18 }
 0x4a1   :  { %v5479_v50 = vpop.f32.mrf.mxu1 }
 0x4a3   :  { %v3882_v44 = vpop.f32.mrf.mxu1 }
 0x4a5   :  { %v5482_v11 = vpop.f32.mrf.mxu1 }
 0x4a7   :  { %v3892_v47 = vpop.f32.mrf.mxu1 }
 0x4a9   :  { %v6031_v10 = vpop.eup %6030 }
 0x4aa   :  { %v4277_v23 = vadd.f32 1.0, %v6031_v10  ;;  %v4280_v32 = vmul.f32 -0.5, %v6031_v10  ;;  %v4283_v53 = vand.u32 2147483647, %v6031_v10 }
 0x4ac   :  { %6032 = vlog2.f32 %v4277_v23  ;;  %v4281_v55 = vadd.f32 1.0, %v4280_v32  ;;  %vm4284_vm3 = vcmp.lt.f32.partialorder %v4283_v53, 0.0004427343 }
 0x4ae   :  { %v4282_v12 = vmul.f32 %v6031_v10, %v4281_v55 }
 0x4b1   :  { %v5485_v19 = vpop.f32.mrf.mxu1 }
 0x4b3   :  { %v3902_v58 = vpop.f32.mrf.mxu1 }
 0x4b5   :  { %v5488_v62 = vpop.f32.mrf.mxu1 }
 0x4b7   :  { %v3912_v14 = vpop.f32.mrf.mxu1 }
 0x4b9   :  { %v6033_v2 = vpop.eup %6032 }
 0x4ba   :  { %v4279_v54 = vmul.f32 0.6931472, %v6033_v2 }
 0x4bc   :  { %v4285_v25 = vsel %vm4284_vm3, %v4282_v12, %v4279_v54 }
 0x4bd   :  { %v4565_v45 = vadd.f32 %v4285_v25, %v4117_v41 }
 0x4bf   :  { %v4729_v63 = vsel %vm4728_vm4, %v4565_v45, 0.0 }
 0x4c0   :  { %4792 = vadd.xlane.f32.xlu0 %v4729_v63 }
 0x4c1   :  { %v5491_v29 = vpop.f32.mrf.mxu1 }
 0x4c3   :  { %v3922_v16 = vpop.f32.mrf.mxu1 }
 0x4c4   :  { %4829 = vadd.xlane.f32.xlu0 %v4826_v30 }
 0x4c5   :  { %v5494_v35 = vpop.f32.mrf.mxu1 }
 0x4c7   :  { %v3932_v46 = vpop.f32.mrf.mxu1 }
 0x4d1   :  { %v5497_v43 = vpop.f32.mrf.mxu1 }
 0x4d3   :  { %v3942_v20 = vpop.f32.mrf.mxu1 }
 0x4d5   :  { %v5500_v15 = vpop.f32.mrf.mxu1 }
 0x4d7   :  { %v3952_v56 = vpop.f32.mrf.mxu1 }
 0x4e1   :  { %v5503_v36 = vpop.f32.mrf.mxu1 }
 0x4e3   :  { %v3962_v33 = vpop.f32.mrf.mxu1 }
 0x4e5   :  { %v5506_v3 = vpop.f32.mrf.mxu1 }
 0x4e7   :  { %v3972_v60 = vpop.f32.mrf.mxu1 }
 0x4f1   :  { %v5509_v31 = vpop.f32.mrf.mxu1 }
 0x4f3   :  { %v3982_v48 = vpop.f32.mrf.mxu1 }
 0x4f5   :  { %v5512_v27 = vpop.f32.mrf.mxu1 }
 0x4f7   :  { %v3992_v8 = vpop.f32.mrf.mxu1 }
 0x501   :  { %v5515_v34 = vpop.f32.mrf.mxu1 }
 0x503   :  { %v4002_v61 = vpop.f32.mrf.mxu1 }
 0x505   :  { %v5518_v17 = vpop.f32.mrf.mxu1 }
 0x507   :  { %v4012_v52 = vpop.f32.mrf.mxu1 }
 0x549   :  { %v4793_v38 = vpop.xlane.xlu0 %4792 }
 0x54a   :  { %v4794_v21 = vrot.slane %v4793_v38, 4 }
 0x54c   :  { %v4795_v7 = vadd.f32 %v4794_v21, %v4793_v38 }
 0x54d   :  { %v4830_v59 = vpop.xlane.xlu0 %4829 }
 0x54e   :  { %v4796_v5 = vrot.slane %v4795_v7, 2  ;;  %v4831_v28 = vrot.slane %v4830_v59, 4 }
 0x550   :  { %v4832_v6 = vadd.f32 %v4831_v28, %v4830_v59  ;;  %v4797_v57 = vadd.f32 %v4796_v5, %v4795_v7 }
 0x552   :  { %v4833_v24 = vrot.slane %v4832_v6, 2  ;;  %v4798_v40 = vrot.slane %v4797_v57, 1 }
 0x554   :  { %v4834_v18 = vadd.f32 %v4833_v24, %v4832_v6  ;;  %v4799_v50 = vadd.f32 %v4798_v40, %v4797_v57 }
 0x556   :  { %5519 = vpush %v4799_v50  ;;  %v4835_v44 = vrot.slane %v4834_v18, 1 }
 0x558   :  { %v4836_v11 = vadd.f32 %v4835_v44, %v4834_v18 }
 0x55a   :  { %5521 = vpush %v4836_v11 }
 0x587   :  { %s5520_s1 = spop %5519 }
 0x588   :  { %v4845_v10 = vstv %s5520_s1 }
 0x58b   :  { %s5522_s18 = spop %5521 }
 0x58c   :  { %v4843_v47 = vstv %s5522_s18 }
 0x58d   :  { %v4844_v23 = vsel %vm4842_vm9, %v4843_v47, 0.0 }
 0x58e   :  { %v4846_v26 = vsel %vm4840_vm10, %v4845_v10, %v4844_v23 }
 0x58f   :  { %4847 = vst [vmem:[#allocation8] sm:$0xff] %v4846_v26 }
 0x590   :  { %6085 = shalt.err (!%p6082_p0)
}
 0x591   :  { %4857 = dma.vmem_to_hbm [thread:$0]  %s4855_s17, 128, %s7059_s11, [#allocation5]  }
 0x592   :  { %6098 = dma.done.wait [#allocation5], 128  }
 0x593   :  { %6099 = vsyncadd [#allocation5], 4294967168 }
 0x594   :  { %4861 = vsyncpa [#allocation4], 1 }
 0x595   :  { %4862 = vsyncpa [#allocation7], 1 }
 0x596   :  { %4863 = vsyncpa [#allocation5], 1 }

</bundles_post_ra>
